<compile_context>
chip_gen: v6e
topology: v6e:2x2x1
jax: 0.10.0
libtpu: 0.0.40
codegen_flags: <defaults>
</compile_context>

<pallas_src>
import functools

import jax
import jax.numpy as jnp
import numpy as np
from jax import lax
from jax.experimental import pallas as pl
from jax.experimental.pallas import tpu as pltpu

HIDDEN_SIZE = 100
OUTPUT_SIZE = 6
BN_EPS = 1e-5
HP = 128     # padded hidden size (lane-aligned)
OP = 128     # padded FC output lane dim


# ----------------------------- Pallas kernel ------------------------------ #
def lstmnet_kernel(xp_ref, m_ref, w_hh_ref, w_fc_ref, b_fc_ref,
                   out_ref, h_scr, c_scr):
    """Packed-LSTM recurrence (input projection precomputed) + final FC."""
    T = xp_ref.shape[0]
    Hp = h_scr.shape[-1]

    h_scr[...] = jnp.zeros_like(h_scr)
    c_scr[...] = jnp.zeros_like(c_scr)

    # TODO(synk): nn.Dropout(p=0.5) is stochastic in train mode; eval-mode
    # identity (and BatchNorm running statistics) are what is implemented here.

    def step(t, carry):
        h = h_scr[...]
        c = c_scr[...]

        # Fused pre-activation for all 4 gates: one MXU dot per timestep.
        pre = xp_ref[t] + jnp.dot(h, w_hh_ref[...],
                                  preferred_element_type=jnp.float32)

        # Lane-aligned gate slices (PyTorch gate order: i, f, g, o).
        i_g = jax.nn.sigmoid(pre[:, 0 * Hp:1 * Hp])
        f_g = jax.nn.sigmoid(pre[:, 1 * Hp:2 * Hp])
        g_g = jnp.tanh(pre[:, 2 * Hp:3 * Hp])
        o_g = jax.nn.sigmoid(pre[:, 3 * Hp:4 * Hp])

        c_new = f_g * c + i_g * g_g
        h_new = o_g * jnp.tanh(c_new)

        # pack_padded_sequence semantics: states freeze once t >= lengths[b].
        m = m_ref[t]                         # (B, Hp) precomputed 0/1 mask
        c_scr[...] = c + m * (c_new - c)
        h_scr[...] = h + m * (h_new - h)
        return carry

    # Static T -> fully unroll so the LLO scheduler can overlap MXU / EUP work
    # across adjacent timesteps.
    lax.fori_loop(0, T, step, 0, unroll=True)

    # out = fc(hidden[-1]); hidden == (h_n, c_n) so hidden[-1] is the CELL state
    # (faithful port of the PyTorch model's quirk).
    out_ref[...] = (jnp.dot(c_scr[...], w_fc_ref[...],
                            preferred_element_type=jnp.float32)
                    + b_fc_ref[...])


# ------------------------------- Wrapper ----------------------------------- #
@jax.jit
def lstmnet_forward(x, lengths, params):
    """x: (B, T, 1) float32 batch-first; lengths: (B,) int32."""
    B, T, _ = x.shape
    H = params["w_hh"].shape[-1]
    O = params["w_fc"].shape[-1]
    Hp, Op = HP, OP

    # ---- fold BatchNorm1d(1) (eval) into the input projection --------------
    a = params["bn_gamma"] * lax.rsqrt(params["bn_var"] + BN_EPS)
    c0 = params["bn_beta"] - params["bn_mean"] * a

    # Zero-pad per-gate input weights / biases H -> Hp, flatten gate-major.
    w_ih_p = jnp.zeros((4, Hp), jnp.float32).at[:, :H].set(params["w_ih"][:, 0, :])
    b_p = jnp.zeros((4, Hp), jnp.float32).at[:, :H].set(params["b"][:, 0, :])
    w_eff = (a * w_ih_p).reshape(1, 1, 4 * Hp)          # bn scale folded in
    b_eff = (c0 * w_ih_p + b_p).reshape(1, 1, 4 * Hp)   # bn shift folded in

    # Precompute the time-parallel input projection: (T, B, 4*Hp), lane-dense.
    x_tm = jnp.transpose(x, (1, 0, 2)).astype(jnp.float32)    # (T, B, 1)
    x_proj = x_tm * w_eff + b_eff

    # Per-step freeze masks from pack_padded_sequence lengths: (T, B, Hp).
    t_idx = jnp.arange(T, dtype=jnp.int32).reshape(T, 1, 1)
    mask = (lengths.reshape(1, B, 1).astype(jnp.int32) > t_idx).astype(jnp.float32)
    mask = jnp.broadcast_to(mask, (T, B, Hp))

    # Fused recurrent weight (Hp, 4*Hp): column block g holds w_hh[g], padded.
    w_hh_p = jnp.zeros((Hp, 4, Hp), jnp.float32)
    w_hh_p = w_hh_p.at[:H, :, :H].set(jnp.transpose(params["w_hh"], (1, 0, 2)))
    w_hh_f = w_hh_p.reshape(Hp, 4 * Hp)

    # Padded FC params (lane-dense output, sliced back below).
    w_fc_p = jnp.zeros((Hp, Op), jnp.float32).at[:H, :O].set(params["w_fc"])
    b_fc_p = jnp.zeros((1, Op), jnp.float32).at[:, :O].set(params["b_fc"])

    out = pl.pallas_call(
        lstmnet_kernel,
        out_shape=jax.ShapeDtypeStruct((B, Op), jnp.float32),
        grid=(1,),
        in_specs=[
            pl.BlockSpec((T, B, 4 * Hp), lambda i: (0, 0, 0)),   # x_proj
            pl.BlockSpec((T, B, Hp), lambda i: (0, 0, 0)),       # freeze masks
            pl.BlockSpec((Hp, 4 * Hp), lambda i: (0, 0)),        # fused w_hh
            pl.BlockSpec((Hp, Op), lambda i: (0, 0)),            # fc weight
            pl.BlockSpec((1, Op), lambda i: (0, 0)),             # fc bias
        ],
        out_specs=pl.BlockSpec((B, Op), lambda i: (0, 0)),
        scratch_shapes=[pltpu.VMEM((B, Hp), jnp.float32),        # h state
                        pltpu.VMEM((B, Hp), jnp.float32)],       # c state
        compiler_params=pltpu.CompilerParams(
            dimension_semantics=("arbitrary",)),
    )(x_proj, mask, w_hh_f, w_fc_p, b_fc_p)

    # PyTorch: fc(c_n) where c_n has shape (num_layers=1, B, H) -> (1, B, O).
    return out[:, :O].reshape(1, B, O)


# --------------------------- Parameter init -------------------------------- #
def init_params(key, hidden_size, output_size):
    H, O = hidden_size, output_size
    ks = jax.random.split(key, 10)
    s = 1.0 / np.sqrt(H)
    u = lambda k, shape: jax.random.uniform(k, shape, jnp.float32, -s, s)
    b_ih = u(ks[2], (4, 1, H))
    b_hh = u(ks[3], (4, 1, H))
    return {
        "w_ih": u(ks[0], (4, 1, H)),      # stacked gate order: i, f, g, o
        "w_hh": u(ks[1], (4, H, H)),
        "b": b_ih + b_hh,
        "w_fc": u(ks[4], (H, O)),
        "b_fc": u(ks[5], (1, O)),
        # BatchNorm1d(1) eval-mode stats / affine (deterministic, non-trivial).
        "bn_mean": jax.random.normal(ks[6], ()) * 0.1,
        "bn_var": jnp.float32(1.0) + jax.random.uniform(ks[7], ()) * 0.5,
        "bn_gamma": jnp.float32(1.0) + jax.random.uniform(ks[8], ()) * 0.3,
        "bn_beta": jax.random.normal(ks[9], ()) * 0.1,
    }


# ----------------------- Pure-JAX reference (check) ------------------------ #
def lstmnet_reference(x, lengths, params):
    B, T, _ = x.shape
    H = params["w_hh"].shape[-1]
    xn = ((x - params["bn_mean"]) * lax.rsqrt(params["bn_var"] + BN_EPS)
          * params["bn_gamma"] + params["bn_beta"])
    w_ih, w_hh, b = params["w_ih"], params["w_hh"], params["b"]
    len2d = lengths.reshape(B, 1).astype(jnp.int32)
    hp = lax.Precision.HIGHEST   # accurate ground truth

    def step(carry, inp):
        h, c = carry
        xt, t = inp
        pre = [xt * w_ih[g] + jnp.dot(h, w_hh[g], precision=hp) + b[g]
               for g in range(4)]
        i = jax.nn.sigmoid(pre[0]); f = jax.nn.sigmoid(pre[1])
        g = jnp.tanh(pre[2]); o = jax.nn.sigmoid(pre[3])
        c_new = f * c + i * g
        h_new = o * jnp.tanh(c_new)
        m = (len2d > t).astype(jnp.float32)
        return (m * h_new + (1 - m) * h, m * c_new + (1 - m) * c), None

    h0 = jnp.zeros((B, H), jnp.float32)
    c0 = jnp.zeros((B, H), jnp.float32)
    (h, c), _ = lax.scan(step, (h0, c0),
                         (jnp.transpose(xn, (1, 0, 2)), jnp.arange(T)))
    out = jnp.dot(c, params["w_fc"], precision=hp) + params["b_fc"]
    return out.reshape(1, B, -1)


# --------------------------------- main ------------------------------------ #
if __name__ == "__main__":
    key = jax.random.PRNGKey(0)
    B, T = 4, 12
    H, O = HIDDEN_SIZE, OUTPUT_SIZE

    kp, kx = jax.random.split(key)
    params = init_params(kp, H, O)
    x = jax.random.normal(kx, (B, T, 1), jnp.float32)          # padded sequences
    lengths = jnp.array([12, 7, 3, 9], dtype=jnp.int32)        # valid lengths

    out = lstmnet_forward(x, lengths, params)
    out = jax.block_until_ready(out)

    ref = lstmnet_reference(x, lengths, params)
    assert out.shape == (1, B, O), out.shape
    # Tolerance accommodates MXU default (bf16-pass) matmul precision in the
    # kernel vs. the HIGHEST-precision reference.
    np.testing.assert_allclose(np.asarray(out), np.asarray(ref),
                               rtol=2e-2, atol=2e-2)
    print("KERNEL_OK")
</pallas_src>

<mosaic_0001>
module attributes {stable_mosaic.version = 11 : i64} {
  func.func @lstmnet_kernel(%arg0: i32, %arg1: memref<12x4x512xf32, #tpu.memory_space<vmem>>, %arg2: memref<12x4x128xf32, #tpu.memory_space<vmem>>, %arg3: memref<128x512xf32, #tpu.memory_space<vmem>>, %arg4: memref<128x128xf32, #tpu.memory_space<vmem>>, %arg5: memref<1x128xf32, #tpu.memory_space<vmem>>, %arg6: memref<4x128xf32, #tpu.memory_space<vmem>>, %arg7: memref<4x128xf32, #tpu.memory_space<vmem>>, %arg8: memref<4x128xf32, #tpu.memory_space<vmem>>) attributes {dimension_semantics = [#tpu.dimension_semantics<arbitrary>], iteration_bounds = array<i64: 1>, scalar_prefetch = 0 : i64, scratch_operands = 2 : i64, tpu.core_type = #tpu.core_type<tc>, window_params = [{pipeline_mode = #tpu.pipeline_mode<synchronous>, transform_indices = @transform_0, window_bounds = array<i64: 12, 4, 512>}, {pipeline_mode = #tpu.pipeline_mode<synchronous>, transform_indices = @transform_1, window_bounds = array<i64: 12, 4, 128>}, {pipeline_mode = #tpu.pipeline_mode<synchronous>, transform_indices = @transform_2, window_bounds = array<i64: 128, 512>}, {pipeline_mode = #tpu.pipeline_mode<synchronous>, transform_indices = @transform_3, window_bounds = array<i64: 128, 128>}, {pipeline_mode = #tpu.pipeline_mode<synchronous>, transform_indices = @transform_4, window_bounds = array<i64: 1, 128>}, {pipeline_mode = #tpu.pipeline_mode<synchronous>, transform_indices = @transform_5, window_bounds = array<i64: 4, 128>}]} {
    %cst = arith.constant 0.000000e+00 : f32
    %0 = vector.broadcast %cst : f32 to vector<4x128xf32>
    %c0 = arith.constant 0 : index
    %c0_0 = arith.constant 0 : index
    %1 = vector.load %arg7[%c0, %c0_0] : memref<4x128xf32, #tpu.memory_space<vmem>>, vector<4x128xf32>
    tpu.vector_store %arg7[%c0, %c0_0], %0 {strides = array<i32>} : memref<4x128xf32, #tpu.memory_space<vmem>>, vector<4x128xf32>,
    %cst_1 = arith.constant 0.000000e+00 : f32
    %2 = vector.broadcast %cst_1 : f32 to vector<4x128xf32>
    %c0_2 = arith.constant 0 : index
    %c0_3 = arith.constant 0 : index
    %3 = vector.load %arg8[%c0_2, %c0_3] : memref<4x128xf32, #tpu.memory_space<vmem>>, vector<4x128xf32>
    tpu.vector_store %arg8[%c0_2, %c0_3], %2 {strides = array<i32>} : memref<4x128xf32, #tpu.memory_space<vmem>>, vector<4x128xf32>,
    %c0_i32 = arith.constant 0 : i32
    %c0_4 = arith.constant 0 : index
    %c0_5 = arith.constant 0 : index
    %4 = vector.load %arg7[%c0_4, %c0_5] : memref<4x128xf32, #tpu.memory_space<vmem>>, vector<4x128xf32>
    %c0_6 = arith.constant 0 : index
    %c0_7 = arith.constant 0 : index
    %5 = vector.load %arg8[%c0_6, %c0_7] : memref<4x128xf32, #tpu.memory_space<vmem>>, vector<4x128xf32>
    %6 = arith.index_cast %c0_i32 : i32 to index
    %c0_8 = arith.constant 0 : index
    %c0_9 = arith.constant 0 : index
    %7 = vector.load %arg1[%6, %c0_8, %c0_9] : memref<12x4x512xf32, #tpu.memory_space<vmem>>, vector<1x4x512xf32>
    %8 = vector.shape_cast %7 : vector<1x4x512xf32> to vector<4x512xf32>
    %c0_10 = arith.constant 0 : index
    %c0_11 = arith.constant 0 : index
    %9 = vector.load %arg3[%c0_10, %c0_11] : memref<128x512xf32, #tpu.memory_space<vmem>>, vector<128x512xf32>
    %cst_12 = arith.constant dense<0.000000e+00> : vector<4x512xf32>
    %10 = tpu.matmul %4, %9, %cst_12 {dimension_numbers = #tpu.dot_dimension_numbers<[1], [0], [0], [1], [0, 0, 1, 1], [], []>} : vector<4x128xf32>, vector<128x512xf32>, vector<4x512xf32> -> vector<4x512xf32>
    %11 = arith.addf %8, %10 : vector<4x512xf32>
    %12 = vector.extract_strided_slice %11 {offsets = [0, 0], sizes = [4, 128], strides = [1, 1]} : vector<4x512xf32> to vector<4x128xf32>
    %13 = arith.negf %12 : vector<4x128xf32>
    %14 = math.exp %13 : vector<4x128xf32>
    %cst_13 = arith.constant 1.000000e+00 : f32
    %15 = vector.broadcast %cst_13 : f32 to vector<4x128xf32>
    %16 = arith.addf %15, %14 : vector<4x128xf32>
    %17 = arith.divf %15, %16 : vector<4x128xf32>
    %18 = vector.extract_strided_slice %11 {offsets = [0, 128], sizes = [4, 128], strides = [1, 1]} : vector<4x512xf32> to vector<4x128xf32>
    %19 = arith.negf %18 : vector<4x128xf32>
    %20 = math.exp %19 : vector<4x128xf32>
    %cst_14 = arith.constant 1.000000e+00 : f32
    %21 = vector.broadcast %cst_14 : f32 to vector<4x128xf32>
    %22 = arith.addf %21, %20 : vector<4x128xf32>
    %23 = arith.divf %21, %22 : vector<4x128xf32>
    %24 = vector.extract_strided_slice %11 {offsets = [0, 256], sizes = [4, 128], strides = [1, 1]} : vector<4x512xf32> to vector<4x128xf32>
    %25 = math.tanh %24 : vector<4x128xf32>
    %26 = vector.extract_strided_slice %11 {offsets = [0, 384], sizes = [4, 128], strides = [1, 1]} : vector<4x512xf32> to vector<4x128xf32>
    %27 = arith.negf %26 : vector<4x128xf32>
    %28 = math.exp %27 : vector<4x128xf32>
    %cst_15 = arith.constant 1.000000e+00 : f32
    %29 = vector.broadcast %cst_15 : f32 to vector<4x128xf32>
    %30 = arith.addf %29, %28 : vector<4x128xf32>
    %31 = arith.divf %29, %30 : vector<4x128xf32>
    %32 = arith.mulf %23, %5 : vector<4x128xf32>
    %33 = arith.mulf %17, %25 : vector<4x128xf32>
    %34 = arith.addf %32, %33 : vector<4x128xf32>
    %35 = math.tanh %34 : vector<4x128xf32>
    %36 = arith.mulf %31, %35 : vector<4x128xf32>
    %37 = arith.index_cast %c0_i32 : i32 to index
    %c0_16 = arith.constant 0 : index
    %c0_17 = arith.constant 0 : index
    %38 = vector.load %arg2[%37, %c0_16, %c0_17] : memref<12x4x128xf32, #tpu.memory_space<vmem>>, vector<1x4x128xf32>
    %39 = vector.shape_cast %38 : vector<1x4x128xf32> to vector<4x128xf32>
    %40 = arith.subf %34, %5 : vector<4x128xf32>
    %41 = arith.mulf %39, %40 : vector<4x128xf32>
    %42 = arith.addf %5, %41 : vector<4x128xf32>
    %c0_18 = arith.constant 0 : index
    %c0_19 = arith.constant 0 : index
    %43 = vector.load %arg8[%c0_18, %c0_19] : memref<4x128xf32, #tpu.memory_space<vmem>>, vector<4x128xf32>
    tpu.vector_store %arg8[%c0_18, %c0_19], %42 {strides = array<i32>} : memref<4x128xf32, #tpu.memory_space<vmem>>, vector<4x128xf32>,
    %44 = arith.subf %36, %4 : vector<4x128xf32>
    %45 = arith.mulf %39, %44 : vector<4x128xf32>
    %46 = arith.addf %4, %45 : vector<4x128xf32>
    %c0_20 = arith.constant 0 : index
    %c0_21 = arith.constant 0 : index
    %47 = vector.load %arg7[%c0_20, %c0_21] : memref<4x128xf32, #tpu.memory_space<vmem>>, vector<4x128xf32>
    tpu.vector_store %arg7[%c0_20, %c0_21], %46 {strides = array<i32>} : memref<4x128xf32, #tpu.memory_space<vmem>>, vector<4x128xf32>,
    %c1_i32 = arith.constant 1 : i32
    %c0_22 = arith.constant 0 : index
    %c0_23 = arith.constant 0 : index
    %48 = vector.load %arg7[%c0_22, %c0_23] : memref<4x128xf32, #tpu.memory_space<vmem>>, vector<4x128xf32>
    %c0_24 = arith.constant 0 : index
    %c0_25 = arith.constant 0 : index
    %49 = vector.load %arg8[%c0_24, %c0_25] : memref<4x128xf32, #tpu.memory_space<vmem>>, vector<4x128xf32>
    %50 = arith.index_cast %c1_i32 : i32 to index
    %c0_26 = arith.constant 0 : index
    %c0_27 = arith.constant 0 : index
    %51 = vector.load %arg1[%50, %c0_26, %c0_27] : memref<12x4x512xf32, #tpu.memory_space<vmem>>, vector<1x4x512xf32>
    %52 = vector.shape_cast %51 : vector<1x4x512xf32> to vector<4x512xf32>
    %c0_28 = arith.constant 0 : index
    %c0_29 = arith.constant 0 : index
    %53 = vector.load %arg3[%c0_28, %c0_29] : memref<128x512xf32, #tpu.memory_space<vmem>>, vector<128x512xf32>
    %cst_30 = arith.constant dense<0.000000e+00> : vector<4x512xf32>
    %54 = tpu.matmul %48, %53, %cst_30 {dimension_numbers = #tpu.dot_dimension_numbers<[1], [0], [0], [1], [0, 0, 1, 1], [], []>} : vector<4x128xf32>, vector<128x512xf32>, vector<4x512xf32> -> vector<4x512xf32>
    %55 = arith.addf %52, %54 : vector<4x512xf32>
    %56 = vector.extract_strided_slice %55 {offsets = [0, 0], sizes = [4, 128], strides = [1, 1]} : vector<4x512xf32> to vector<4x128xf32>
    %57 = arith.negf %56 : vector<4x128xf32>
    %58 = math.exp %57 : vector<4x128xf32>
    %cst_31 = arith.constant 1.000000e+00 : f32
    %59 = vector.broadcast %cst_31 : f32 to vector<4x128xf32>
    %60 = arith.addf %59, %58 : vector<4x128xf32>
    %61 = arith.divf %59, %60 : vector<4x128xf32>
    %62 = vector.extract_strided_slice %55 {offsets = [0, 128], sizes = [4, 128], strides = [1, 1]} : vector<4x512xf32> to vector<4x128xf32>
    %63 = arith.negf %62 : vector<4x128xf32>
    %64 = math.exp %63 : vector<4x128xf32>
    %cst_32 = arith.constant 1.000000e+00 : f32
    %65 = vector.broadcast %cst_32 : f32 to vector<4x128xf32>
    %66 = arith.addf %65, %64 : vector<4x128xf32>
    %67 = arith.divf %65, %66 : vector<4x128xf32>
    %68 = vector.extract_strided_slice %55 {offsets = [0, 256], sizes = [4, 128], strides = [1, 1]} : vector<4x512xf32> to vector<4x128xf32>
    %69 = math.tanh %68 : vector<4x128xf32>
    %70 = vector.extract_strided_slice %55 {offsets = [0, 384], sizes = [4, 128], strides = [1, 1]} : vector<4x512xf32> to vector<4x128xf32>
    %71 = arith.negf %70 : vector<4x128xf32>
    %72 = math.exp %71 : vector<4x128xf32>
    %cst_33 = arith.constant 1.000000e+00 : f32
    %73 = vector.broadcast %cst_33 : f32 to vector<4x128xf32>
    %74 = arith.addf %73, %72 : vector<4x128xf32>
    %75 = arith.divf %73, %74 : vector<4x128xf32>
    %76 = arith.mulf %67, %49 : vector<4x128xf32>
    %77 = arith.mulf %61, %69 : vector<4x128xf32>
    %78 = arith.addf %76, %77 : vector<4x128xf32>
    %79 = math.tanh %78 : vector<4x128xf32>
    %80 = arith.mulf %75, %79 : vector<4x128xf32>
    %81 = arith.index_cast %c1_i32 : i32 to index
    %c0_34 = arith.constant 0 : index
    %c0_35 = arith.constant 0 : index
    %82 = vector.load %arg2[%81, %c0_34, %c0_35] : memref<12x4x128xf32, #tpu.memory_space<vmem>>, vector<1x4x128xf32>
    %83 = vector.shape_cast %82 : vector<1x4x128xf32> to vector<4x128xf32>
    %84 = arith.subf %78, %49 : vector<4x128xf32>
    %85 = arith.mulf %83, %84 : vector<4x128xf32>
    %86 = arith.addf %49, %85 : vector<4x128xf32>
    %c0_36 = arith.constant 0 : index
    %c0_37 = arith.constant 0 : index
    %87 = vector.load %arg8[%c0_36, %c0_37] : memref<4x128xf32, #tpu.memory_space<vmem>>, vector<4x128xf32>
    tpu.vector_store %arg8[%c0_36, %c0_37], %86 {strides = array<i32>} : memref<4x128xf32, #tpu.memory_space<vmem>>, vector<4x128xf32>,
    %88 = arith.subf %80, %48 : vector<4x128xf32>
    %89 = arith.mulf %83, %88 : vector<4x128xf32>
    %90 = arith.addf %48, %89 : vector<4x128xf32>
    %c0_38 = arith.constant 0 : index
    %c0_39 = arith.constant 0 : index
    %91 = vector.load %arg7[%c0_38, %c0_39] : memref<4x128xf32, #tpu.memory_space<vmem>>, vector<4x128xf32>
    tpu.vector_store %arg7[%c0_38, %c0_39], %90 {strides = array<i32>} : memref<4x128xf32, #tpu.memory_space<vmem>>, vector<4x128xf32>,
    %c2_i32 = arith.constant 2 : i32
    %c0_40 = arith.constant 0 : index
    %c0_41 = arith.constant 0 : index
    %92 = vector.load %arg7[%c0_40, %c0_41] : memref<4x128xf32, #tpu.memory_space<vmem>>, vector<4x128xf32>
    %c0_42 = arith.constant 0 : index
    %c0_43 = arith.constant 0 : index
    %93 = vector.load %arg8[%c0_42, %c0_43] : memref<4x128xf32, #tpu.memory_space<vmem>>, vector<4x128xf32>
    %94 = arith.index_cast %c2_i32 : i32 to index
    %c0_44 = arith.constant 0 : index
    %c0_45 = arith.constant 0 : index
    %95 = vector.load %arg1[%94, %c0_44, %c0_45] : memref<12x4x512xf32, #tpu.memory_space<vmem>>, vector<1x4x512xf32>
    %96 = vector.shape_cast %95 : vector<1x4x512xf32> to vector<4x512xf32>
    %c0_46 = arith.constant 0 : index
    %c0_47 = arith.constant 0 : index
    %97 = vector.load %arg3[%c0_46, %c0_47] : memref<128x512xf32, #tpu.memory_space<vmem>>, vector<128x512xf32>
    %cst_48 = arith.constant dense<0.000000e+00> : vector<4x512xf32>
    %98 = tpu.matmul %92, %97, %cst_48 {dimension_numbers = #tpu.dot_dimension_numbers<[1], [0], [0], [1], [0, 0, 1, 1], [], []>} : vector<4x128xf32>, vector<128x512xf32>, vector<4x512xf32> -> vector<4x512xf32>
    %99 = arith.addf %96, %98 : vector<4x512xf32>
    %100 = vector.extract_strided_slice %99 {offsets = [0, 0], sizes = [4, 128], strides = [1, 1]} : vector<4x512xf32> to vector<4x128xf32>
    %101 = arith.negf %100 : vector<4x128xf32>
    %102 = math.exp %101 : vector<4x128xf32>
    %cst_49 = arith.constant 1.000000e+00 : f32
    %103 = vector.broadcast %cst_49 : f32 to vector<4x128xf32>
    %104 = arith.addf %103, %102 : vector<4x128xf32>
    %105 = arith.divf %103, %104 : vector<4x128xf32>
    %106 = vector.extract_strided_slice %99 {offsets = [0, 128], sizes = [4, 128], strides = [1, 1]} : vector<4x512xf32> to vector<4x128xf32>
    %107 = arith.negf %106 : vector<4x128xf32>
    %108 = math.exp %107 : vector<4x128xf32>
    %cst_50 = arith.constant 1.000000e+00 : f32
    %109 = vector.broadcast %cst_50 : f32 to vector<4x128xf32>
    %110 = arith.addf %109, %108 : vector<4x128xf32>
    %111 = arith.divf %109, %110 : vector<4x128xf32>
    %112 = vector.extract_strided_slice %99 {offsets = [0, 256], sizes = [4, 128], strides = [1, 1]} : vector<4x512xf32> to vector<4x128xf32>
    %113 = math.tanh %112 : vector<4x128xf32>
    %114 = vector.extract_strided_slice %99 {offsets = [0, 384], sizes = [4, 128], strides = [1, 1]} : vector<4x512xf32> to vector<4x128xf32>
    %115 = arith.negf %114 : vector<4x128xf32>
    %116 = math.exp %115 : vector<4x128xf32>
    %cst_51 = arith.constant 1.000000e+00 : f32
    %117 = vector.broadcast %cst_51 : f32 to vector<4x128xf32>
    %118 = arith.addf %117, %116 : vector<4x128xf32>
    %119 = arith.divf %117, %118 : vector<4x128xf32>
    %120 = arith.mulf %111, %93 : vector<4x128xf32>
    %121 = arith.mulf %105, %113 : vector<4x128xf32>
    %122 = arith.addf %120, %121 : vector<4x128xf32>
    %123 = math.tanh %122 : vector<4x128xf32>
    %124 = arith.mulf %119, %123 : vector<4x128xf32>
    %125 = arith.index_cast %c2_i32 : i32 to index
    %c0_52 = arith.constant 0 : index
    %c0_53 = arith.constant 0 : index
    %126 = vector.load %arg2[%125, %c0_52, %c0_53] : memref<12x4x128xf32, #tpu.memory_space<vmem>>, vector<1x4x128xf32>
    %127 = vector.shape_cast %126 : vector<1x4x128xf32> to vector<4x128xf32>
    %128 = arith.subf %122, %93 : vector<4x128xf32>
    %129 = arith.mulf %127, %128 : vector<4x128xf32>
    %130 = arith.addf %93, %129 : vector<4x128xf32>
    %c0_54 = arith.constant 0 : index
    %c0_55 = arith.constant 0 : index
    %131 = vector.load %arg8[%c0_54, %c0_55] : memref<4x128xf32, #tpu.memory_space<vmem>>, vector<4x128xf32>
    tpu.vector_store %arg8[%c0_54, %c0_55], %130 {strides = array<i32>} : memref<4x128xf32, #tpu.memory_space<vmem>>, vector<4x128xf32>,
    %132 = arith.subf %124, %92 : vector<4x128xf32>
    %133 = arith.mulf %127, %132 : vector<4x128xf32>
    %134 = arith.addf %92, %133 : vector<4x128xf32>
    %c0_56 = arith.constant 0 : index
    %c0_57 = arith.constant 0 : index
    %135 = vector.load %arg7[%c0_56, %c0_57] : memref<4x128xf32, #tpu.memory_space<vmem>>, vector<4x128xf32>
    tpu.vector_store %arg7[%c0_56, %c0_57], %134 {strides = array<i32>} : memref<4x128xf32, #tpu.memory_space<vmem>>, vector<4x128xf32>,
    %c3_i32 = arith.constant 3 : i32
    %c0_58 = arith.constant 0 : index
    %c0_59 = arith.constant 0 : index
    %136 = vector.load %arg7[%c0_58, %c0_59] : memref<4x128xf32, #tpu.memory_space<vmem>>, vector<4x128xf32>
    %c0_60 = arith.constant 0 : index
    %c0_61 = arith.constant 0 : index
    %137 = vector.load %arg8[%c0_60, %c0_61] : memref<4x128xf32, #tpu.memory_space<vmem>>, vector<4x128xf32>
    %138 = arith.index_cast %c3_i32 : i32 to index
    %c0_62 = arith.constant 0 : index
    %c0_63 = arith.constant 0 : index
    %139 = vector.load %arg1[%138, %c0_62, %c0_63] : memref<12x4x512xf32, #tpu.memory_space<vmem>>, vector<1x4x512xf32>
    %140 = vector.shape_cast %139 : vector<1x4x512xf32> to vector<4x512xf32>
    %c0_64 = arith.constant 0 : index
    %c0_65 = arith.constant 0 : index
    %141 = vector.load %arg3[%c0_64, %c0_65] : memref<128x512xf32, #tpu.memory_space<vmem>>, vector<128x512xf32>
    %cst_66 = arith.constant dense<0.000000e+00> : vector<4x512xf32>
    %142 = tpu.matmul %136, %141, %cst_66 {dimension_numbers = #tpu.dot_dimension_numbers<[1], [0], [0], [1], [0, 0, 1, 1], [], []>} : vector<4x128xf32>, vector<128x512xf32>, vector<4x512xf32> -> vector<4x512xf32>
    %143 = arith.addf %140, %142 : vector<4x512xf32>
    %144 = vector.extract_strided_slice %143 {offsets = [0, 0], sizes = [4, 128], strides = [1, 1]} : vector<4x512xf32> to vector<4x128xf32>
    %145 = arith.negf %144 : vector<4x128xf32>
    %146 = math.exp %145 : vector<4x128xf32>
    %cst_67 = arith.constant 1.000000e+00 : f32
    %147 = vector.broadcast %cst_67 : f32 to vector<4x128xf32>
    %148 = arith.addf %147, %146 : vector<4x128xf32>
    %149 = arith.divf %147, %148 : vector<4x128xf32>
    %150 = vector.extract_strided_slice %143 {offsets = [0, 128], sizes = [4, 128], strides = [1, 1]} : vector<4x512xf32> to vector<4x128xf32>
    %151 = arith.negf %150 : vector<4x128xf32>
    %152 = math.exp %151 : vector<4x128xf32>
    %cst_68 = arith.constant 1.000000e+00 : f32
    %153 = vector.broadcast %cst_68 : f32 to vector<4x128xf32>
    %154 = arith.addf %153, %152 : vector<4x128xf32>
    %155 = arith.divf %153, %154 : vector<4x128xf32>
    %156 = vector.extract_strided_slice %143 {offsets = [0, 256], sizes = [4, 128], strides = [1, 1]} : vector<4x512xf32> to vector<4x128xf32>
    %157 = math.tanh %156 : vector<4x128xf32>
    %158 = vector.extract_strided_slice %143 {offsets = [0, 384], sizes = [4, 128], strides = [1, 1]} : vector<4x512xf32> to vector<4x128xf32>
    %159 = arith.negf %158 : vector<4x128xf32>
    %160 = math.exp %159 : vector<4x128xf32>
    %cst_69 = arith.constant 1.000000e+00 : f32
    %161 = vector.broadcast %cst_69 : f32 to vector<4x128xf32>
    %162 = arith.addf %161, %160 : vector<4x128xf32>
    %163 = arith.divf %161, %162 : vector<4x128xf32>
    %164 = arith.mulf %155, %137 : vector<4x128xf32>
    %165 = arith.mulf %149, %157 : vector<4x128xf32>
    %166 = arith.addf %164, %165 : vector<4x128xf32>
    %167 = math.tanh %166 : vector<4x128xf32>
    %168 = arith.mulf %163, %167 : vector<4x128xf32>
    %169 = arith.index_cast %c3_i32 : i32 to index
    %c0_70 = arith.constant 0 : index
    %c0_71 = arith.constant 0 : index
    %170 = vector.load %arg2[%169, %c0_70, %c0_71] : memref<12x4x128xf32, #tpu.memory_space<vmem>>, vector<1x4x128xf32>
    %171 = vector.shape_cast %170 : vector<1x4x128xf32> to vector<4x128xf32>
    %172 = arith.subf %166, %137 : vector<4x128xf32>
    %173 = arith.mulf %171, %172 : vector<4x128xf32>
    %174 = arith.addf %137, %173 : vector<4x128xf32>
    %c0_72 = arith.constant 0 : index
    %c0_73 = arith.constant 0 : index
    %175 = vector.load %arg8[%c0_72, %c0_73] : memref<4x128xf32, #tpu.memory_space<vmem>>, vector<4x128xf32>
    tpu.vector_store %arg8[%c0_72, %c0_73], %174 {strides = array<i32>} : memref<4x128xf32, #tpu.memory_space<vmem>>, vector<4x128xf32>,
    %176 = arith.subf %168, %136 : vector<4x128xf32>
    %177 = arith.mulf %171, %176 : vector<4x128xf32>
    %178 = arith.addf %136, %177 : vector<4x128xf32>
    %c0_74 = arith.constant 0 : index
    %c0_75 = arith.constant 0 : index
    %179 = vector.load %arg7[%c0_74, %c0_75] : memref<4x128xf32, #tpu.memory_space<vmem>>, vector<4x128xf32>
    tpu.vector_store %arg7[%c0_74, %c0_75], %178 {strides = array<i32>} : memref<4x128xf32, #tpu.memory_space<vmem>>, vector<4x128xf32>,
    %c4_i32 = arith.constant 4 : i32
    %c0_76 = arith.constant 0 : index
    %c0_77 = arith.constant 0 : index
    %180 = vector.load %arg7[%c0_76, %c0_77] : memref<4x128xf32, #tpu.memory_space<vmem>>, vector<4x128xf32>
    %c0_78 = arith.constant 0 : index
    %c0_79 = arith.constant 0 : index
    %181 = vector.load %arg8[%c0_78, %c0_79] : memref<4x128xf32, #tpu.memory_space<vmem>>, vector<4x128xf32>
    %182 = arith.index_cast %c4_i32 : i32 to index
    %c0_80 = arith.constant 0 : index
    %c0_81 = arith.constant 0 : index
    %183 = vector.load %arg1[%182, %c0_80, %c0_81] : memref<12x4x512xf32, #tpu.memory_space<vmem>>, vector<1x4x512xf32>
    %184 = vector.shape_cast %183 : vector<1x4x512xf32> to vector<4x512xf32>
    %c0_82 = arith.constant 0 : index
    %c0_83 = arith.constant 0 : index
    %185 = vector.load %arg3[%c0_82, %c0_83] : memref<128x512xf32, #tpu.memory_space<vmem>>, vector<128x512xf32>
    %cst_84 = arith.constant dense<0.000000e+00> : vector<4x512xf32>
    %186 = tpu.matmul %180, %185, %cst_84 {dimension_numbers = #tpu.dot_dimension_numbers<[1], [0], [0], [1], [0, 0, 1, 1], [], []>} : vector<4x128xf32>, vector<128x512xf32>, vector<4x512xf32> -> vector<4x512xf32>
    %187 = arith.addf %184, %186 : vector<4x512xf32>
    %188 = vector.extract_strided_slice %187 {offsets = [0, 0], sizes = [4, 128], strides = [1, 1]} : vector<4x512xf32> to vector<4x128xf32>
    %189 = arith.negf %188 : vector<4x128xf32>
    %190 = math.exp %189 : vector<4x128xf32>
    %cst_85 = arith.constant 1.000000e+00 : f32
    %191 = vector.broadcast %cst_85 : f32 to vector<4x128xf32>
    %192 = arith.addf %191, %190 : vector<4x128xf32>
    %193 = arith.divf %191, %192 : vector<4x128xf32>
    %194 = vector.extract_strided_slice %187 {offsets = [0, 128], sizes = [4, 128], strides = [1, 1]} : vector<4x512xf32> to vector<4x128xf32>
    %195 = arith.negf %194 : vector<4x128xf32>
    %196 = math.exp %195 : vector<4x128xf32>
    %cst_86 = arith.constant 1.000000e+00 : f32
    %197 = vector.broadcast %cst_86 : f32 to vector<4x128xf32>
    %198 = arith.addf %197, %196 : vector<4x128xf32>
    %199 = arith.divf %197, %198 : vector<4x128xf32>
    %200 = vector.extract_strided_slice %187 {offsets = [0, 256], sizes = [4, 128], strides = [1, 1]} : vector<4x512xf32> to vector<4x128xf32>
    %201 = math.tanh %200 : vector<4x128xf32>
    %202 = vector.extract_strided_slice %187 {offsets = [0, 384], sizes = [4, 128], strides = [1, 1]} : vector<4x512xf32> to vector<4x128xf32>
    %203 = arith.negf %202 : vector<4x128xf32>
    %204 = math.exp %203 : vector<4x128xf32>
    %cst_87 = arith.constant 1.000000e+00 : f32
    %205 = vector.broadcast %cst_87 : f32 to vector<4x128xf32>
    %206 = arith.addf %205, %204 : vector<4x128xf32>
    %207 = arith.divf %205, %206 : vector<4x128xf32>
    %208 = arith.mulf %199, %181 : vector<4x128xf32>
    %209 = arith.mulf %193, %201 : vector<4x128xf32>
    %210 = arith.addf %208, %209 : vector<4x128xf32>
    %211 = math.tanh %210 : vector<4x128xf32>
    %212 = arith.mulf %207, %211 : vector<4x128xf32>
    %213 = arith.index_cast %c4_i32 : i32 to index
    %c0_88 = arith.constant 0 : index
    %c0_89 = arith.constant 0 : index
    %214 = vector.load %arg2[%213, %c0_88, %c0_89] : memref<12x4x128xf32, #tpu.memory_space<vmem>>, vector<1x4x128xf32>
    %215 = vector.shape_cast %214 : vector<1x4x128xf32> to vector<4x128xf32>
    %216 = arith.subf %210, %181 : vector<4x128xf32>
    %217 = arith.mulf %215, %216 : vector<4x128xf32>
    %218 = arith.addf %181, %217 : vector<4x128xf32>
    %c0_90 = arith.constant 0 : index
    %c0_91 = arith.constant 0 : index
    %219 = vector.load %arg8[%c0_90, %c0_91] : memref<4x128xf32, #tpu.memory_space<vmem>>, vector<4x128xf32>
    tpu.vector_store %arg8[%c0_90, %c0_91], %218 {strides = array<i32>} : memref<4x128xf32, #tpu.memory_space<vmem>>, vector<4x128xf32>,
    %220 = arith.subf %212, %180 : vector<4x128xf32>
    %221 = arith.mulf %215, %220 : vector<4x128xf32>
    %222 = arith.addf %180, %221 : vector<4x128xf32>
    %c0_92 = arith.constant 0 : index
    %c0_93 = arith.constant 0 : index
    %223 = vector.load %arg7[%c0_92, %c0_93] : memref<4x128xf32, #tpu.memory_space<vmem>>, vector<4x128xf32>
    tpu.vector_store %arg7[%c0_92, %c0_93], %222 {strides = array<i32>} : memref<4x128xf32, #tpu.memory_space<vmem>>, vector<4x128xf32>,
    %c5_i32 = arith.constant 5 : i32
    %c0_94 = arith.constant 0 : index
    %c0_95 = arith.constant 0 : index
    %224 = vector.load %arg7[%c0_94, %c0_95] : memref<4x128xf32, #tpu.memory_space<vmem>>, vector<4x128xf32>
    %c0_96 = arith.constant 0 : index
    %c0_97 = arith.constant 0 : index
    %225 = vector.load %arg8[%c0_96, %c0_97] : memref<4x128xf32, #tpu.memory_space<vmem>>, vector<4x128xf32>
    %226 = arith.index_cast %c5_i32 : i32 to index
    %c0_98 = arith.constant 0 : index
    %c0_99 = arith.constant 0 : index
    %227 = vector.load %arg1[%226, %c0_98, %c0_99] : memref<12x4x512xf32, #tpu.memory_space<vmem>>, vector<1x4x512xf32>
    %228 = vector.shape_cast %227 : vector<1x4x512xf32> to vector<4x512xf32>
    %c0_100 = arith.constant 0 : index
    %c0_101 = arith.constant 0 : index
    %229 = vector.load %arg3[%c0_100, %c0_101] : memref<128x512xf32, #tpu.memory_space<vmem>>, vector<128x512xf32>
    %cst_102 = arith.constant dense<0.000000e+00> : vector<4x512xf32>
    %230 = tpu.matmul %224, %229, %cst_102 {dimension_numbers = #tpu.dot_dimension_numbers<[1], [0], [0], [1], [0, 0, 1, 1], [], []>} : vector<4x128xf32>, vector<128x512xf32>, vector<4x512xf32> -> vector<4x512xf32>
    %231 = arith.addf %228, %230 : vector<4x512xf32>
    %232 = vector.extract_strided_slice %231 {offsets = [0, 0], sizes = [4, 128], strides = [1, 1]} : vector<4x512xf32> to vector<4x128xf32>
    %233 = arith.negf %232 : vector<4x128xf32>
    %234 = math.exp %233 : vector<4x128xf32>
    %cst_103 = arith.constant 1.000000e+00 : f32
    %235 = vector.broadcast %cst_103 : f32 to vector<4x128xf32>
    %236 = arith.addf %235, %234 : vector<4x128xf32>
    %237 = arith.divf %235, %236 : vector<4x128xf32>
    %238 = vector.extract_strided_slice %231 {offsets = [0, 128], sizes = [4, 128], strides = [1, 1]} : vector<4x512xf32> to vector<4x128xf32>
    %239 = arith.negf %238 : vector<4x128xf32>
    %240 = math.exp %239 : vector<4x128xf32>
    %cst_104 = arith.constant 1.000000e+00 : f32
    %241 = vector.broadcast %cst_104 : f32 to vector<4x128xf32>
    %242 = arith.addf %241, %240 : vector<4x128xf32>
    %243 = arith.divf %241, %242 : vector<4x128xf32>
    %244 = vector.extract_strided_slice %231 {offsets = [0, 256], sizes = [4, 128], strides = [1, 1]} : vector<4x512xf32> to vector<4x128xf32>
    %245 = math.tanh %244 : vector<4x128xf32>
    %246 = vector.extract_strided_slice %231 {offsets = [0, 384], sizes = [4, 128], strides = [1, 1]} : vector<4x512xf32> to vector<4x128xf32>
    %247 = arith.negf %246 : vector<4x128xf32>
    %248 = math.exp %247 : vector<4x128xf32>
    %cst_105 = arith.constant 1.000000e+00 : f32
    %249 = vector.broadcast %cst_105 : f32 to vector<4x128xf32>
    %250 = arith.addf %249, %248 : vector<4x128xf32>
    %251 = arith.divf %249, %250 : vector<4x128xf32>
    %252 = arith.mulf %243, %225 : vector<4x128xf32>
    %253 = arith.mulf %237, %245 : vector<4x128xf32>
    %254 = arith.addf %252, %253 : vector<4x128xf32>
    %255 = math.tanh %254 : vector<4x128xf32>
    %256 = arith.mulf %251, %255 : vector<4x128xf32>
    %257 = arith.index_cast %c5_i32 : i32 to index
    %c0_106 = arith.constant 0 : index
    %c0_107 = arith.constant 0 : index
    %258 = vector.load %arg2[%257, %c0_106, %c0_107] : memref<12x4x128xf32, #tpu.memory_space<vmem>>, vector<1x4x128xf32>
    %259 = vector.shape_cast %258 : vector<1x4x128xf32> to vector<4x128xf32>
    %260 = arith.subf %254, %225 : vector<4x128xf32>
    %261 = arith.mulf %259, %260 : vector<4x128xf32>
    %262 = arith.addf %225, %261 : vector<4x128xf32>
    %c0_108 = arith.constant 0 : index
    %c0_109 = arith.constant 0 : index
    %263 = vector.load %arg8[%c0_108, %c0_109] : memref<4x128xf32, #tpu.memory_space<vmem>>, vector<4x128xf32>
    tpu.vector_store %arg8[%c0_108, %c0_109], %262 {strides = array<i32>} : memref<4x128xf32, #tpu.memory_space<vmem>>, vector<4x128xf32>,
    %264 = arith.subf %256, %224 : vector<4x128xf32>
    %265 = arith.mulf %259, %264 : vector<4x128xf32>
    %266 = arith.addf %224, %265 : vector<4x128xf32>
    %c0_110 = arith.constant 0 : index
    %c0_111 = arith.constant 0 : index
    %267 = vector.load %arg7[%c0_110, %c0_111] : memref<4x128xf32, #tpu.memory_space<vmem>>, vector<4x128xf32>
    tpu.vector_store %arg7[%c0_110, %c0_111], %266 {strides = array<i32>} : memref<4x128xf32, #tpu.memory_space<vmem>>, vector<4x128xf32>,
    %c6_i32 = arith.constant 6 : i32
    %c0_112 = arith.constant 0 : index
    %c0_113 = arith.constant 0 : index
    %268 = vector.load %arg7[%c0_112, %c0_113] : memref<4x128xf32, #tpu.memory_space<vmem>>, vector<4x128xf32>
    %c0_114 = arith.constant 0 : index
    %c0_115 = arith.constant 0 : index
    %269 = vector.load %arg8[%c0_114, %c0_115] : memref<4x128xf32, #tpu.memory_space<vmem>>, vector<4x128xf32>
    %270 = arith.index_cast %c6_i32 : i32 to index
    %c0_116 = arith.constant 0 : index
    %c0_117 = arith.constant 0 : index
    %271 = vector.load %arg1[%270, %c0_116, %c0_117] : memref<12x4x512xf32, #tpu.memory_space<vmem>>, vector<1x4x512xf32>
    %272 = vector.shape_cast %271 : vector<1x4x512xf32> to vector<4x512xf32>
    %c0_118 = arith.constant 0 : index
    %c0_119 = arith.constant 0 : index
    %273 = vector.load %arg3[%c0_118, %c0_119] : memref<128x512xf32, #tpu.memory_space<vmem>>, vector<128x512xf32>
    %cst_120 = arith.constant dense<0.000000e+00> : vector<4x512xf32>
    %274 = tpu.matmul %268, %273, %cst_120 {dimension_numbers = #tpu.dot_dimension_numbers<[1], [0], [0], [1], [0, 0, 1, 1], [], []>} : vector<4x128xf32>, vector<128x512xf32>, vector<4x512xf32> -> vector<4x512xf32>
    %275 = arith.addf %272, %274 : vector<4x512xf32>
    %276 = vector.extract_strided_slice %275 {offsets = [0, 0], sizes = [4, 128], strides = [1, 1]} : vector<4x512xf32> to vector<4x128xf32>
    %277 = arith.negf %276 : vector<4x128xf32>
    %278 = math.exp %277 : vector<4x128xf32>
    %cst_121 = arith.constant 1.000000e+00 : f32
    %279 = vector.broadcast %cst_121 : f32 to vector<4x128xf32>
    %280 = arith.addf %279, %278 : vector<4x128xf32>
    %281 = arith.divf %279, %280 : vector<4x128xf32>
    %282 = vector.extract_strided_slice %275 {offsets = [0, 128], sizes = [4, 128], strides = [1, 1]} : vector<4x512xf32> to vector<4x128xf32>
    %283 = arith.negf %282 : vector<4x128xf32>
    %284 = math.exp %283 : vector<4x128xf32>
    %cst_122 = arith.constant 1.000000e+00 : f32
    %285 = vector.broadcast %cst_122 : f32 to vector<4x128xf32>
    %286 = arith.addf %285, %284 : vector<4x128xf32>
    %287 = arith.divf %285, %286 : vector<4x128xf32>
    %288 = vector.extract_strided_slice %275 {offsets = [0, 256], sizes = [4, 128], strides = [1, 1]} : vector<4x512xf32> to vector<4x128xf32>
    %289 = math.tanh %288 : vector<4x128xf32>
    %290 = vector.extract_strided_slice %275 {offsets = [0, 384], sizes = [4, 128], strides = [1, 1]} : vector<4x512xf32> to vector<4x128xf32>
    %291 = arith.negf %290 : vector<4x128xf32>
    %292 = math.exp %291 : vector<4x128xf32>
    %cst_123 = arith.constant 1.000000e+00 : f32
    %293 = vector.broadcast %cst_123 : f32 to vector<4x128xf32>
    %294 = arith.addf %293, %292 : vector<4x128xf32>
    %295 = arith.divf %293, %294 : vector<4x128xf32>
    %296 = arith.mulf %287, %269 : vector<4x128xf32>
    %297 = arith.mulf %281, %289 : vector<4x128xf32>
    %298 = arith.addf %296, %297 : vector<4x128xf32>
    %299 = math.tanh %298 : vector<4x128xf32>
    %300 = arith.mulf %295, %299 : vector<4x128xf32>
    %301 = arith.index_cast %c6_i32 : i32 to index
    %c0_124 = arith.constant 0 : index
    %c0_125 = arith.constant 0 : index
    %302 = vector.load %arg2[%301, %c0_124, %c0_125] : memref<12x4x128xf32, #tpu.memory_space<vmem>>, vector<1x4x128xf32>
    %303 = vector.shape_cast %302 : vector<1x4x128xf32> to vector<4x128xf32>
    %304 = arith.subf %298, %269 : vector<4x128xf32>
    %305 = arith.mulf %303, %304 : vector<4x128xf32>
    %306 = arith.addf %269, %305 : vector<4x128xf32>
    %c0_126 = arith.constant 0 : index
    %c0_127 = arith.constant 0 : index
    %307 = vector.load %arg8[%c0_126, %c0_127] : memref<4x128xf32, #tpu.memory_space<vmem>>, vector<4x128xf32>
    tpu.vector_store %arg8[%c0_126, %c0_127], %306 {strides = array<i32>} : memref<4x128xf32, #tpu.memory_space<vmem>>, vector<4x128xf32>,
    %308 = arith.subf %300, %268 : vector<4x128xf32>
    %309 = arith.mulf %303, %308 : vector<4x128xf32>
    %310 = arith.addf %268, %309 : vector<4x128xf32>
    %c0_128 = arith.constant 0 : index
    %c0_129 = arith.constant 0 : index
    %311 = vector.load %arg7[%c0_128, %c0_129] : memref<4x128xf32, #tpu.memory_space<vmem>>, vector<4x128xf32>
    tpu.vector_store %arg7[%c0_128, %c0_129], %310 {strides = array<i32>} : memref<4x128xf32, #tpu.memory_space<vmem>>, vector<4x128xf32>,
    %c7_i32 = arith.constant 7 : i32
    %c0_130 = arith.constant 0 : index
    %c0_131 = arith.constant 0 : index
    %312 = vector.load %arg7[%c0_130, %c0_131] : memref<4x128xf32, #tpu.memory_space<vmem>>, vector<4x128xf32>
    %c0_132 = arith.constant 0 : index
    %c0_133 = arith.constant 0 : index
    %313 = vector.load %arg8[%c0_132, %c0_133] : memref<4x128xf32, #tpu.memory_space<vmem>>, vector<4x128xf32>
    %314 = arith.index_cast %c7_i32 : i32 to index
    %c0_134 = arith.constant 0 : index
    %c0_135 = arith.constant 0 : index
    %315 = vector.load %arg1[%314, %c0_134, %c0_135] : memref<12x4x512xf32, #tpu.memory_space<vmem>>, vector<1x4x512xf32>
    %316 = vector.shape_cast %315 : vector<1x4x512xf32> to vector<4x512xf32>
    %c0_136 = arith.constant 0 : index
    %c0_137 = arith.constant 0 : index
    %317 = vector.load %arg3[%c0_136, %c0_137] : memref<128x512xf32, #tpu.memory_space<vmem>>, vector<128x512xf32>
    %cst_138 = arith.constant dense<0.000000e+00> : vector<4x512xf32>
    %318 = tpu.matmul %312, %317, %cst_138 {dimension_numbers = #tpu.dot_dimension_numbers<[1], [0], [0], [1], [0, 0, 1, 1], [], []>} : vector<4x128xf32>, vector<128x512xf32>, vector<4x512xf32> -> vector<4x512xf32>
    %319 = arith.addf %316, %318 : vector<4x512xf32>
    %320 = vector.extract_strided_slice %319 {offsets = [0, 0], sizes = [4, 128], strides = [1, 1]} : vector<4x512xf32> to vector<4x128xf32>
    %321 = arith.negf %320 : vector<4x128xf32>
    %322 = math.exp %321 : vector<4x128xf32>
    %cst_139 = arith.constant 1.000000e+00 : f32
    %323 = vector.broadcast %cst_139 : f32 to vector<4x128xf32>
    %324 = arith.addf %323, %322 : vector<4x128xf32>
    %325 = arith.divf %323, %324 : vector<4x128xf32>
    %326 = vector.extract_strided_slice %319 {offsets = [0, 128], sizes = [4, 128], strides = [1, 1]} : vector<4x512xf32> to vector<4x128xf32>
    %327 = arith.negf %326 : vector<4x128xf32>
    %328 = math.exp %327 : vector<4x128xf32>
    %cst_140 = arith.constant 1.000000e+00 : f32
    %329 = vector.broadcast %cst_140 : f32 to vector<4x128xf32>
    %330 = arith.addf %329, %328 : vector<4x128xf32>
    %331 = arith.divf %329, %330 : vector<4x128xf32>
    %332 = vector.extract_strided_slice %319 {offsets = [0, 256], sizes = [4, 128], strides = [1, 1]} : vector<4x512xf32> to vector<4x128xf32>
    %333 = math.tanh %332 : vector<4x128xf32>
    %334 = vector.extract_strided_slice %319 {offsets = [0, 384], sizes = [4, 128], strides = [1, 1]} : vector<4x512xf32> to vector<4x128xf32>
    %335 = arith.negf %334 : vector<4x128xf32>
    %336 = math.exp %335 : vector<4x128xf32>
    %cst_141 = arith.constant 1.000000e+00 : f32
    %337 = vector.broadcast %cst_141 : f32 to vector<4x128xf32>
    %338 = arith.addf %337, %336 : vector<4x128xf32>
    %339 = arith.divf %337, %338 : vector<4x128xf32>
    %340 = arith.mulf %331, %313 : vector<4x128xf32>
    %341 = arith.mulf %325, %333 : vector<4x128xf32>
    %342 = arith.addf %340, %341 : vector<4x128xf32>
    %343 = math.tanh %342 : vector<4x128xf32>
    %344 = arith.mulf %339, %343 : vector<4x128xf32>
    %345 = arith.index_cast %c7_i32 : i32 to index
    %c0_142 = arith.constant 0 : index
    %c0_143 = arith.constant 0 : index
    %346 = vector.load %arg2[%345, %c0_142, %c0_143] : memref<12x4x128xf32, #tpu.memory_space<vmem>>, vector<1x4x128xf32>
    %347 = vector.shape_cast %346 : vector<1x4x128xf32> to vector<4x128xf32>
    %348 = arith.subf %342, %313 : vector<4x128xf32>
    %349 = arith.mulf %347, %348 : vector<4x128xf32>
    %350 = arith.addf %313, %349 : vector<4x128xf32>
    %c0_144 = arith.constant 0 : index
    %c0_145 = arith.constant 0 : index
    %351 = vector.load %arg8[%c0_144, %c0_145] : memref<4x128xf32, #tpu.memory_space<vmem>>, vector<4x128xf32>
    tpu.vector_store %arg8[%c0_144, %c0_145], %350 {strides = array<i32>} : memref<4x128xf32, #tpu.memory_space<vmem>>, vector<4x128xf32>,
    %352 = arith.subf %344, %312 : vector<4x128xf32>
    %353 = arith.mulf %347, %352 : vector<4x128xf32>
    %354 = arith.addf %312, %353 : vector<4x128xf32>
    %c0_146 = arith.constant 0 : index
    %c0_147 = arith.constant 0 : index
    %355 = vector.load %arg7[%c0_146, %c0_147] : memref<4x128xf32, #tpu.memory_space<vmem>>, vector<4x128xf32>
    tpu.vector_store %arg7[%c0_146, %c0_147], %354 {strides = array<i32>} : memref<4x128xf32, #tpu.memory_space<vmem>>, vector<4x128xf32>,
    %c8_i32 = arith.constant 8 : i32
    %c0_148 = arith.constant 0 : index
    %c0_149 = arith.constant 0 : index
    %356 = vector.load %arg7[%c0_148, %c0_149] : memref<4x128xf32, #tpu.memory_space<vmem>>, vector<4x128xf32>
    %c0_150 = arith.constant 0 : index
    %c0_151 = arith.constant 0 : index
    %357 = vector.load %arg8[%c0_150, %c0_151] : memref<4x128xf32, #tpu.memory_space<vmem>>, vector<4x128xf32>
    %358 = arith.index_cast %c8_i32 : i32 to index
    %c0_152 = arith.constant 0 : index
    %c0_153 = arith.constant 0 : index
    %359 = vector.load %arg1[%358, %c0_152, %c0_153] : memref<12x4x512xf32, #tpu.memory_space<vmem>>, vector<1x4x512xf32>
    %360 = vector.shape_cast %359 : vector<1x4x512xf32> to vector<4x512xf32>
    %c0_154 = arith.constant 0 : index
    %c0_155 = arith.constant 0 : index
    %361 = vector.load %arg3[%c0_154, %c0_155] : memref<128x512xf32, #tpu.memory_space<vmem>>, vector<128x512xf32>
    %cst_156 = arith.constant dense<0.000000e+00> : vector<4x512xf32>
    %362 = tpu.matmul %356, %361, %cst_156 {dimension_numbers = #tpu.dot_dimension_numbers<[1], [0], [0], [1], [0, 0, 1, 1], [], []>} : vector<4x128xf32>, vector<128x512xf32>, vector<4x512xf32> -> vector<4x512xf32>
    %363 = arith.addf %360, %362 : vector<4x512xf32>
    %364 = vector.extract_strided_slice %363 {offsets = [0, 0], sizes = [4, 128], strides = [1, 1]} : vector<4x512xf32> to vector<4x128xf32>
    %365 = arith.negf %364 : vector<4x128xf32>
    %366 = math.exp %365 : vector<4x128xf32>
    %cst_157 = arith.constant 1.000000e+00 : f32
    %367 = vector.broadcast %cst_157 : f32 to vector<4x128xf32>
    %368 = arith.addf %367, %366 : vector<4x128xf32>
    %369 = arith.divf %367, %368 : vector<4x128xf32>
    %370 = vector.extract_strided_slice %363 {offsets = [0, 128], sizes = [4, 128], strides = [1, 1]} : vector<4x512xf32> to vector<4x128xf32>
    %371 = arith.negf %370 : vector<4x128xf32>
    %372 = math.exp %371 : vector<4x128xf32>
    %cst_158 = arith.constant 1.000000e+00 : f32
    %373 = vector.broadcast %cst_158 : f32 to vector<4x128xf32>
    %374 = arith.addf %373, %372 : vector<4x128xf32>
    %375 = arith.divf %373, %374 : vector<4x128xf32>
    %376 = vector.extract_strided_slice %363 {offsets = [0, 256], sizes = [4, 128], strides = [1, 1]} : vector<4x512xf32> to vector<4x128xf32>
    %377 = math.tanh %376 : vector<4x128xf32>
    %378 = vector.extract_strided_slice %363 {offsets = [0, 384], sizes = [4, 128], strides = [1, 1]} : vector<4x512xf32> to vector<4x128xf32>
    %379 = arith.negf %378 : vector<4x128xf32>
    %380 = math.exp %379 : vector<4x128xf32>
    %cst_159 = arith.constant 1.000000e+00 : f32
    %381 = vector.broadcast %cst_159 : f32 to vector<4x128xf32>
    %382 = arith.addf %381, %380 : vector<4x128xf32>
    %383 = arith.divf %381, %382 : vector<4x128xf32>
    %384 = arith.mulf %375, %357 : vector<4x128xf32>
    %385 = arith.mulf %369, %377 : vector<4x128xf32>
    %386 = arith.addf %384, %385 : vector<4x128xf32>
    %387 = math.tanh %386 : vector<4x128xf32>
    %388 = arith.mulf %383, %387 : vector<4x128xf32>
    %389 = arith.index_cast %c8_i32 : i32 to index
    %c0_160 = arith.constant 0 : index
    %c0_161 = arith.constant 0 : index
    %390 = vector.load %arg2[%389, %c0_160, %c0_161] : memref<12x4x128xf32, #tpu.memory_space<vmem>>, vector<1x4x128xf32>
    %391 = vector.shape_cast %390 : vector<1x4x128xf32> to vector<4x128xf32>
    %392 = arith.subf %386, %357 : vector<4x128xf32>
    %393 = arith.mulf %391, %392 : vector<4x128xf32>
    %394 = arith.addf %357, %393 : vector<4x128xf32>
    %c0_162 = arith.constant 0 : index
    %c0_163 = arith.constant 0 : index
    %395 = vector.load %arg8[%c0_162, %c0_163] : memref<4x128xf32, #tpu.memory_space<vmem>>, vector<4x128xf32>
    tpu.vector_store %arg8[%c0_162, %c0_163], %394 {strides = array<i32>} : memref<4x128xf32, #tpu.memory_space<vmem>>, vector<4x128xf32>,
    %396 = arith.subf %388, %356 : vector<4x128xf32>
    %397 = arith.mulf %391, %396 : vector<4x128xf32>
    %398 = arith.addf %356, %397 : vector<4x128xf32>
    %c0_164 = arith.constant 0 : index
    %c0_165 = arith.constant 0 : index
    %399 = vector.load %arg7[%c0_164, %c0_165] : memref<4x128xf32, #tpu.memory_space<vmem>>, vector<4x128xf32>
    tpu.vector_store %arg7[%c0_164, %c0_165], %398 {strides = array<i32>} : memref<4x128xf32, #tpu.memory_space<vmem>>, vector<4x128xf32>,
    %c9_i32 = arith.constant 9 : i32
    %c0_166 = arith.constant 0 : index
    %c0_167 = arith.constant 0 : index
    %400 = vector.load %arg7[%c0_166, %c0_167] : memref<4x128xf32, #tpu.memory_space<vmem>>, vector<4x128xf32>
    %c0_168 = arith.constant 0 : index
    %c0_169 = arith.constant 0 : index
    %401 = vector.load %arg8[%c0_168, %c0_169] : memref<4x128xf32, #tpu.memory_space<vmem>>, vector<4x128xf32>
    %402 = arith.index_cast %c9_i32 : i32 to index
    %c0_170 = arith.constant 0 : index
    %c0_171 = arith.constant 0 : index
    %403 = vector.load %arg1[%402, %c0_170, %c0_171] : memref<12x4x512xf32, #tpu.memory_space<vmem>>, vector<1x4x512xf32>
    %404 = vector.shape_cast %403 : vector<1x4x512xf32> to vector<4x512xf32>
    %c0_172 = arith.constant 0 : index
    %c0_173 = arith.constant 0 : index
    %405 = vector.load %arg3[%c0_172, %c0_173] : memref<128x512xf32, #tpu.memory_space<vmem>>, vector<128x512xf32>
    %cst_174 = arith.constant dense<0.000000e+00> : vector<4x512xf32>
    %406 = tpu.matmul %400, %405, %cst_174 {dimension_numbers = #tpu.dot_dimension_numbers<[1], [0], [0], [1], [0, 0, 1, 1], [], []>} : vector<4x128xf32>, vector<128x512xf32>, vector<4x512xf32> -> vector<4x512xf32>
    %407 = arith.addf %404, %406 : vector<4x512xf32>
    %408 = vector.extract_strided_slice %407 {offsets = [0, 0], sizes = [4, 128], strides = [1, 1]} : vector<4x512xf32> to vector<4x128xf32>
    %409 = arith.negf %408 : vector<4x128xf32>
    %410 = math.exp %409 : vector<4x128xf32>
    %cst_175 = arith.constant 1.000000e+00 : f32
    %411 = vector.broadcast %cst_175 : f32 to vector<4x128xf32>
    %412 = arith.addf %411, %410 : vector<4x128xf32>
    %413 = arith.divf %411, %412 : vector<4x128xf32>
    %414 = vector.extract_strided_slice %407 {offsets = [0, 128], sizes = [4, 128], strides = [1, 1]} : vector<4x512xf32> to vector<4x128xf32>
    %415 = arith.negf %414 : vector<4x128xf32>
    %416 = math.exp %415 : vector<4x128xf32>
    %cst_176 = arith.constant 1.000000e+00 : f32
    %417 = vector.broadcast %cst_176 : f32 to vector<4x128xf32>
    %418 = arith.addf %417, %416 : vector<4x128xf32>
    %419 = arith.divf %417, %418 : vector<4x128xf32>
    %420 = vector.extract_strided_slice %407 {offsets = [0, 256], sizes = [4, 128], strides = [1, 1]} : vector<4x512xf32> to vector<4x128xf32>
    %421 = math.tanh %420 : vector<4x128xf32>
    %422 = vector.extract_strided_slice %407 {offsets = [0, 384], sizes = [4, 128], strides = [1, 1]} : vector<4x512xf32> to vector<4x128xf32>
    %423 = arith.negf %422 : vector<4x128xf32>
    %424 = math.exp %423 : vector<4x128xf32>
    %cst_177 = arith.constant 1.000000e+00 : f32
    %425 = vector.broadcast %cst_177 : f32 to vector<4x128xf32>
    %426 = arith.addf %425, %424 : vector<4x128xf32>
    %427 = arith.divf %425, %426 : vector<4x128xf32>
    %428 = arith.mulf %419, %401 : vector<4x128xf32>
    %429 = arith.mulf %413, %421 : vector<4x128xf32>
    %430 = arith.addf %428, %429 : vector<4x128xf32>
    %431 = math.tanh %430 : vector<4x128xf32>
    %432 = arith.mulf %427, %431 : vector<4x128xf32>
    %433 = arith.index_cast %c9_i32 : i32 to index
    %c0_178 = arith.constant 0 : index
    %c0_179 = arith.constant 0 : index
    %434 = vector.load %arg2[%433, %c0_178, %c0_179] : memref<12x4x128xf32, #tpu.memory_space<vmem>>, vector<1x4x128xf32>
    %435 = vector.shape_cast %434 : vector<1x4x128xf32> to vector<4x128xf32>
    %436 = arith.subf %430, %401 : vector<4x128xf32>
    %437 = arith.mulf %435, %436 : vector<4x128xf32>
    %438 = arith.addf %401, %437 : vector<4x128xf32>
    %c0_180 = arith.constant 0 : index
    %c0_181 = arith.constant 0 : index
    %439 = vector.load %arg8[%c0_180, %c0_181] : memref<4x128xf32, #tpu.memory_space<vmem>>, vector<4x128xf32>
    tpu.vector_store %arg8[%c0_180, %c0_181], %438 {strides = array<i32>} : memref<4x128xf32, #tpu.memory_space<vmem>>, vector<4x128xf32>,
    %440 = arith.subf %432, %400 : vector<4x128xf32>
    %441 = arith.mulf %435, %440 : vector<4x128xf32>
    %442 = arith.addf %400, %441 : vector<4x128xf32>
    %c0_182 = arith.constant 0 : index
    %c0_183 = arith.constant 0 : index
    %443 = vector.load %arg7[%c0_182, %c0_183] : memref<4x128xf32, #tpu.memory_space<vmem>>, vector<4x128xf32>
    tpu.vector_store %arg7[%c0_182, %c0_183], %442 {strides = array<i32>} : memref<4x128xf32, #tpu.memory_space<vmem>>, vector<4x128xf32>,
    %c10_i32 = arith.constant 10 : i32
    %c0_184 = arith.constant 0 : index
    %c0_185 = arith.constant 0 : index
    %444 = vector.load %arg7[%c0_184, %c0_185] : memref<4x128xf32, #tpu.memory_space<vmem>>, vector<4x128xf32>
    %c0_186 = arith.constant 0 : index
    %c0_187 = arith.constant 0 : index
    %445 = vector.load %arg8[%c0_186, %c0_187] : memref<4x128xf32, #tpu.memory_space<vmem>>, vector<4x128xf32>
    %446 = arith.index_cast %c10_i32 : i32 to index
    %c0_188 = arith.constant 0 : index
    %c0_189 = arith.constant 0 : index
    %447 = vector.load %arg1[%446, %c0_188, %c0_189] : memref<12x4x512xf32, #tpu.memory_space<vmem>>, vector<1x4x512xf32>
    %448 = vector.shape_cast %447 : vector<1x4x512xf32> to vector<4x512xf32>
    %c0_190 = arith.constant 0 : index
    %c0_191 = arith.constant 0 : index
    %449 = vector.load %arg3[%c0_190, %c0_191] : memref<128x512xf32, #tpu.memory_space<vmem>>, vector<128x512xf32>
    %cst_192 = arith.constant dense<0.000000e+00> : vector<4x512xf32>
    %450 = tpu.matmul %444, %449, %cst_192 {dimension_numbers = #tpu.dot_dimension_numbers<[1], [0], [0], [1], [0, 0, 1, 1], [], []>} : vector<4x128xf32>, vector<128x512xf32>, vector<4x512xf32> -> vector<4x512xf32>
    %451 = arith.addf %448, %450 : vector<4x512xf32>
    %452 = vector.extract_strided_slice %451 {offsets = [0, 0], sizes = [4, 128], strides = [1, 1]} : vector<4x512xf32> to vector<4x128xf32>
    %453 = arith.negf %452 : vector<4x128xf32>
    %454 = math.exp %453 : vector<4x128xf32>
    %cst_193 = arith.constant 1.000000e+00 : f32
    %455 = vector.broadcast %cst_193 : f32 to vector<4x128xf32>
    %456 = arith.addf %455, %454 : vector<4x128xf32>
    %457 = arith.divf %455, %456 : vector<4x128xf32>
    %458 = vector.extract_strided_slice %451 {offsets = [0, 128], sizes = [4, 128], strides = [1, 1]} : vector<4x512xf32> to vector<4x128xf32>
    %459 = arith.negf %458 : vector<4x128xf32>
    %460 = math.exp %459 : vector<4x128xf32>
    %cst_194 = arith.constant 1.000000e+00 : f32
    %461 = vector.broadcast %cst_194 : f32 to vector<4x128xf32>
    %462 = arith.addf %461, %460 : vector<4x128xf32>
    %463 = arith.divf %461, %462 : vector<4x128xf32>
    %464 = vector.extract_strided_slice %451 {offsets = [0, 256], sizes = [4, 128], strides = [1, 1]} : vector<4x512xf32> to vector<4x128xf32>
    %465 = math.tanh %464 : vector<4x128xf32>
    %466 = vector.extract_strided_slice %451 {offsets = [0, 384], sizes = [4, 128], strides = [1, 1]} : vector<4x512xf32> to vector<4x128xf32>
    %467 = arith.negf %466 : vector<4x128xf32>
    %468 = math.exp %467 : vector<4x128xf32>
    %cst_195 = arith.constant 1.000000e+00 : f32
    %469 = vector.broadcast %cst_195 : f32 to vector<4x128xf32>
    %470 = arith.addf %469, %468 : vector<4x128xf32>
    %471 = arith.divf %469, %470 : vector<4x128xf32>
    %472 = arith.mulf %463, %445 : vector<4x128xf32>
    %473 = arith.mulf %457, %465 : vector<4x128xf32>
    %474 = arith.addf %472, %473 : vector<4x128xf32>
    %475 = math.tanh %474 : vector<4x128xf32>
    %476 = arith.mulf %471, %475 : vector<4x128xf32>
    %477 = arith.index_cast %c10_i32 : i32 to index
    %c0_196 = arith.constant 0 : index
    %c0_197 = arith.constant 0 : index
    %478 = vector.load %arg2[%477, %c0_196, %c0_197] : memref<12x4x128xf32, #tpu.memory_space<vmem>>, vector<1x4x128xf32>
    %479 = vector.shape_cast %478 : vector<1x4x128xf32> to vector<4x128xf32>
    %480 = arith.subf %474, %445 : vector<4x128xf32>
    %481 = arith.mulf %479, %480 : vector<4x128xf32>
    %482 = arith.addf %445, %481 : vector<4x128xf32>
    %c0_198 = arith.constant 0 : index
    %c0_199 = arith.constant 0 : index
    %483 = vector.load %arg8[%c0_198, %c0_199] : memref<4x128xf32, #tpu.memory_space<vmem>>, vector<4x128xf32>
    tpu.vector_store %arg8[%c0_198, %c0_199], %482 {strides = array<i32>} : memref<4x128xf32, #tpu.memory_space<vmem>>, vector<4x128xf32>,
    %484 = arith.subf %476, %444 : vector<4x128xf32>
    %485 = arith.mulf %479, %484 : vector<4x128xf32>
    %486 = arith.addf %444, %485 : vector<4x128xf32>
    %c0_200 = arith.constant 0 : index
    %c0_201 = arith.constant 0 : index
    %487 = vector.load %arg7[%c0_200, %c0_201] : memref<4x128xf32, #tpu.memory_space<vmem>>, vector<4x128xf32>
    tpu.vector_store %arg7[%c0_200, %c0_201], %486 {strides = array<i32>} : memref<4x128xf32, #tpu.memory_space<vmem>>, vector<4x128xf32>,
    %c11_i32 = arith.constant 11 : i32
    %c0_202 = arith.constant 0 : index
    %c0_203 = arith.constant 0 : index
    %488 = vector.load %arg7[%c0_202, %c0_203] : memref<4x128xf32, #tpu.memory_space<vmem>>, vector<4x128xf32>
    %c0_204 = arith.constant 0 : index
    %c0_205 = arith.constant 0 : index
    %489 = vector.load %arg8[%c0_204, %c0_205] : memref<4x128xf32, #tpu.memory_space<vmem>>, vector<4x128xf32>
    %490 = arith.index_cast %c11_i32 : i32 to index
    %c0_206 = arith.constant 0 : index
    %c0_207 = arith.constant 0 : index
    %491 = vector.load %arg1[%490, %c0_206, %c0_207] : memref<12x4x512xf32, #tpu.memory_space<vmem>>, vector<1x4x512xf32>
    %492 = vector.shape_cast %491 : vector<1x4x512xf32> to vector<4x512xf32>
    %c0_208 = arith.constant 0 : index
    %c0_209 = arith.constant 0 : index
    %493 = vector.load %arg3[%c0_208, %c0_209] : memref<128x512xf32, #tpu.memory_space<vmem>>, vector<128x512xf32>
    %cst_210 = arith.constant dense<0.000000e+00> : vector<4x512xf32>
    %494 = tpu.matmul %488, %493, %cst_210 {dimension_numbers = #tpu.dot_dimension_numbers<[1], [0], [0], [1], [0, 0, 1, 1], [], []>} : vector<4x128xf32>, vector<128x512xf32>, vector<4x512xf32> -> vector<4x512xf32>
    %495 = arith.addf %492, %494 : vector<4x512xf32>
    %496 = vector.extract_strided_slice %495 {offsets = [0, 0], sizes = [4, 128], strides = [1, 1]} : vector<4x512xf32> to vector<4x128xf32>
    %497 = arith.negf %496 : vector<4x128xf32>
    %498 = math.exp %497 : vector<4x128xf32>
    %cst_211 = arith.constant 1.000000e+00 : f32
    %499 = vector.broadcast %cst_211 : f32 to vector<4x128xf32>
    %500 = arith.addf %499, %498 : vector<4x128xf32>
    %501 = arith.divf %499, %500 : vector<4x128xf32>
    %502 = vector.extract_strided_slice %495 {offsets = [0, 128], sizes = [4, 128], strides = [1, 1]} : vector<4x512xf32> to vector<4x128xf32>
    %503 = arith.negf %502 : vector<4x128xf32>
    %504 = math.exp %503 : vector<4x128xf32>
    %cst_212 = arith.constant 1.000000e+00 : f32
    %505 = vector.broadcast %cst_212 : f32 to vector<4x128xf32>
    %506 = arith.addf %505, %504 : vector<4x128xf32>
    %507 = arith.divf %505, %506 : vector<4x128xf32>
    %508 = vector.extract_strided_slice %495 {offsets = [0, 256], sizes = [4, 128], strides = [1, 1]} : vector<4x512xf32> to vector<4x128xf32>
    %509 = math.tanh %508 : vector<4x128xf32>
    %510 = vector.extract_strided_slice %495 {offsets = [0, 384], sizes = [4, 128], strides = [1, 1]} : vector<4x512xf32> to vector<4x128xf32>
    %511 = arith.negf %510 : vector<4x128xf32>
    %512 = math.exp %511 : vector<4x128xf32>
    %cst_213 = arith.constant 1.000000e+00 : f32
    %513 = vector.broadcast %cst_213 : f32 to vector<4x128xf32>
    %514 = arith.addf %513, %512 : vector<4x128xf32>
    %515 = arith.divf %513, %514 : vector<4x128xf32>
    %516 = arith.mulf %507, %489 : vector<4x128xf32>
    %517 = arith.mulf %501, %509 : vector<4x128xf32>
    %518 = arith.addf %516, %517 : vector<4x128xf32>
    %519 = math.tanh %518 : vector<4x128xf32>
    %520 = arith.mulf %515, %519 : vector<4x128xf32>
    %521 = arith.index_cast %c11_i32 : i32 to index
    %c0_214 = arith.constant 0 : index
    %c0_215 = arith.constant 0 : index
    %522 = vector.load %arg2[%521, %c0_214, %c0_215] : memref<12x4x128xf32, #tpu.memory_space<vmem>>, vector<1x4x128xf32>
    %523 = vector.shape_cast %522 : vector<1x4x128xf32> to vector<4x128xf32>
    %524 = arith.subf %518, %489 : vector<4x128xf32>
    %525 = arith.mulf %523, %524 : vector<4x128xf32>
    %526 = arith.addf %489, %525 : vector<4x128xf32>
    %c0_216 = arith.constant 0 : index
    %c0_217 = arith.constant 0 : index
    %527 = vector.load %arg8[%c0_216, %c0_217] : memref<4x128xf32, #tpu.memory_space<vmem>>, vector<4x128xf32>
    tpu.vector_store %arg8[%c0_216, %c0_217], %526 {strides = array<i32>} : memref<4x128xf32, #tpu.memory_space<vmem>>, vector<4x128xf32>,
    %528 = arith.subf %520, %488 : vector<4x128xf32>
    %529 = arith.mulf %523, %528 : vector<4x128xf32>
    %530 = arith.addf %488, %529 : vector<4x128xf32>
    %c0_218 = arith.constant 0 : index
    %c0_219 = arith.constant 0 : index
    %531 = vector.load %arg7[%c0_218, %c0_219] : memref<4x128xf32, #tpu.memory_space<vmem>>, vector<4x128xf32>
    tpu.vector_store %arg7[%c0_218, %c0_219], %530 {strides = array<i32>} : memref<4x128xf32, #tpu.memory_space<vmem>>, vector<4x128xf32>,
    %c12_i32 = arith.constant 12 : i32
    %c0_220 = arith.constant 0 : index
    %c0_221 = arith.constant 0 : index
    %532 = vector.load %arg8[%c0_220, %c0_221] : memref<4x128xf32, #tpu.memory_space<vmem>>, vector<4x128xf32>
    %c0_222 = arith.constant 0 : index
    %c0_223 = arith.constant 0 : index
    %533 = vector.load %arg4[%c0_222, %c0_223] : memref<128x128xf32, #tpu.memory_space<vmem>>, vector<128x128xf32>
    %cst_224 = arith.constant dense<0.000000e+00> : vector<4x128xf32>
    %534 = tpu.matmul %532, %533, %cst_224 {dimension_numbers = #tpu.dot_dimension_numbers<[1], [0], [0], [1], [0, 0, 1, 1], [], []>} : vector<4x128xf32>, vector<128x128xf32>, vector<4x128xf32> -> vector<4x128xf32>
    %c0_225 = arith.constant 0 : index
    %c0_226 = arith.constant 0 : index
    %535 = vector.load %arg5[%c0_225, %c0_226] : memref<1x128xf32, #tpu.memory_space<vmem>>, vector<1x128xf32>
    %536 = vector.broadcast %535 : vector<1x128xf32> to vector<4x128xf32>
    %537 = arith.addf %534, %536 : vector<4x128xf32>
    %c0_227 = arith.constant 0 : index
    %c0_228 = arith.constant 0 : index
    %538 = vector.load %arg6[%c0_227, %c0_228] : memref<4x128xf32, #tpu.memory_space<vmem>>, vector<4x128xf32>
    tpu.vector_store %arg6[%c0_227, %c0_228], %537 {strides = array<i32>} : memref<4x128xf32, #tpu.memory_space<vmem>>, vector<4x128xf32>,
    return
  }
  func.func @transform_0(%arg0: i32) -> (i32, i32, i32) {
    %c0_i32 = arith.constant 0 : i32
    %c0_i32_0 = arith.constant 0 : i32
    %c0_i32_1 = arith.constant 0 : i32
    %c0_i32_2 = arith.constant 0 : i32
    return %c0_i32, %c0_i32_0, %c0_i32_1 : i32, i32, i32
  }
  func.func @transform_1(%arg0: i32) -> (i32, i32, i32) {
    %c0_i32 = arith.constant 0 : i32
    %c0_i32_0 = arith.constant 0 : i32
    %c0_i32_1 = arith.constant 0 : i32
    %c0_i32_2 = arith.constant 0 : i32
    return %c0_i32, %c0_i32_0, %c0_i32_1 : i32, i32, i32
  }
  func.func @transform_2(%arg0: i32) -> (i32, i32) {
    %c0_i32 = arith.constant 0 : i32
    %c0_i32_0 = arith.constant 0 : i32
    %c0_i32_1 = arith.constant 0 : i32
    return %c0_i32, %c0_i32_0 : i32, i32
  }
  func.func @transform_3(%arg0: i32) -> (i32, i32) {
    %c0_i32 = arith.constant 0 : i32
    %c0_i32_0 = arith.constant 0 : i32
    %c0_i32_1 = arith.constant 0 : i32
    return %c0_i32, %c0_i32_0 : i32, i32
  }
  func.func @transform_4(%arg0: i32) -> (i32, i32) {
    %c0_i32 = arith.constant 0 : i32
    %c0_i32_0 = arith.constant 0 : i32
    %c0_i32_1 = arith.constant 0 : i32
    return %c0_i32, %c0_i32_0 : i32, i32
  }
  func.func @transform_5(%arg0: i32) -> (i32, i32) {
    %c0_i32 = arith.constant 0 : i32
    %c0_i32_0 = arith.constant 0 : i32
    %c0_i32_1 = arith.constant 0 : i32
    return %c0_i32, %c0_i32_0 : i32, i32
  }
}

</mosaic_0001>

<bundles_post_ra>
// kernel: lstmnet_forward.1
= control target key start
LH: loop header
LB: loop body
LE: loop exit
PB: predicated region body
PF: predicated region fallthrough
CT: control target
= control target key end

     0   :  { %v5926_v3 = vmov 0.0   ;;  %vm3568_vm0 = vmmov 0   ;;  %s5920_s2 = inlined_call_operand.vmem [shape: f32[128,512], index: 2, kind: input, shape index: {}]   ;;  %s5921_s0 = inlined_call_operand.vmem [shape: f32[12,4,512], index: 0, kind: input, shape index: {}]   ;;  %s5922_s1 = inlined_call_operand.vmem [shape: f32[12,4,128], index: 1, kind: input, shape index: {}]   ;;  %s5923_s3 = inlined_call_operand.vmem [shape: f32[128,128], index: 3, kind: input, shape index: {}]   ;;  %s5924_s4 = inlined_call_operand.vmem [shape: f32[1,128], index: 4, kind: input, shape index: {}]   ;;  %s5925_s5 = inlined_call_operand.vmem [shape: f32[4,128], index: 5, kind: output, shape index: {}]  }
   0x1   :  { %v3602_v0 = vld [vmem:[%s5920_s2 + $0x1e8] sm:$0xff]  ;;  %v3607_v1 = vld [vmem:[%s5920_s2 + $0x1e0] sm:$0xff]  ;;  %154 = vmatprep.mubr.f32.mxu0 %v5926_v3  ;;  %20 = vst [vmem:[#allocation2] sm:$0xf] %v5926_v3  ;;  %21 = vst [vmem:[#allocation3] sm:$0xf] %v5926_v3  ;;  %225 = vmatprep.mubr.f32.mxu1 %v5926_v3 }
   0x2   :  { %v3612_v2 = vld [vmem:[%s5920_s2 + $0x1c8] sm:$0xff]  ;;  %90 = vmatprep.subr.mxu0 %v3602_v0  ;;  %v3622_v4 = vld [vmem:[%s5920_s2 + $0x1c0] sm:$0xff]  ;;  %v3651_v9 = vld [vmem:[%s5920_s2 + $0x1f8] sm:$0xff] }
   0x3   :  { %91 = vmatpush1.msra.mxu0 %v3607_v1  ;;  %v3628_v5 = vld [vmem:[%s5920_s2 + $0x1a8] sm:$0xff]  ;;  %v3634_v6 = vld [vmem:[%s5920_s2 + $0x1a0] sm:$0xff]  ;;  %6022 = vst [vmem:[#allocation4_spill] sm:$0xff] %v3651_v9  ;;  %161 = vmatprep.subr.mxu1 %v3651_v9  ;;  %v3663_v11 = vld [vmem:[%s5920_s2 + $0x1f0] sm:$0xff] }
   0x4   :  { %92 = vmatprep.subr.mxu0 %v3612_v2  ;;  %v3640_v7 = vld [vmem:[%s5920_s2 + $0x188] sm:$0xff]  ;;  %v3646_v8 = vld [vmem:[%s5920_s2 + $0x180] sm:$0xff]  ;;  %162 = vmatpush1.msra.mxu1 %v3663_v11  ;;  %v3675_v13 = vld [vmem:[%s5920_s2 + $0x1d8] sm:$0xff] }
   0x5   :  { %93 = vmatpush1.msra.mxu0 %v3622_v4  ;;  %v3657_v10 = vld [vmem:[%s5920_s2 + $0x168] sm:$0xff]  ;;  %v3669_v12 = vld [vmem:[%s5920_s2 + $0x160] sm:$0xff]  ;;  %v3680_v14 = vld [vmem:[%s5920_s2 + $0x1d0] sm:$0xff]  ;;  %163 = vmatprep.subr.mxu1 %v3675_v13 }
   0x6   :  { %94 = vmatprep.subr.mxu0 %v3628_v5  ;;  %v3686_v15 = vld [vmem:[%s5920_s2 + $0x148] sm:$0xff]  ;;  %v3692_v16 = vld [vmem:[%s5920_s2 + $0x1b8] sm:$0xff]  ;;  %v3698_v17 = vld [vmem:[%s5920_s2 + $0x140] sm:$0xff]  ;;  %164 = vmatpush1.msra.mxu1 %v3680_v14 }
   0x7   :  { %95 = vmatpush1.msra.mxu0 %v3634_v6  ;;  %v3704_v18 = vld [vmem:[%s5920_s2 + $0x1b0] sm:$0xff]  ;;  %v3709_v19 = vld [vmem:[%s5920_s2 + $0x198] sm:$0xff]  ;;  %v3715_v20 = vld [vmem:[%s5920_s2 + $0x128] sm:$0xff]  ;;  %165 = vmatprep.subr.mxu1 %v3692_v16 }
   0x8   :  { %96 = vmatprep.subr.mxu0 %v3640_v7  ;;  %v3721_v21 = vld [vmem:[%s5920_s2 + $0x190] sm:$0xff]  ;;  %v3727_v22 = vld [vmem:[%s5920_s2 + $0x120] sm:$0xff]  ;;  %166 = vmatpush1.msra.mxu1 %v3704_v18  ;;  %v3733_v23 = vld [vmem:[%s5920_s2 + $0x178] sm:$0xff] }
   0x9   :  { %97 = vmatpush1.msra.mxu0 %v3646_v8  ;;  %v3739_v24 = vld [vmem:[%s5920_s2 + $0x108] sm:$0xff]  ;;  %167 = vmatprep.subr.mxu1 %v3709_v19  ;;  %v3745_v25 = vld [vmem:[%s5920_s2 + $0x170] sm:$0xff]  ;;  %v3751_v26 = vld [vmem:[%s5920_s2 + $0x100] sm:$0xff] }
   0xa   :  { %98 = vmatprep.subr.mxu0 %v3657_v10  ;;  %168 = vmatpush1.msra.mxu1 %v3721_v21  ;;  %v3757_v27 = vld [vmem:[%s5920_s2 + $0x158] sm:$0xff]  ;;  %v3763_v28 = vld [vmem:[%s5920_s2 + $0xe8] sm:$0xff]  ;;  %v3769_v29 = vld [vmem:[%s5920_s2 + $0x150] sm:$0xff] }
   0xb   :  { %99 = vmatpush1.msra.mxu0 %v3669_v12  ;;  %169 = vmatprep.subr.mxu1 %v3733_v23  ;;  %v3775_v30 = vld [vmem:[%s5920_s2 + $0xe0] sm:$0xff]  ;;  %v3781_v31 = vld [vmem:[%s5920_s2 + $0x138] sm:$0xff]  ;;  %v3787_v32 = vld [vmem:[%s5920_s2 + $0xc8] sm:$0xff] }
   0xc   :  { %100 = vmatprep.subr.mxu0 %v3686_v15  ;;  %170 = vmatpush1.msra.mxu1 %v3745_v25  ;;  %v3793_v33 = vld [vmem:[%s5920_s2 + $0x130] sm:$0xff]  ;;  %v3799_v34 = vld [vmem:[%s5920_s2 + $0xc0] sm:$0xff]  ;;  %v3805_v35 = vld [vmem:[%s5920_s2 + $0x118] sm:$0xff] }
   0xd   :  { %101 = vmatpush1.msra.mxu0 %v3698_v17  ;;  %171 = vmatprep.subr.mxu1 %v3757_v27  ;;  %v3811_v36 = vld [vmem:[%s5920_s2 + $0xa8] sm:$0xff]  ;;  %v3817_v37 = vld [vmem:[%s5920_s2 + $0x110] sm:$0xff]  ;;  %v3823_v38 = vld [vmem:[%s5920_s2 + $0xa0] sm:$0xff] }
   0xe   :  { %102 = vmatprep.subr.mxu0 %v3715_v20  ;;  %172 = vmatpush1.msra.mxu1 %v3769_v29  ;;  %v3829_v39 = vld [vmem:[%s5920_s2 + $0xf8] sm:$0xff]  ;;  %v3835_v40 = vld [vmem:[%s5920_s2 + $0x88] sm:$0xff]  ;;  %v3841_v41 = vld [vmem:[%s5920_s2 + $0xf0] sm:$0xff] }
   0xf   :  { %103 = vmatpush1.msra.mxu0 %v3727_v22  ;;  %173 = vmatprep.subr.mxu1 %v3781_v31  ;;  %v3847_v42 = vld [vmem:[%s5920_s2 + $0x80] sm:$0xff]  ;;  %v3853_v43 = vld [vmem:[%s5920_s2 + $0xd8] sm:$0xff]  ;;  %v3859_v44 = vld [vmem:[%s5920_s2 + $0x68] sm:$0xff] }
  0x10   :  { %104 = vmatprep.subr.mxu0 %v3739_v24  ;;  %174 = vmatpush1.msra.mxu1 %v3793_v33  ;;  %6023 = vst [vmem:[#allocation5_spill] sm:$0xff] %v3859_v44  ;;  %v3865_v45 = vld [vmem:[%s5920_s2 + $0xd0] sm:$0xff]  ;;  %v3871_v46 = vld [vmem:[%s5920_s2 + $0x60] sm:$0xff]  ;;  %v3877_v47 = vld [vmem:[%s5920_s2 + $0xb8] sm:$0xff] }
  0x11   :  { %105 = vmatpush1.msra.mxu0 %v3751_v26  ;;  %175 = vmatprep.subr.mxu1 %v3805_v35  ;;  %6024 = vst [vmem:[#allocation6_spill] sm:$0xff] %v3871_v46  ;;  %v3883_v48 = vld [vmem:[%s5920_s2 + $0x48] sm:$0xff]  ;;  %v3889_v49 = vld [vmem:[%s5920_s2 + $0xb0] sm:$0xff]  ;;  %v3895_v50 = vld [vmem:[%s5920_s2 + $0x40] sm:$0xff] }
  0x12   :  { %106 = vmatprep.subr.mxu0 %v3763_v28  ;;  %176 = vmatpush1.msra.mxu1 %v3817_v37  ;;  %6025 = vst [vmem:[#allocation7_spill] sm:$0xff] %v3883_v48  ;;  %6026 = vst [vmem:[#allocation8_spill] sm:$0xff] %v3895_v50  ;;  %v3901_v51 = vld [vmem:[%s5920_s2 + $0x98] sm:$0xff]  ;;  %v3907_v52 = vld [vmem:[%s5920_s2 + $0x28] sm:$0xff] }
  0x13   :  { %107 = vmatpush1.msra.mxu0 %v3775_v30  ;;  %177 = vmatprep.subr.mxu1 %v3829_v39  ;;  %6027 = vst [vmem:[#allocation9_spill] sm:$0xff] %v3907_v52  ;;  %v3913_v53 = vld [vmem:[%s5920_s2 + $0x90] sm:$0xff]  ;;  %v3919_v54 = vld [vmem:[%s5920_s2 + $0x20] sm:$0xff]  ;;  %v3925_v55 = vld [vmem:[%s5920_s2 + $0x78] sm:$0xff] }
  0x14   :  { %108 = vmatprep.subr.mxu0 %v3787_v32  ;;  %178 = vmatpush1.msra.mxu1 %v3841_v41  ;;  %6028 = vst [vmem:[#allocation10_spill] sm:$0xff] %v3913_v53  ;;  %6029 = vst [vmem:[#allocation11_spill] sm:$0xff] %v3919_v54  ;;  %v3931_v56 = vld [vmem:[%s5920_s2 + $0x8] sm:$0xff]  ;;  %v3937_v57 = vld [vmem:[%s5920_s2 + $0x70] sm:$0xff] }
  0x15   :  { %109 = vmatpush1.msra.mxu0 %v3799_v34  ;;  %179 = vmatprep.subr.mxu1 %v3853_v43  ;;  %6030 = vst [vmem:[#allocation12_spill] sm:$0xff] %v3925_v55  ;;  %6031 = vst [vmem:[#allocation13_spill] sm:$0xff] %v3931_v56  ;;  %v3943_v58 = vld [vmem:[%s5920_s2] sm:$0xff]  ;;  %v3949_v59 = vld [vmem:[%s5920_s2 + $0x58] sm:$0xff] }
  0x16   :  { %110 = vmatprep.subr.mxu0 %v3811_v36  ;;  %180 = vmatpush1.msra.mxu1 %v3865_v45  ;;  %6032 = vst [vmem:[#allocation14_spill] sm:$0xff] %v3937_v57  ;;  %6033 = vst [vmem:[#allocation15_spill] sm:$0xff] %v3943_v58  ;;  %v3952_v60 = vld [vmem:[#allocation2] sm:$0xf]  ;;  %v3958_v61 = vld [vmem:[%s5920_s2 + $0x50] sm:$0xff] }
  0x17   :  { %111 = vmatpush1.msra.mxu0 %v3823_v38  ;;  %181 = vmatprep.subr.mxu1 %v3877_v47  ;;  %6034 = vst [vmem:[#allocation16_spill] sm:$0xff] %v3949_v59  ;;  %6035 = vst [vmem:[#allocation17_spill] sm:$0xff] %v3958_v61  ;;  %v3965_v62 = vld [vmem:[%s5920_s2 + $0x38] sm:$0xff]  ;;  %v3972_v63 = vld [vmem:[%s5920_s2 + $0x30] sm:$0xff] }
  0x18   :  { %112 = vmatprep.subr.mxu0 %v3835_v40  ;;  %182 = vmatpush1.msra.mxu1 %v3889_v49  ;;  %6036 = vst [vmem:[#allocation18_spill] sm:$0xff] %v3965_v62  ;;  %6037 = vst [vmem:[#allocation19_spill] sm:$0xff] %v3972_v63  ;;  %v3979_v3 = vld [vmem:[%s5920_s2 + $0x18] sm:$0xff] }
  0x19   :  { %113 = vmatpush1.msra.mxu0 %v3847_v42  ;;  %183 = vmatprep.subr.mxu1 %v3901_v51  ;;  %6038 = vst [vmem:[#allocation20_spill] sm:$0xff] %v3979_v3 }
  0x1a   :  { %114 = vmatprep.subr.mxu0 %v3859_v44  ;;  %184 = vmatpush1.msra.mxu1 %v3913_v53 }
  0x1b   :  { %115 = vmatpush1.msra.mxu0 %v3871_v46  ;;  %185 = vmatprep.subr.mxu1 %v3925_v55 }
  0x1c   :  { %116 = vmatprep.subr.mxu0 %v3883_v48  ;;  %186 = vmatpush1.msra.mxu1 %v3937_v57 }
  0x1d   :  { %117 = vmatpush1.msra.mxu0 %v3895_v50  ;;  %187 = vmatprep.subr.mxu1 %v3949_v59 }
  0x1e   :  { %118 = vmatprep.subr.mxu0 %v3907_v52  ;;  %188 = vmatpush1.msra.mxu1 %v3958_v61 }
  0x1f   :  { %119 = vmatpush1.msra.mxu0 %v3919_v54  ;;  %189 = vmatprep.subr.mxu1 %v3965_v62 }
  0x20   :  { %120 = vmatprep.subr.mxu0 %v3931_v56  ;;  %190 = vmatpush1.msra.mxu1 %v3972_v63 }
  0x21   :  { %121 = vmatpush1.msra.mxu0 %v3943_v58  ;;  %v3985_v58 = vld [vmem:[%s5920_s2 + $0x10] sm:$0xff]  ;;  %191 = vmatprep.subr.mxu1 %v3979_v3 }
  0x22   :  { %155 = vmatmul.mubr.f32.vlgmr.msra.gmra.mxu0 %v3952_v60  ;;  %6039 = vst [vmem:[#allocation21_spill] sm:$0xff] %v3985_v58  ;;  %350 = vmatprep.subr.mxu0 %v3602_v0 }
  0x23   :  { %351 = vmatpush1.msra.mxu0 %v3607_v1  ;;  %192 = vmatpush1.msra.mxu1 %v3985_v58 }
  0x24   :  { %352 = vmatprep.subr.mxu0 %v3612_v2  ;;  %226 = vmatmul.mubr.f32.vlgmr.msra.gmra.mxu1 %v3952_v60 }
  0x25   :  { %353 = vmatpush1.msra.mxu0 %v3622_v4  ;;  %421 = vmatprep.subr.mxu1 %v3651_v9 }
  0x26   :  { %422 = vmatpush1.msra.mxu1 %v3663_v11  ;;  %354 = vmatprep.subr.mxu0 %v3628_v5 }
  0x27   :  { %423 = vmatprep.subr.mxu1 %v3675_v13  ;;  %355 = vmatpush1.msra.mxu0 %v3634_v6 }
  0x28   :  { %424 = vmatpush1.msra.mxu1 %v3680_v14  ;;  %356 = vmatprep.subr.mxu0 %v3640_v7 }
  0x29   :  { %425 = vmatprep.subr.mxu1 %v3692_v16  ;;  %357 = vmatpush1.msra.mxu0 %v3646_v8 }
  0x2a   :  { %426 = vmatpush1.msra.mxu1 %v3704_v18  ;;  %358 = vmatprep.subr.mxu0 %v3657_v10 }
  0x2b   :  { %427 = vmatprep.subr.mxu1 %v3709_v19  ;;  %359 = vmatpush1.msra.mxu0 %v3669_v12 }
  0x2c   :  { %428 = vmatpush1.msra.mxu1 %v3721_v21  ;;  %360 = vmatprep.subr.mxu0 %v3686_v15 }
  0x2d   :  { %429 = vmatprep.subr.mxu1 %v3733_v23  ;;  %361 = vmatpush1.msra.mxu0 %v3698_v17 }
  0x2e   :  { %430 = vmatpush1.msra.mxu1 %v3745_v25  ;;  %362 = vmatprep.subr.mxu0 %v3715_v20 }
  0x2f   :  { %431 = vmatprep.subr.mxu1 %v3757_v27  ;;  %363 = vmatpush1.msra.mxu0 %v3727_v22 }
  0x30   :  { %432 = vmatpush1.msra.mxu1 %v3769_v29  ;;  %364 = vmatprep.subr.mxu0 %v3739_v24 }
  0x31   :  { %433 = vmatprep.subr.mxu1 %v3781_v31  ;;  %365 = vmatpush1.msra.mxu0 %v3751_v26 }
  0x32   :  { %434 = vmatpush1.msra.mxu1 %v3793_v33  ;;  %366 = vmatprep.subr.mxu0 %v3763_v28 }
  0x33   :  { %435 = vmatprep.subr.mxu1 %v3805_v35  ;;  %367 = vmatpush1.msra.mxu0 %v3775_v30 }
  0x34   :  { %436 = vmatpush1.msra.mxu1 %v3817_v37  ;;  %368 = vmatprep.subr.mxu0 %v3787_v32 }
  0x35   :  { %437 = vmatprep.subr.mxu1 %v3829_v39  ;;  %369 = vmatpush1.msra.mxu0 %v3799_v34 }
  0x36   :  { %438 = vmatpush1.msra.mxu1 %v3841_v41  ;;  %370 = vmatprep.subr.mxu0 %v3811_v36 }
  0x37   :  { %439 = vmatprep.subr.mxu1 %v3853_v43  ;;  %371 = vmatpush1.msra.mxu0 %v3823_v38 }
  0x38   :  { %440 = vmatpush1.msra.mxu1 %v3865_v45  ;;  %372 = vmatprep.subr.mxu0 %v3835_v40 }
  0x39   :  { %441 = vmatprep.subr.mxu1 %v3877_v47  ;;  %373 = vmatpush1.msra.mxu0 %v3847_v42 }
  0x3a   :  { %442 = vmatpush1.msra.mxu1 %v3889_v49  ;;  %374 = vmatprep.subr.mxu0 %v3859_v44 }
  0x3b   :  { %443 = vmatprep.subr.mxu1 %v3901_v51  ;;  %375 = vmatpush1.msra.mxu0 %v3871_v46  ;;  %v6040_v46 = vld [vmem:[#allocation15_spill] sm:$0xff] }
  0x3c   :  { %444 = vmatpush1.msra.mxu1 %v3913_v53  ;;  %376 = vmatprep.subr.mxu0 %v3883_v48  ;;  %v6041_v48 = vmov 0.0  }
  0x3d   :  { %445 = vmatprep.subr.mxu1 %v3925_v55  ;;  %377 = vmatpush1.msra.mxu0 %v3895_v50 }
  0x3e   :  { %446 = vmatpush1.msra.mxu1 %v3937_v57  ;;  %378 = vmatprep.subr.mxu0 %v3907_v52 }
  0x3f   :  { %447 = vmatprep.subr.mxu1 %v3949_v59  ;;  %379 = vmatpush1.msra.mxu0 %v3919_v54 }
  0x40   :  { %448 = vmatpush1.msra.mxu1 %v3958_v61  ;;  %380 = vmatprep.subr.mxu0 %v3931_v56  ;;  %v24_v56 = vld [vmem:[%s5921_s0] sm:$0xff] }
  0x41   :  { %449 = vmatprep.subr.mxu1 %v3965_v62  ;;  %381 = vmatpush1.msra.mxu0 %v6040_v46 }
  0x42   :  { %450 = vmatpush1.msra.mxu1 %v3972_v63  ;;  %414 = vmatprep.mubr.f32.mxu0 %v6041_v48 }
  0x43   :  { %451 = vmatprep.subr.mxu1 %v3979_v3  ;;  %485 = vmatprep.mubr.f32.mxu1 %v6041_v48 }
  0x44   :  { %452 = vmatpush1.msra.mxu1 %v3985_v58  ;;  %611 = vmatprep.subr.mxu0 %v3602_v0  ;;  %v25_v0 = vld [vmem:[%s5921_s0 + $0x8] sm:$0xff] }
  0x45   :  { %682 = vmatprep.subr.mxu1 %v3651_v9 }
  0xe2   :  { %v156_v54 = vpop.f32.mrf.mxu0 }
  0xe4   :  { %v158_v46 = vpop.f32.mrf.mxu0  ;;  %v227_v52 = vpop.f32.mrf.mxu1 }
  0xe5   :  { %v236_v62 = vcombine.low %v156_v54, %v158_v46 }
  0xe6   :  { %v229_v3 = vpop.f32.mrf.mxu1 }
  0xe7   :  { %v240_v63 = vadd.f32 %v236_v62, %v24_v56  ;;  %v237_v59 = vcombine.low %v227_v52, %v229_v3  ;;  %v23_v52 = vld [vmem:[#allocation3] sm:$0xf] }
  0xe9   :  { %v3251_v61 = vmul.f32 -1.442695, %v240_v63  ;;  %v249_v50 = vrot.slane %v240_v63, 4  ;;  %v241_v9 = vadd.f32 %v237_v59, %v25_v0 }
  0xeb   :  { %3375 = vpow2.f32 %v3251_v61  ;;  %v3252_v48 = vmul.f32 -1.442695, %v249_v50  ;;  %v259_v58 = vrot.slane %v241_v9, 4 }
  0xed   :  { %3377 = vpow2.f32 %v3252_v48  ;;  %v3253_v57 = vmul.f32 -1.442695, %v259_v58 }
  0xef   :  { %3379 = vpow2.f32 %v3253_v57 }
  0xf8   :  { %v3376_v55 = vpop.eup %3375 }
  0xf9   :  { %v245_v44 = vadd.f32 1.0, %v3376_v55  ;;  %v272_v55 = vld [vmem:[%s5922_s1] sm:$0xf] }
  0xfa   :  { %v3378_v53 = vpop.eup %3377 }
  0xfb   :  { %3381 = vrcp.f32 %v245_v44  ;;  %v254_v46 = vadd.f32 1.0, %v3378_v53 }
  0xfc   :  { %3383 = vtanh.f32 %v241_v9  ;;  %v3380_v54 = vpop.eup %3379 }
  0xfd   :  { %3385 = vrcp.f32 %v254_v46  ;;  %v264_v61 = vadd.f32 1.0, %v3380_v54 }
  0xff   :  { %3387 = vrcp.f32 %v264_v61 }
 0x108   :  { %v3382_v3 = vpop.eup %3381 }
 0x109   :  { %v3384_v50 = vpop.eup %3383 }
 0x10a   :  { %v3386_v56 = vpop.eup %3385  ;;  %v268_v63 = vmul.f32 %v3384_v50, %v3382_v3 }
 0x10b   :  { %v267_v62 = vmul.f32 %v3386_v56, %v23_v52 }
 0x10c   :  { %v3388_v9 = vpop.eup %3387 }
 0x10d   :  { %v269_v48 = vadd.f32 %v268_v63, %v267_v62 }
 0x10f   :  { %3389 = vtanh.f32 %v269_v48  ;;  %v273_v57 = vsub.f32 %v269_v48, %v23_v52  ;;  %v3255_v48 = vld [vmem:[%s5921_s0 + $0x18] sm:$0xff] }
 0x111   :  { %v274_v44 = vmul.f32 %v273_v57, %v272_v55 }
 0x113   :  { %v275_v53 = vadd.f32 %v274_v44, %v23_v52 }
 0x115   :  { %276 = vst [vmem:[#allocation3] sm:$0xf] %v275_v53 }
 0x11c   :  { %v3390_v58 = vpop.eup %3389 }
 0x11d   :  { %v271_v59 = vmul.f32 %v3390_v58, %v3388_v9 }
 0x11f   :  { %v277_v0 = vsub.f32 %v271_v59, %v3952_v60 }
 0x121   :  { %v278_v46 = vmul.f32 %v277_v0, %v272_v55 }
 0x123   :  { %v279_v54 = vadd.f32 %v278_v46, %v3952_v60 }
 0x125   :  { %280 = vst [vmem:[#allocation2] sm:$0xf] %v279_v54 }
 0x12c   :  { %v4070_v3 = vld [vmem:[#allocation2] sm:$0xf] }
 0x12d   :  { %415 = vmatmul.mubr.f32.vlgmr.msra.gmra.mxu0 %v4070_v3  ;;  %486 = vmatmul.mubr.f32.vlgmr.msra.gmra.mxu1 %v4070_v3 }
 0x12e   :  { %612 = vmatpush1.msra.mxu0 %v3607_v1  ;;  %683 = vmatpush1.msra.mxu1 %v3663_v11  ;;  %v6042_v1 = vld [vmem:[#allocation10_spill] sm:$0xff] }
 0x12f   :  { %613 = vmatprep.subr.mxu0 %v3612_v2  ;;  %684 = vmatprep.subr.mxu1 %v3675_v13  ;;  %v6043_v2 = vld [vmem:[#allocation5_spill] sm:$0xff] }
 0x130   :  { %614 = vmatpush1.msra.mxu0 %v3622_v4  ;;  %685 = vmatpush1.msra.mxu1 %v3680_v14  ;;  %v6044_v4 = vld [vmem:[#allocation12_spill] sm:$0xff] }
 0x131   :  { %615 = vmatprep.subr.mxu0 %v3628_v5  ;;  %686 = vmatprep.subr.mxu1 %v3692_v16  ;;  %v6045_v5 = vld [vmem:[#allocation6_spill] sm:$0xff] }
 0x132   :  { %616 = vmatpush1.msra.mxu0 %v3634_v6  ;;  %687 = vmatpush1.msra.mxu1 %v3704_v18  ;;  %v6046_v6 = vld [vmem:[#allocation14_spill] sm:$0xff] }
 0x133   :  { %617 = vmatprep.subr.mxu0 %v3640_v7  ;;  %688 = vmatprep.subr.mxu1 %v3709_v19  ;;  %v6047_v7 = vld [vmem:[#allocation7_spill] sm:$0xff] }
 0x134   :  { %618 = vmatpush1.msra.mxu0 %v3646_v8  ;;  %689 = vmatpush1.msra.mxu1 %v3721_v21  ;;  %v6048_v8 = vld [vmem:[#allocation16_spill] sm:$0xff] }
 0x135   :  { %619 = vmatprep.subr.mxu0 %v3657_v10  ;;  %690 = vmatprep.subr.mxu1 %v3733_v23  ;;  %v6049_v10 = vld [vmem:[#allocation8_spill] sm:$0xff] }
 0x136   :  { %620 = vmatpush1.msra.mxu0 %v3669_v12  ;;  %691 = vmatpush1.msra.mxu1 %v3745_v25  ;;  %v6050_v12 = vld [vmem:[#allocation17_spill] sm:$0xff] }
 0x137   :  { %621 = vmatprep.subr.mxu0 %v3686_v15  ;;  %692 = vmatprep.subr.mxu1 %v3757_v27  ;;  %v6051_v15 = vld [vmem:[#allocation9_spill] sm:$0xff] }
 0x138   :  { %622 = vmatpush1.msra.mxu0 %v3698_v17  ;;  %693 = vmatpush1.msra.mxu1 %v3769_v29  ;;  %v6052_v17 = vld [vmem:[#allocation18_spill] sm:$0xff] }
 0x139   :  { %623 = vmatprep.subr.mxu0 %v3715_v20  ;;  %694 = vmatprep.subr.mxu1 %v3781_v31  ;;  %v6053_v20 = vld [vmem:[#allocation11_spill] sm:$0xff] }
 0x13a   :  { %624 = vmatpush1.msra.mxu0 %v3727_v22  ;;  %695 = vmatpush1.msra.mxu1 %v3793_v33  ;;  %v6054_v22 = vld [vmem:[#allocation19_spill] sm:$0xff] }
 0x13b   :  { %625 = vmatprep.subr.mxu0 %v3739_v24  ;;  %696 = vmatprep.subr.mxu1 %v3805_v35  ;;  %v6055_v24 = vld [vmem:[#allocation13_spill] sm:$0xff] }
 0x13c   :  { %626 = vmatpush1.msra.mxu0 %v3751_v26  ;;  %697 = vmatpush1.msra.mxu1 %v3817_v37  ;;  %v6056_v26 = vld [vmem:[#allocation20_spill] sm:$0xff] }
 0x13d   :  { %627 = vmatprep.subr.mxu0 %v3763_v28  ;;  %698 = vmatprep.subr.mxu1 %v3829_v39  ;;  %v6057_v28 = vld [vmem:[#allocation15_spill] sm:$0xff] }
 0x13e   :  { %628 = vmatpush1.msra.mxu0 %v3775_v30  ;;  %699 = vmatpush1.msra.mxu1 %v3841_v41  ;;  %v6058_v30 = vmov 0.0  }
 0x13f   :  { %629 = vmatprep.subr.mxu0 %v3787_v32  ;;  %700 = vmatprep.subr.mxu1 %v3853_v43  ;;  %v6059_v32 = vld [vmem:[#allocation21_spill] sm:$0xff] }
 0x140   :  { %630 = vmatpush1.msra.mxu0 %v3799_v34  ;;  %701 = vmatpush1.msra.mxu1 %v3865_v45  ;;  %v6060_v34 = vld [vmem:[#allocation4_spill] sm:$0xff] }
 0x141   :  { %631 = vmatprep.subr.mxu0 %v3811_v36  ;;  %702 = vmatprep.subr.mxu1 %v3877_v47 }
 0x142   :  { %632 = vmatpush1.msra.mxu0 %v3823_v38  ;;  %703 = vmatpush1.msra.mxu1 %v3889_v49 }
 0x143   :  { %633 = vmatprep.subr.mxu0 %v3835_v40  ;;  %704 = vmatprep.subr.mxu1 %v3901_v51  ;;  %v3254_v40 = vld [vmem:[%s5921_s0 + $0x10] sm:$0xff] }
 0x144   :  { %634 = vmatpush1.msra.mxu0 %v3847_v42  ;;  %705 = vmatpush1.msra.mxu1 %v6042_v1 }
 0x145   :  { %635 = vmatprep.subr.mxu0 %v6043_v2  ;;  %706 = vmatprep.subr.mxu1 %v6044_v4 }
 0x146   :  { %636 = vmatpush1.msra.mxu0 %v6045_v5  ;;  %707 = vmatpush1.msra.mxu1 %v6046_v6  ;;  %v282_v5 = vld [vmem:[#allocation3] sm:$0xf] }
 0x147   :  { %637 = vmatprep.subr.mxu0 %v6047_v7  ;;  %708 = vmatprep.subr.mxu1 %v6048_v8 }
 0x148   :  { %638 = vmatpush1.msra.mxu0 %v6049_v10  ;;  %709 = vmatpush1.msra.mxu1 %v6050_v12 }
 0x149   :  { %639 = vmatprep.subr.mxu0 %v6051_v15  ;;  %710 = vmatprep.subr.mxu1 %v6052_v17 }
 0x14a   :  { %640 = vmatpush1.msra.mxu0 %v6053_v20  ;;  %711 = vmatpush1.msra.mxu1 %v6054_v22  ;;  %v3259_v22 = vld [vmem:[%s5922_s1 + $0x4] sm:$0xf] }
 0x14b   :  { %641 = vmatprep.subr.mxu0 %v6055_v24  ;;  %712 = vmatprep.subr.mxu1 %v6056_v26 }
 0x14c   :  { %642 = vmatpush1.msra.mxu0 %v6057_v28  ;;  %675 = vmatprep.mubr.f32.mxu0 %v6058_v30 }
 0x14d   :  { %713 = vmatpush1.msra.mxu1 %v6059_v32  ;;  %746 = vmatprep.mubr.f32.mxu1 %v6058_v30 }
 0x14e   :  { %943 = vmatprep.subr.mxu1 %v6060_v34 }
 0x1ed   :  { %v416_v36 = vpop.f32.mrf.mxu0  ;;  %v487_v38 = vpop.f32.mrf.mxu1 }
 0x1ef   :  { %v418_v42 = vpop.f32.mrf.mxu0  ;;  %v489_v50 = vpop.f32.mrf.mxu1 }
 0x1f0   :  { %v496_v60 = vcombine.low %v416_v36, %v418_v42  ;;  %v497_v62 = vcombine.low %v487_v38, %v489_v50  ;;  %v4363_v50 = vld [vmem:[%s5920_s2 + $0x18] sm:$0xff] }
 0x1f1   :  { %6067 = vst [vmem:[#allocation16_spill] sm:$0xff] %v4363_v50 }
 0x1f2   :  { %v500_v52 = vadd.f32 %v3254_v40, %v496_v60  ;;  %v501_v55 = vadd.f32 %v3255_v48, %v497_v62  ;;  %v4381_v62 = vld [vmem:[%s5920_s2 + $0x8] sm:$0xff] }
 0x1f3   :  { %6070 = vst [vmem:[#allocation9_spill] sm:$0xff] %v4381_v62 }
 0x1f4   :  { %v3256_v56 = vmul.f32 -1.442695, %v500_v52  ;;  %v509_v61 = vrot.slane %v500_v52, 4  ;;  %v519_v57 = vrot.slane %v501_v55, 4  ;;  %v4358_v52 = vld [vmem:[%s5920_s2 + $0x30] sm:$0xff] }
 0x1f5   :  { %6066 = vst [vmem:[#allocation7_spill] sm:$0xff] %v4358_v52 }
 0x1f6   :  { %3391 = vpow2.f32 %v3256_v56  ;;  %v3257_v63 = vmul.f32 -1.442695, %v509_v61  ;;  %v3258_v44 = vmul.f32 -1.442695, %v519_v57  ;;  %v4369_v56 = vld [vmem:[%s5920_s2 + $0x20] sm:$0xff]  ;;  %v4375_v61 = vld [vmem:[%s5920_s2 + $0x10] sm:$0xff] }
 0x1f7   :  { %6068 = vst [vmem:[#allocation8_spill] sm:$0xff] %v4369_v56  ;;  %6069 = vst [vmem:[#allocation17_spill] sm:$0xff] %v4375_v61  ;;  %v3260_v57 = vld [vmem:[%s5921_s0 + $0x20] sm:$0xff] }
 0x1f8   :  { %3393 = vpow2.f32 %v3257_v63  ;;  %v4388_v63 = vld [vmem:[%s5920_s2] sm:$0xff] }
 0x1f9   :  { %3395 = vpow2.f32 %v3258_v44  ;;  %6071 = vst [vmem:[#allocation18_spill] sm:$0xff] %v4388_v63 }
 0x203   :  { %v3392_v53 = vpop.eup %3391 }
 0x204   :  { %v505_v9 = vadd.f32 1.0, %v3392_v53 }
 0x205   :  { %v3394_v58 = vpop.eup %3393 }
 0x206   :  { %3397 = vrcp.f32 %v505_v9  ;;  %v514_v59 = vadd.f32 1.0, %v3394_v58  ;;  %v3396_v0 = vpop.eup %3395 }
 0x207   :  { %3399 = vtanh.f32 %v501_v55  ;;  %v524_v7 = vadd.f32 1.0, %v3396_v0 }
 0x208   :  { %3401 = vrcp.f32 %v514_v59 }
 0x209   :  { %3403 = vrcp.f32 %v524_v7 }
 0x213   :  { %v3398_v46 = vpop.eup %3397 }
 0x214   :  { %v3400_v54 = vpop.eup %3399 }
 0x215   :  { %v3402_v2 = vpop.eup %3401  ;;  %v528_v15 = vmul.f32 %v3400_v54, %v3398_v46 }
 0x216   :  { %v527_v10 = vmul.f32 %v3402_v2, %v282_v5  ;;  %v3404_v32 = vpop.eup %3403  ;;  %v3261_v2 = vld [vmem:[%s5921_s0 + $0x28] sm:$0xff] }
 0x218   :  { %v529_v20 = vadd.f32 %v528_v15, %v527_v10 }
 0x21a   :  { %3405 = vtanh.f32 %v529_v20  ;;  %v534_v24 = vsub.f32 %v529_v20, %v282_v5 }
 0x21c   :  { %v535_v26 = vmul.f32 %v3259_v22, %v534_v24 }
 0x21e   :  { %v536_v28 = vadd.f32 %v535_v26, %v282_v5 }
 0x220   :  { %537 = vst [vmem:[#allocation3] sm:$0xf] %v536_v28 }
 0x227   :  { %v3406_v34 = vpop.eup %3405 }
 0x228   :  { %v531_v36 = vmul.f32 %v3406_v34, %v3404_v32 }
 0x22a   :  { %v538_v38 = vsub.f32 %v531_v36, %v4070_v3  ;;  %v543_v36 = vld [vmem:[#allocation3] sm:$0xf] }
 0x22c   :  { %v539_v40 = vmul.f32 %v3259_v22, %v538_v38 }
 0x22e   :  { %v540_v42 = vadd.f32 %v539_v40, %v4070_v3  ;;  %v4319_v3 = vld [vmem:[%s5920_s2 + $0x88] sm:$0xff] }
 0x230   :  { %541 = vst [vmem:[#allocation2] sm:$0xf] %v540_v42 }
 0x237   :  { %v4150_v60 = vld [vmem:[#allocation2] sm:$0xf] }
 0x238   :  { %676 = vmatmul.mubr.f32.vlgmr.msra.gmra.mxu0 %v4150_v60  ;;  %747 = vmatmul.mubr.f32.vlgmr.msra.gmra.mxu1 %v4150_v60 }
 0x239   :  { %944 = vmatpush1.msra.mxu1 %v3663_v11  ;;  %936 = vmatprep.mubr.f32.mxu0 %v6058_v30  ;;  %v4187_v11 = vld [vmem:[%s5920_s2 + $0x1e8] sm:$0xff] }
 0x23a   :  { %945 = vmatprep.subr.mxu1 %v3675_v13  ;;  %1007 = vmatprep.mubr.f32.mxu1 %v6058_v30  ;;  %v4193_v13 = vld [vmem:[%s5920_s2 + $0x1e0] sm:$0xff] }
 0x23b   :  { %946 = vmatpush1.msra.mxu1 %v3680_v14  ;;  %872 = vmatprep.subr.mxu0 %v4187_v11  ;;  %v4199_v14 = vld [vmem:[%s5920_s2 + $0x1c8] sm:$0xff] }
 0x23c   :  { %947 = vmatprep.subr.mxu1 %v3692_v16  ;;  %873 = vmatpush1.msra.mxu0 %v4193_v13  ;;  %v4205_v16 = vld [vmem:[%s5920_s2 + $0x1c0] sm:$0xff] }
 0x23d   :  { %948 = vmatpush1.msra.mxu1 %v3704_v18  ;;  %874 = vmatprep.subr.mxu0 %v4199_v14  ;;  %v4211_v18 = vld [vmem:[%s5920_s2 + $0x1a8] sm:$0xff] }
 0x23e   :  { %949 = vmatprep.subr.mxu1 %v3709_v19  ;;  %875 = vmatpush1.msra.mxu0 %v4205_v16  ;;  %v4217_v19 = vld [vmem:[%s5920_s2 + $0x1a0] sm:$0xff] }
 0x23f   :  { %950 = vmatpush1.msra.mxu1 %v3721_v21  ;;  %876 = vmatprep.subr.mxu0 %v4211_v18  ;;  %v4223_v21 = vld [vmem:[%s5920_s2 + $0x188] sm:$0xff] }
 0x240   :  { %951 = vmatprep.subr.mxu1 %v3733_v23  ;;  %877 = vmatpush1.msra.mxu0 %v4217_v19  ;;  %v4229_v23 = vld [vmem:[%s5920_s2 + $0x180] sm:$0xff] }
 0x241   :  { %952 = vmatpush1.msra.mxu1 %v3745_v25  ;;  %878 = vmatprep.subr.mxu0 %v4223_v21  ;;  %v4235_v25 = vld [vmem:[%s5920_s2 + $0x168] sm:$0xff] }
 0x242   :  { %953 = vmatprep.subr.mxu1 %v3757_v27  ;;  %879 = vmatpush1.msra.mxu0 %v4229_v23  ;;  %v4241_v27 = vld [vmem:[%s5920_s2 + $0x160] sm:$0xff] }
 0x243   :  { %954 = vmatpush1.msra.mxu1 %v3769_v29  ;;  %880 = vmatprep.subr.mxu0 %v4235_v25  ;;  %v4247_v29 = vld [vmem:[%s5920_s2 + $0x148] sm:$0xff] }
 0x244   :  { %955 = vmatprep.subr.mxu1 %v3781_v31  ;;  %881 = vmatpush1.msra.mxu0 %v4241_v27  ;;  %v4253_v31 = vld [vmem:[%s5920_s2 + $0x140] sm:$0xff] }
 0x245   :  { %956 = vmatpush1.msra.mxu1 %v3793_v33  ;;  %882 = vmatprep.subr.mxu0 %v4247_v29  ;;  %v4259_v33 = vld [vmem:[%s5920_s2 + $0x128] sm:$0xff] }
 0x246   :  { %957 = vmatprep.subr.mxu1 %v3805_v35  ;;  %883 = vmatpush1.msra.mxu0 %v4253_v31  ;;  %v4265_v35 = vld [vmem:[%s5920_s2 + $0x120] sm:$0xff] }
 0x247   :  { %958 = vmatpush1.msra.mxu1 %v3817_v37  ;;  %884 = vmatprep.subr.mxu0 %v4259_v33  ;;  %v4271_v37 = vld [vmem:[%s5920_s2 + $0x108] sm:$0xff] }
 0x248   :  { %959 = vmatprep.subr.mxu1 %v3829_v39  ;;  %885 = vmatpush1.msra.mxu0 %v4265_v35  ;;  %v4277_v39 = vld [vmem:[%s5920_s2 + $0x100] sm:$0xff] }
 0x249   :  { %960 = vmatpush1.msra.mxu1 %v3841_v41  ;;  %886 = vmatprep.subr.mxu0 %v4271_v37  ;;  %v4283_v41 = vld [vmem:[%s5920_s2 + $0xe8] sm:$0xff] }
 0x24a   :  { %961 = vmatprep.subr.mxu1 %v3853_v43  ;;  %887 = vmatpush1.msra.mxu0 %v4277_v39  ;;  %v4289_v43 = vld [vmem:[%s5920_s2 + $0xe0] sm:$0xff] }
 0x24b   :  { %962 = vmatpush1.msra.mxu1 %v3865_v45  ;;  %888 = vmatprep.subr.mxu0 %v4283_v41  ;;  %v4295_v45 = vld [vmem:[%s5920_s2 + $0xc8] sm:$0xff] }
 0x24c   :  { %963 = vmatprep.subr.mxu1 %v3877_v47  ;;  %889 = vmatpush1.msra.mxu0 %v4289_v43  ;;  %v4301_v47 = vld [vmem:[%s5920_s2 + $0xc0] sm:$0xff] }
 0x24d   :  { %964 = vmatpush1.msra.mxu1 %v3889_v49  ;;  %890 = vmatprep.subr.mxu0 %v4295_v45  ;;  %v4307_v49 = vld [vmem:[%s5920_s2 + $0xa8] sm:$0xff] }
 0x24e   :  { %965 = vmatprep.subr.mxu1 %v3901_v51  ;;  %891 = vmatpush1.msra.mxu0 %v4301_v47  ;;  %v4313_v51 = vld [vmem:[%s5920_s2 + $0xa0] sm:$0xff] }
 0x24f   :  { %966 = vmatpush1.msra.mxu1 %v6042_v1  ;;  %892 = vmatprep.subr.mxu0 %v4307_v49  ;;  %v4325_v1 = vld [vmem:[%s5920_s2 + $0x80] sm:$0xff] }
 0x250   :  { %967 = vmatprep.subr.mxu1 %v6044_v4  ;;  %893 = vmatpush1.msra.mxu0 %v4313_v51  ;;  %v4331_v4 = vld [vmem:[%s5920_s2 + $0x68] sm:$0xff] }
 0x251   :  { %968 = vmatpush1.msra.mxu1 %v6046_v6  ;;  %894 = vmatprep.subr.mxu0 %v4319_v3  ;;  %6061 = vst [vmem:[#allocation10_spill] sm:$0xff] %v4331_v4  ;;  %v4336_v6 = vld [vmem:[%s5920_s2 + $0x60] sm:$0xff] }
 0x252   :  { %969 = vmatprep.subr.mxu1 %v6048_v8  ;;  %895 = vmatpush1.msra.mxu0 %v4325_v1  ;;  %6062 = vst [vmem:[#allocation5_spill] sm:$0xff] %v4336_v6  ;;  %v4341_v8 = vld [vmem:[%s5920_s2 + $0x48] sm:$0xff] }
 0x253   :  { %970 = vmatpush1.msra.mxu1 %v6050_v12  ;;  %6063 = vst [vmem:[#allocation12_spill] sm:$0xff] %v4341_v8  ;;  %896 = vmatprep.subr.mxu0 %v4331_v4  ;;  %v4347_v12 = vld [vmem:[%s5920_s2 + $0x40] sm:$0xff] }
 0x254   :  { %971 = vmatprep.subr.mxu1 %v6052_v17  ;;  %6064 = vst [vmem:[#allocation6_spill] sm:$0xff] %v4347_v12  ;;  %897 = vmatpush1.msra.mxu0 %v4336_v6  ;;  %v4353_v17 = vld [vmem:[%s5920_s2 + $0x28] sm:$0xff] }
 0x255   :  { %6065 = vst [vmem:[#allocation14_spill] sm:$0xff] %v4353_v17  ;;  %898 = vmatprep.subr.mxu0 %v4341_v8  ;;  %972 = vmatpush1.msra.mxu1 %v4358_v52 }
 0x256   :  { %899 = vmatpush1.msra.mxu0 %v4347_v12  ;;  %973 = vmatprep.subr.mxu1 %v4363_v50 }
 0x257   :  { %900 = vmatprep.subr.mxu0 %v4353_v17  ;;  %974 = vmatpush1.msra.mxu1 %v4375_v61 }
 0x258   :  { %901 = vmatpush1.msra.mxu0 %v4369_v56 }
 0x259   :  { %902 = vmatprep.subr.mxu0 %v4381_v62 }
 0x25a   :  { %903 = vmatpush1.msra.mxu0 %v4388_v63 }
 0x25b   :  { %1133 = vmatprep.subr.mxu0 %v4187_v11 }
 0x2f8   :  { %v677_v48 = vpop.f32.mrf.mxu0  ;;  %v748_v55 = vpop.f32.mrf.mxu1 }
 0x2fa   :  { %v679_v44 = vpop.f32.mrf.mxu0  ;;  %v750_v58 = vpop.f32.mrf.mxu1 }
 0x2fb   :  { %v757_v53 = vcombine.low %v677_v48, %v679_v44  ;;  %v758_v46 = vcombine.low %v748_v55, %v750_v58  ;;  %v3265_v55 = vld [vmem:[%s5922_s1 + $0x8] sm:$0xf] }
 0x2fd   :  { %v761_v9 = vadd.f32 %v3260_v57, %v757_v53  ;;  %v762_v5 = vadd.f32 %v3261_v2, %v758_v46 }
 0x2ff   :  { %v3262_v59 = vmul.f32 -1.442695, %v761_v9  ;;  %v770_v0 = vrot.slane %v761_v9, 4  ;;  %v780_v7 = vrot.slane %v762_v5, 4 }
 0x301   :  { %3407 = vpow2.f32 %v3262_v59  ;;  %v3263_v54 = vmul.f32 -1.442695, %v770_v0  ;;  %v3264_v10 = vmul.f32 -1.442695, %v780_v7  ;;  %v4459_v7 = vld [vmem:[%s5920_s2 + $0x1d8] sm:$0xff] }
 0x303   :  { %3409 = vpow2.f32 %v3263_v54 }
 0x304   :  { %3411 = vpow2.f32 %v3264_v10  ;;  %v4471_v10 = vld [vmem:[%s5920_s2 + $0x1b8] sm:$0xff] }
 0x30e   :  { %v3408_v15 = vpop.eup %3407 }
 0x30f   :  { %v766_v20 = vadd.f32 1.0, %v3408_v15  ;;  %v4477_v15 = vld [vmem:[%s5920_s2 + $0x1b0] sm:$0xff] }
 0x310   :  { %v3410_v22 = vpop.eup %3409 }
 0x311   :  { %3413 = vrcp.f32 %v766_v20  ;;  %v775_v24 = vadd.f32 1.0, %v3410_v22  ;;  %v3412_v26 = vpop.eup %3411  ;;  %v4483_v20 = vld [vmem:[%s5920_s2 + $0x198] sm:$0xff]  ;;  %v4489_v22 = vld [vmem:[%s5920_s2 + $0x190] sm:$0xff] }
 0x312   :  { %3415 = vtanh.f32 %v762_v5  ;;  %v785_v38 = vadd.f32 1.0, %v3412_v26  ;;  %v4453_v5 = vld [vmem:[%s5920_s2 + $0x1f0] sm:$0xff] }
 0x313   :  { %3417 = vrcp.f32 %v775_v24  ;;  %v4495_v24 = vld [vmem:[%s5920_s2 + $0x178] sm:$0xff]  ;;  %v4501_v26 = vld [vmem:[%s5920_s2 + $0x170] sm:$0xff] }
 0x314   :  { %3419 = vrcp.f32 %v785_v38  ;;  %v4531_v38 = vld [vmem:[%s5920_s2 + $0x118] sm:$0xff] }
 0x31e   :  { %v3414_v28 = vpop.eup %3413 }
 0x31f   :  { %v3416_v32 = vpop.eup %3415 }
 0x320   :  { %v3418_v34 = vpop.eup %3417  ;;  %v789_v42 = vmul.f32 %v3416_v32, %v3414_v28  ;;  %v4507_v28 = vld [vmem:[%s5920_s2 + $0x158] sm:$0xff]  ;;  %v4513_v32 = vld [vmem:[%s5920_s2 + $0x150] sm:$0xff] }
 0x321   :  { %v788_v40 = vmul.f32 %v3418_v34, %v543_v36  ;;  %v3420_v9 = vpop.eup %3419  ;;  %v4519_v34 = vld [vmem:[%s5920_s2 + $0x138] sm:$0xff] }
 0x323   :  { %v790_v48 = vadd.f32 %v789_v42, %v788_v40  ;;  %v4537_v40 = vld [vmem:[%s5920_s2 + $0x110] sm:$0xff]  ;;  %v4543_v42 = vld [vmem:[%s5920_s2 + $0xf8] sm:$0xff] }
 0x325   :  { %3421 = vtanh.f32 %v790_v48  ;;  %v795_v57 = vsub.f32 %v790_v48, %v543_v36  ;;  %v4549_v48 = vld [vmem:[%s5920_s2 + $0xf0] sm:$0xff] }
 0x327   :  { %v796_v44 = vmul.f32 %v3265_v55, %v795_v57  ;;  %v4561_v57 = vld [vmem:[%s5920_s2 + $0xd0] sm:$0xff] }
 0x329   :  { %v797_v53 = vadd.f32 %v796_v44, %v543_v36  ;;  %v4525_v36 = vld [vmem:[%s5920_s2 + $0x130] sm:$0xff]  ;;  %v4567_v44 = vld [vmem:[%s5920_s2 + $0xb8] sm:$0xff] }
 0x32b   :  { %798 = vst [vmem:[#allocation3] sm:$0xf] %v797_v53  ;;  %v4573_v53 = vld [vmem:[%s5920_s2 + $0xb0] sm:$0xff] }
 0x332   :  { %v3422_v58 = vpop.eup %3421 }
 0x333   :  { %v792_v59 = vmul.f32 %v3422_v58, %v3420_v9  ;;  %v4579_v9 = vld [vmem:[%s5920_s2 + $0x98] sm:$0xff]  ;;  %v4585_v58 = vld [vmem:[%s5920_s2 + $0x90] sm:$0xff] }
 0x334   :  { %6073 = vst [vmem:[#allocation19_spill] sm:$0xff] %v4585_v58 }
 0x335   :  { %v799_v0 = vsub.f32 %v792_v59, %v4150_v60  ;;  %v4591_v59 = vld [vmem:[%s5920_s2 + $0x78] sm:$0xff] }
 0x336   :  { %6074 = vst [vmem:[#allocation13_spill] sm:$0xff] %v4591_v59 }
 0x337   :  { %v800_v46 = vmul.f32 %v3265_v55, %v799_v0  ;;  %v4555_v55 = vld [vmem:[%s5920_s2 + $0xd8] sm:$0xff]  ;;  %v4596_v0 = vld [vmem:[%s5920_s2 + $0x70] sm:$0xff] }
 0x338   :  { %6075 = vst [vmem:[#allocation20_spill] sm:$0xff] %v4596_v0 }
 0x339   :  { %v801_v54 = vadd.f32 %v800_v46, %v4150_v60  ;;  %v4447_v60 = vld [vmem:[%s5920_s2 + $0x1f8] sm:$0xff] }
 0x33a   :  { %6072 = vst [vmem:[#allocation11_spill] sm:$0xff] %v4447_v60  ;;  %1204 = vmatprep.subr.mxu1 %v4447_v60  ;;  %v4601_v46 = vld [vmem:[%s5920_s2 + $0x58] sm:$0xff] }
 0x33b   :  { %802 = vst [vmem:[#allocation2] sm:$0xf] %v801_v54  ;;  %6076 = vst [vmem:[#allocation15_spill] sm:$0xff] %v4601_v46  ;;  %v4607_v54 = vld [vmem:[%s5920_s2 + $0x50] sm:$0xff] }
 0x33c   :  { %6077 = vst [vmem:[#allocation21_spill] sm:$0xff] %v4607_v54 }
 0x342   :  { %v4406_v2 = vld [vmem:[#allocation2] sm:$0xf] }
 0x343   :  { %937 = vmatmul.mubr.f32.vlgmr.msra.gmra.mxu0 %v4406_v2  ;;  %1008 = vmatmul.mubr.f32.vlgmr.msra.gmra.mxu1 %v4406_v2 }
 0x344   :  { %1134 = vmatpush1.msra.mxu0 %v4193_v13  ;;  %1197 = vmatprep.mubr.f32.mxu0 %v6058_v30 }
 0x345   :  { %1135 = vmatprep.subr.mxu0 %v4199_v14  ;;  %1268 = vmatprep.mubr.f32.mxu1 %v6058_v30  ;;  %v4613_v30 = vld [vmem:[%s5920_s2 + $0x38] sm:$0xff] }
 0x346   :  { %1136 = vmatpush1.msra.mxu0 %v4205_v16  ;;  %1205 = vmatpush1.msra.mxu1 %v4453_v5  ;;  %6078 = vst [vmem:[#allocation4_spill] sm:$0xff] %v4613_v30 }
 0x347   :  { %1137 = vmatprep.subr.mxu0 %v4211_v18  ;;  %1206 = vmatprep.subr.mxu1 %v4459_v7 }
 0x348   :  { %1138 = vmatpush1.msra.mxu0 %v4217_v19 }
 0x349   :  { %1139 = vmatprep.subr.mxu0 %v4223_v21 }
 0x34a   :  { %1140 = vmatpush1.msra.mxu0 %v4229_v23 }
 0x34b   :  { %1141 = vmatprep.subr.mxu0 %v4235_v25 }
 0x34c   :  { %1142 = vmatpush1.msra.mxu0 %v4241_v27 }
 0x34d   :  { %1143 = vmatprep.subr.mxu0 %v4247_v29 }
 0x34e   :  { %1144 = vmatpush1.msra.mxu0 %v4253_v31 }
 0x34f   :  { %1145 = vmatprep.subr.mxu0 %v4259_v33 }
 0x350   :  { %1146 = vmatpush1.msra.mxu0 %v4265_v35 }
 0x351   :  { %1147 = vmatprep.subr.mxu0 %v4271_v37 }
 0x352   :  { %1148 = vmatpush1.msra.mxu0 %v4277_v39 }
 0x353   :  { %1149 = vmatprep.subr.mxu0 %v4283_v41 }
 0x354   :  { %1150 = vmatpush1.msra.mxu0 %v4289_v43 }
 0x355   :  { %1151 = vmatprep.subr.mxu0 %v4295_v45 }
 0x356   :  { %1152 = vmatpush1.msra.mxu0 %v4301_v47 }
 0x357   :  { %1153 = vmatprep.subr.mxu0 %v4307_v49 }
 0x358   :  { %1154 = vmatpush1.msra.mxu0 %v4313_v51 }
 0x359   :  { %1155 = vmatprep.subr.mxu0 %v4319_v3 }
 0x35a   :  { %1156 = vmatpush1.msra.mxu0 %v4325_v1 }
 0x35b   :  { %1157 = vmatprep.subr.mxu0 %v4331_v4 }
 0x35c   :  { %1158 = vmatpush1.msra.mxu0 %v4336_v6 }
 0x35d   :  { %1159 = vmatprep.subr.mxu0 %v4341_v8 }
 0x35e   :  { %1160 = vmatpush1.msra.mxu0 %v4347_v12 }
 0x35f   :  { %1161 = vmatprep.subr.mxu0 %v4353_v17 }
 0x360   :  { %1162 = vmatpush1.msra.mxu0 %v4369_v56  ;;  %v3266_v56 = vld [vmem:[%s5921_s0 + $0x30] sm:$0xff] }
 0x361   :  { %1163 = vmatprep.subr.mxu0 %v4381_v62 }
 0x362   :  { %1164 = vmatpush1.msra.mxu0 %v4388_v63 }
 0x363   :  { %1394 = vmatprep.subr.mxu0 %v4187_v11  ;;  %v4465_v11 = vld [vmem:[%s5920_s2 + $0x1d0] sm:$0xff] }
 0x364   :  { %1207 = vmatpush1.msra.mxu1 %v4465_v11 }
 0x365   :  { %1208 = vmatprep.subr.mxu1 %v4471_v10 }
 0x366   :  { %1209 = vmatpush1.msra.mxu1 %v4477_v15 }
 0x367   :  { %1210 = vmatprep.subr.mxu1 %v4483_v20 }
 0x368   :  { %1211 = vmatpush1.msra.mxu1 %v4489_v22 }
 0x369   :  { %1212 = vmatprep.subr.mxu1 %v4495_v24 }
 0x36a   :  { %1213 = vmatpush1.msra.mxu1 %v4501_v26 }
 0x36b   :  { %1214 = vmatprep.subr.mxu1 %v4507_v28 }
 0x36c   :  { %1215 = vmatpush1.msra.mxu1 %v4513_v32 }
 0x36d   :  { %1216 = vmatprep.subr.mxu1 %v4519_v34 }
 0x36e   :  { %1217 = vmatpush1.msra.mxu1 %v4525_v36 }
 0x36f   :  { %1218 = vmatprep.subr.mxu1 %v4531_v38 }
 0x370   :  { %1219 = vmatpush1.msra.mxu1 %v4537_v40 }
 0x371   :  { %1220 = vmatprep.subr.mxu1 %v4543_v42 }
 0x372   :  { %1221 = vmatpush1.msra.mxu1 %v4549_v48 }
 0x373   :  { %1222 = vmatprep.subr.mxu1 %v4555_v55 }
 0x374   :  { %1223 = vmatpush1.msra.mxu1 %v4561_v57 }
 0x375   :  { %1224 = vmatprep.subr.mxu1 %v4567_v44 }
 0x376   :  { %1225 = vmatpush1.msra.mxu1 %v4573_v53 }
 0x377   :  { %1226 = vmatprep.subr.mxu1 %v4579_v9 }
 0x378   :  { %1227 = vmatpush1.msra.mxu1 %v4585_v58 }
 0x379   :  { %1228 = vmatprep.subr.mxu1 %v4591_v59 }
 0x37a   :  { %1229 = vmatpush1.msra.mxu1 %v4596_v0 }
 0x37b   :  { %1230 = vmatprep.subr.mxu1 %v4601_v46 }
 0x37c   :  { %1231 = vmatpush1.msra.mxu1 %v4607_v54 }
 0x37d   :  { %1232 = vmatprep.subr.mxu1 %v4613_v30 }
 0x37e   :  { %1233 = vmatpush1.msra.mxu1 %v4358_v52 }
 0x37f   :  { %1234 = vmatprep.subr.mxu1 %v4363_v50 }
 0x380   :  { %1235 = vmatpush1.msra.mxu1 %v4375_v61  ;;  %v3267_v61 = vld [vmem:[%s5921_s0 + $0x38] sm:$0xff] }
 0x381   :  { %1465 = vmatprep.subr.mxu1 %v4447_v60 }
 0x403   :  { %v938_v63 = vpop.f32.mrf.mxu0  ;;  %v1009_v62 = vpop.f32.mrf.mxu1 }
 0x405   :  { %v940_v17 = vpop.f32.mrf.mxu0  ;;  %v1011_v54 = vpop.f32.mrf.mxu1 }
 0x406   :  { %v1018_v12 = vcombine.low %v938_v63, %v940_v17  ;;  %v1019_v0 = vcombine.low %v1009_v62, %v1011_v54  ;;  %v804_v62 = vld [vmem:[#allocation3] sm:$0xf] }
 0x408   :  { %v1022_v46 = vadd.f32 %v3266_v56, %v1018_v12  ;;  %v1023_v60 = vadd.f32 %v3267_v61, %v1019_v0 }
 0x40a   :  { %v3268_v8 = vmul.f32 -1.442695, %v1022_v46  ;;  %v1031_v30 = vrot.slane %v1022_v46, 4  ;;  %v1041_v50 = vrot.slane %v1023_v60, 4 }
 0x40c   :  { %3423 = vpow2.f32 %v3268_v8  ;;  %v3269_v52 = vmul.f32 -1.442695, %v1031_v30  ;;  %v3270_v6 = vmul.f32 -1.442695, %v1041_v50  ;;  %v3271_v50 = vld [vmem:[%s5922_s1 + $0xc] sm:$0xf] }
 0x40e   :  { %3425 = vpow2.f32 %v3269_v52 }
 0x40f   :  { %3427 = vpow2.f32 %v3270_v6 }
 0x419   :  { %v3424_v59 = vpop.eup %3423 }
 0x41a   :  { %v1027_v4 = vadd.f32 1.0, %v3424_v59 }
 0x41b   :  { %v3426_v58 = vpop.eup %3425 }
 0x41c   :  { %3429 = vrcp.f32 %v1027_v4  ;;  %v1036_v12 = vadd.f32 1.0, %v3426_v58  ;;  %v3428_v17 = vpop.eup %3427 }
 0x41d   :  { %3431 = vtanh.f32 %v1023_v60  ;;  %v1046_v63 = vadd.f32 1.0, %v3428_v17 }
 0x41e   :  { %3433 = vrcp.f32 %v1036_v12 }
 0x41f   :  { %3435 = vrcp.f32 %v1046_v63 }
 0x429   :  { %v3430_v56 = vpop.eup %3429 }
 0x42a   :  { %v3432_v8 = vpop.eup %3431 }
 0x42b   :  { %v3434_v30 = vpop.eup %3433  ;;  %v1050_v54 = vmul.f32 %v3432_v8, %v3430_v56 }
 0x42c   :  { %v1049_v46 = vmul.f32 %v3434_v30, %v804_v62  ;;  %v3436_v60 = vpop.eup %3435 }
 0x42e   :  { %v1051_v52 = vadd.f32 %v1050_v54, %v1049_v46 }
 0x430   :  { %3437 = vtanh.f32 %v1051_v52  ;;  %v1056_v6 = vsub.f32 %v1051_v52, %v804_v62  ;;  %v3273_v52 = vld [vmem:[%s5921_s0 + $0x48] sm:$0xff] }
 0x432   :  { %v1057_v4 = vmul.f32 %v3271_v50, %v1056_v6 }
 0x434   :  { %v1058_v61 = vadd.f32 %v1057_v4, %v804_v62 }
 0x436   :  { %1059 = vst [vmem:[#allocation3] sm:$0xf] %v1058_v61 }
 0x43d   :  { %v3438_v58 = vpop.eup %3437 }
 0x43e   :  { %v1053_v59 = vmul.f32 %v3438_v58, %v3436_v60 }
 0x440   :  { %v1060_v0 = vsub.f32 %v1053_v59, %v4406_v2 }
 0x442   :  { %v1061_v12 = vmul.f32 %v3271_v50, %v1060_v0 }
 0x444   :  { %v1062_v17 = vadd.f32 %v1061_v12, %v4406_v2 }
 0x446   :  { %1063 = vst [vmem:[#allocation2] sm:$0xf] %v1062_v17 }
 0x44d   :  { %v4633_v56 = vld [vmem:[#allocation2] sm:$0xf] }
 0x44e   :  { %1198 = vmatmul.mubr.f32.vlgmr.msra.gmra.mxu0 %v4633_v56  ;;  %1269 = vmatmul.mubr.f32.vlgmr.msra.gmra.mxu1 %v4633_v56 }
 0x44f   :  { %1395 = vmatpush1.msra.mxu0 %v4193_v13  ;;  %1466 = vmatpush1.msra.mxu1 %v4453_v5  ;;  %v6079_v13 = vld [vmem:[#allocation19_spill] sm:$0xff] }
 0x450   :  { %1396 = vmatprep.subr.mxu0 %v4199_v14  ;;  %1467 = vmatprep.subr.mxu1 %v4459_v7  ;;  %v6080_v14 = vld [vmem:[#allocation10_spill] sm:$0xff] }
 0x451   :  { %1397 = vmatpush1.msra.mxu0 %v4205_v16  ;;  %1468 = vmatpush1.msra.mxu1 %v4465_v11  ;;  %v6081_v16 = vld [vmem:[#allocation13_spill] sm:$0xff] }
 0x452   :  { %1398 = vmatprep.subr.mxu0 %v4211_v18  ;;  %1469 = vmatprep.subr.mxu1 %v4471_v10  ;;  %v6082_v18 = vld [vmem:[#allocation5_spill] sm:$0xff] }
 0x453   :  { %1399 = vmatpush1.msra.mxu0 %v4217_v19  ;;  %1470 = vmatpush1.msra.mxu1 %v4477_v15  ;;  %v6083_v19 = vld [vmem:[#allocation20_spill] sm:$0xff] }
 0x454   :  { %1400 = vmatprep.subr.mxu0 %v4223_v21  ;;  %1471 = vmatprep.subr.mxu1 %v4483_v20  ;;  %v6084_v21 = vld [vmem:[#allocation12_spill] sm:$0xff] }
 0x455   :  { %1401 = vmatpush1.msra.mxu0 %v4229_v23  ;;  %1472 = vmatpush1.msra.mxu1 %v4489_v22  ;;  %v6085_v23 = vld [vmem:[#allocation15_spill] sm:$0xff] }
 0x456   :  { %1402 = vmatprep.subr.mxu0 %v4235_v25  ;;  %1473 = vmatprep.subr.mxu1 %v4495_v24  ;;  %v6086_v25 = vld [vmem:[#allocation6_spill] sm:$0xff] }
 0x457   :  { %1403 = vmatpush1.msra.mxu0 %v4241_v27  ;;  %1474 = vmatpush1.msra.mxu1 %v4501_v26  ;;  %v6087_v27 = vld [vmem:[#allocation21_spill] sm:$0xff] }
 0x458   :  { %1404 = vmatprep.subr.mxu0 %v4247_v29  ;;  %1475 = vmatprep.subr.mxu1 %v4507_v28  ;;  %v6088_v29 = vld [vmem:[#allocation14_spill] sm:$0xff] }
 0x459   :  { %1405 = vmatpush1.msra.mxu0 %v4253_v31  ;;  %1476 = vmatpush1.msra.mxu1 %v4513_v32  ;;  %v6089_v31 = vld [vmem:[#allocation4_spill] sm:$0xff] }
 0x45a   :  { %1406 = vmatprep.subr.mxu0 %v4259_v33  ;;  %1477 = vmatprep.subr.mxu1 %v4519_v34  ;;  %v6090_v33 = vld [vmem:[#allocation8_spill] sm:$0xff] }
 0x45b   :  { %1407 = vmatpush1.msra.mxu0 %v4265_v35  ;;  %1478 = vmatpush1.msra.mxu1 %v4525_v36  ;;  %v6091_v35 = vld [vmem:[#allocation7_spill] sm:$0xff] }
 0x45c   :  { %1408 = vmatprep.subr.mxu0 %v4271_v37  ;;  %1479 = vmatprep.subr.mxu1 %v4531_v38  ;;  %v6092_v37 = vld [vmem:[#allocation9_spill] sm:$0xff] }
 0x45d   :  { %1409 = vmatpush1.msra.mxu0 %v4277_v39  ;;  %1480 = vmatpush1.msra.mxu1 %v4537_v40  ;;  %v6093_v39 = vld [vmem:[#allocation16_spill] sm:$0xff] }
 0x45e   :  { %1410 = vmatprep.subr.mxu0 %v4283_v41  ;;  %1481 = vmatprep.subr.mxu1 %v4543_v42  ;;  %v6094_v41 = vld [vmem:[#allocation18_spill] sm:$0xff] }
 0x45f   :  { %1411 = vmatpush1.msra.mxu0 %v4289_v43  ;;  %1482 = vmatpush1.msra.mxu1 %v4549_v48  ;;  %v6095_v43 = vmov 0.0  }
 0x460   :  { %1412 = vmatprep.subr.mxu0 %v4295_v45  ;;  %1483 = vmatprep.subr.mxu1 %v4555_v55  ;;  %v6096_v45 = vld [vmem:[#allocation17_spill] sm:$0xff] }
 0x461   :  { %1413 = vmatpush1.msra.mxu0 %v4301_v47  ;;  %1484 = vmatpush1.msra.mxu1 %v4561_v57  ;;  %v6097_v47 = vld [vmem:[#allocation11_spill] sm:$0xff] }
 0x462   :  { %1414 = vmatprep.subr.mxu0 %v4307_v49  ;;  %1485 = vmatprep.subr.mxu1 %v4567_v44 }
 0x463   :  { %1415 = vmatpush1.msra.mxu0 %v4313_v51  ;;  %1486 = vmatpush1.msra.mxu1 %v4573_v53 }
 0x464   :  { %1416 = vmatprep.subr.mxu0 %v4319_v3  ;;  %1487 = vmatprep.subr.mxu1 %v4579_v9  ;;  %v3272_v3 = vld [vmem:[%s5921_s0 + $0x40] sm:$0xff] }
 0x465   :  { %1417 = vmatpush1.msra.mxu0 %v4325_v1  ;;  %1488 = vmatpush1.msra.mxu1 %v6079_v13 }
 0x466   :  { %1418 = vmatprep.subr.mxu0 %v6080_v14  ;;  %1489 = vmatprep.subr.mxu1 %v6081_v16 }
 0x467   :  { %1419 = vmatpush1.msra.mxu0 %v6082_v18  ;;  %1490 = vmatpush1.msra.mxu1 %v6083_v19  ;;  %v1065_v18 = vld [vmem:[#allocation3] sm:$0xf] }
 0x468   :  { %1420 = vmatprep.subr.mxu0 %v6084_v21  ;;  %1491 = vmatprep.subr.mxu1 %v6085_v23 }
 0x469   :  { %1421 = vmatpush1.msra.mxu0 %v6086_v25  ;;  %1492 = vmatpush1.msra.mxu1 %v6087_v27 }
 0x46a   :  { %1422 = vmatprep.subr.mxu0 %v6088_v29  ;;  %1493 = vmatprep.subr.mxu1 %v6089_v31 }
 0x46b   :  { %1423 = vmatpush1.msra.mxu0 %v6090_v33  ;;  %1494 = vmatpush1.msra.mxu1 %v6091_v35  ;;  %v3277_v35 = vld [vmem:[%s5922_s1 + $0x10] sm:$0xf] }
 0x46c   :  { %1424 = vmatprep.subr.mxu0 %v6092_v37  ;;  %1495 = vmatprep.subr.mxu1 %v6093_v39 }
 0x46d   :  { %1425 = vmatpush1.msra.mxu0 %v6094_v41  ;;  %1458 = vmatprep.mubr.f32.mxu0 %v6095_v43 }
 0x46e   :  { %1496 = vmatpush1.msra.mxu1 %v6096_v45  ;;  %1529 = vmatprep.mubr.f32.mxu1 %v6095_v43 }
 0x46f   :  { %1726 = vmatprep.subr.mxu1 %v6097_v47 }
 0x50e   :  { %v1199_v49 = vpop.f32.mrf.mxu0  ;;  %v1270_v51 = vpop.f32.mrf.mxu1 }
 0x510   :  { %v1201_v1 = vpop.f32.mrf.mxu0  ;;  %v1272_v30 = vpop.f32.mrf.mxu1 }
 0x511   :  { %v1279_v2 = vcombine.low %v1199_v49, %v1201_v1  ;;  %v1280_v46 = vcombine.low %v1270_v51, %v1272_v30  ;;  %v4926_v30 = vld [vmem:[%s5920_s2 + $0x18] sm:$0xff] }
 0x512   :  { %6104 = vst [vmem:[#allocation15_spill] sm:$0xff] %v4926_v30 }
 0x513   :  { %v1283_v8 = vadd.f32 %v3272_v3, %v1279_v2  ;;  %v1284_v50 = vadd.f32 %v3273_v52, %v1280_v46  ;;  %v4944_v46 = vld [vmem:[%s5920_s2 + $0x8] sm:$0xff] }
 0x514   :  { %6107 = vst [vmem:[#allocation14_spill] sm:$0xff] %v4944_v46 }
 0x515   :  { %v3274_v62 = vmul.f32 -1.442695, %v1283_v8  ;;  %v1292_v63 = vrot.slane %v1283_v8, 4  ;;  %v1302_v6 = vrot.slane %v1284_v50, 4  ;;  %v4921_v8 = vld [vmem:[%s5920_s2 + $0x30] sm:$0xff] }
 0x516   :  { %6103 = vst [vmem:[#allocation12_spill] sm:$0xff] %v4921_v8 }
 0x517   :  { %3439 = vpow2.f32 %v3274_v62  ;;  %v3275_v54 = vmul.f32 -1.442695, %v1292_v63  ;;  %v3276_v4 = vmul.f32 -1.442695, %v1302_v6  ;;  %v4932_v62 = vld [vmem:[%s5920_s2 + $0x20] sm:$0xff]  ;;  %v4938_v63 = vld [vmem:[%s5920_s2 + $0x10] sm:$0xff] }
 0x518   :  { %6105 = vst [vmem:[#allocation6_spill] sm:$0xff] %v4932_v62  ;;  %6106 = vst [vmem:[#allocation21_spill] sm:$0xff] %v4938_v63  ;;  %v3278_v6 = vld [vmem:[%s5921_s0 + $0x50] sm:$0xff] }
 0x519   :  { %3441 = vpow2.f32 %v3275_v54  ;;  %v4951_v54 = vld [vmem:[%s5920_s2] sm:$0xff] }
 0x51a   :  { %3443 = vpow2.f32 %v3276_v4  ;;  %6108 = vst [vmem:[#allocation4_spill] sm:$0xff] %v4951_v54 }
 0x524   :  { %v3440_v61 = vpop.eup %3439 }
 0x525   :  { %v1288_v60 = vadd.f32 1.0, %v3440_v61 }
 0x526   :  { %v3442_v58 = vpop.eup %3441 }
 0x527   :  { %3445 = vrcp.f32 %v1288_v60  ;;  %v1297_v59 = vadd.f32 1.0, %v3442_v58  ;;  %v3444_v0 = vpop.eup %3443 }
 0x528   :  { %3447 = vtanh.f32 %v1284_v50  ;;  %v1307_v21 = vadd.f32 1.0, %v3444_v0 }
 0x529   :  { %3449 = vrcp.f32 %v1297_v59 }
 0x52a   :  { %3451 = vrcp.f32 %v1307_v21 }
 0x534   :  { %v3446_v12 = vpop.eup %3445 }
 0x535   :  { %v3448_v17 = vpop.eup %3447 }
 0x536   :  { %v3450_v14 = vpop.eup %3449  ;;  %v1311_v29 = vmul.f32 %v3448_v17, %v3446_v12 }
 0x537   :  { %v1310_v25 = vmul.f32 %v3450_v14, %v1065_v18  ;;  %v3452_v45 = vpop.eup %3451  ;;  %v3279_v14 = vld [vmem:[%s5921_s0 + $0x58] sm:$0xff] }
 0x539   :  { %v1312_v33 = vadd.f32 %v1311_v29, %v1310_v25 }
 0x53b   :  { %3453 = vtanh.f32 %v1312_v33  ;;  %v1317_v37 = vsub.f32 %v1312_v33, %v1065_v18 }
 0x53d   :  { %v1318_v39 = vmul.f32 %v3277_v35, %v1317_v37 }
 0x53f   :  { %v1319_v41 = vadd.f32 %v1318_v39, %v1065_v18 }
 0x541   :  { %1320 = vst [vmem:[#allocation3] sm:$0xf] %v1319_v41 }
 0x548   :  { %v3454_v47 = vpop.eup %3453 }
 0x549   :  { %v1314_v49 = vmul.f32 %v3454_v47, %v3452_v45 }
 0x54b   :  { %v1321_v51 = vsub.f32 %v1314_v49, %v4633_v56  ;;  %v1326_v49 = vld [vmem:[#allocation3] sm:$0xf] }
 0x54d   :  { %v1322_v3 = vmul.f32 %v3277_v35, %v1321_v51 }
 0x54f   :  { %v1323_v1 = vadd.f32 %v1322_v3, %v4633_v56  ;;  %v4882_v56 = vld [vmem:[%s5920_s2 + $0x88] sm:$0xff] }
 0x551   :  { %1324 = vst [vmem:[#allocation2] sm:$0xf] %v1323_v1 }
 0x558   :  { %v4713_v2 = vld [vmem:[#allocation2] sm:$0xf] }
 0x559   :  { %1459 = vmatmul.mubr.f32.vlgmr.msra.gmra.mxu0 %v4713_v2  ;;  %1530 = vmatmul.mubr.f32.vlgmr.msra.gmra.mxu1 %v4713_v2 }
 0x55a   :  { %1727 = vmatpush1.msra.mxu1 %v4453_v5  ;;  %1719 = vmatprep.mubr.f32.mxu0 %v6095_v43  ;;  %v4750_v5 = vld [vmem:[%s5920_s2 + $0x1e8] sm:$0xff] }
 0x55b   :  { %1728 = vmatprep.subr.mxu1 %v4459_v7  ;;  %1790 = vmatprep.mubr.f32.mxu1 %v6095_v43  ;;  %v4756_v7 = vld [vmem:[%s5920_s2 + $0x1e0] sm:$0xff] }
 0x55c   :  { %1729 = vmatpush1.msra.mxu1 %v4465_v11  ;;  %1655 = vmatprep.subr.mxu0 %v4750_v5  ;;  %v4762_v11 = vld [vmem:[%s5920_s2 + $0x1c8] sm:$0xff] }
 0x55d   :  { %1730 = vmatprep.subr.mxu1 %v4471_v10  ;;  %1656 = vmatpush1.msra.mxu0 %v4756_v7  ;;  %v4768_v10 = vld [vmem:[%s5920_s2 + $0x1c0] sm:$0xff] }
 0x55e   :  { %1731 = vmatpush1.msra.mxu1 %v4477_v15  ;;  %1657 = vmatprep.subr.mxu0 %v4762_v11  ;;  %v4774_v15 = vld [vmem:[%s5920_s2 + $0x1a8] sm:$0xff] }
 0x55f   :  { %1732 = vmatprep.subr.mxu1 %v4483_v20  ;;  %1658 = vmatpush1.msra.mxu0 %v4768_v10  ;;  %v4780_v20 = vld [vmem:[%s5920_s2 + $0x1a0] sm:$0xff] }
 0x560   :  { %1733 = vmatpush1.msra.mxu1 %v4489_v22  ;;  %1659 = vmatprep.subr.mxu0 %v4774_v15  ;;  %v4786_v22 = vld [vmem:[%s5920_s2 + $0x188] sm:$0xff] }
 0x561   :  { %1734 = vmatprep.subr.mxu1 %v4495_v24  ;;  %1660 = vmatpush1.msra.mxu0 %v4780_v20  ;;  %v4792_v24 = vld [vmem:[%s5920_s2 + $0x180] sm:$0xff] }
 0x562   :  { %1735 = vmatpush1.msra.mxu1 %v4501_v26  ;;  %1661 = vmatprep.subr.mxu0 %v4786_v22  ;;  %v4798_v26 = vld [vmem:[%s5920_s2 + $0x168] sm:$0xff] }
 0x563   :  { %1736 = vmatprep.subr.mxu1 %v4507_v28  ;;  %1662 = vmatpush1.msra.mxu0 %v4792_v24  ;;  %v4804_v28 = vld [vmem:[%s5920_s2 + $0x160] sm:$0xff] }
 0x564   :  { %1737 = vmatpush1.msra.mxu1 %v4513_v32  ;;  %1663 = vmatprep.subr.mxu0 %v4798_v26  ;;  %v4810_v32 = vld [vmem:[%s5920_s2 + $0x148] sm:$0xff] }
 0x565   :  { %1738 = vmatprep.subr.mxu1 %v4519_v34  ;;  %1664 = vmatpush1.msra.mxu0 %v4804_v28  ;;  %v4816_v34 = vld [vmem:[%s5920_s2 + $0x140] sm:$0xff] }
 0x566   :  { %1739 = vmatpush1.msra.mxu1 %v4525_v36  ;;  %1665 = vmatprep.subr.mxu0 %v4810_v32  ;;  %v4822_v36 = vld [vmem:[%s5920_s2 + $0x128] sm:$0xff] }
 0x567   :  { %1740 = vmatprep.subr.mxu1 %v4531_v38  ;;  %1666 = vmatpush1.msra.mxu0 %v4816_v34  ;;  %v4828_v38 = vld [vmem:[%s5920_s2 + $0x120] sm:$0xff] }
 0x568   :  { %1741 = vmatpush1.msra.mxu1 %v4537_v40  ;;  %1667 = vmatprep.subr.mxu0 %v4822_v36  ;;  %v4834_v40 = vld [vmem:[%s5920_s2 + $0x108] sm:$0xff] }
 0x569   :  { %1742 = vmatprep.subr.mxu1 %v4543_v42  ;;  %1668 = vmatpush1.msra.mxu0 %v4828_v38  ;;  %v4840_v42 = vld [vmem:[%s5920_s2 + $0x100] sm:$0xff] }
 0x56a   :  { %1743 = vmatpush1.msra.mxu1 %v4549_v48  ;;  %1669 = vmatprep.subr.mxu0 %v4834_v40  ;;  %v4846_v48 = vld [vmem:[%s5920_s2 + $0xe8] sm:$0xff] }
 0x56b   :  { %1744 = vmatprep.subr.mxu1 %v4555_v55  ;;  %1670 = vmatpush1.msra.mxu0 %v4840_v42  ;;  %v4852_v55 = vld [vmem:[%s5920_s2 + $0xe0] sm:$0xff] }
 0x56c   :  { %1745 = vmatpush1.msra.mxu1 %v4561_v57  ;;  %1671 = vmatprep.subr.mxu0 %v4846_v48  ;;  %v4858_v57 = vld [vmem:[%s5920_s2 + $0xc8] sm:$0xff] }
 0x56d   :  { %1746 = vmatprep.subr.mxu1 %v4567_v44  ;;  %1672 = vmatpush1.msra.mxu0 %v4852_v55  ;;  %v4864_v44 = vld [vmem:[%s5920_s2 + $0xc0] sm:$0xff] }
 0x56e   :  { %1747 = vmatpush1.msra.mxu1 %v4573_v53  ;;  %1673 = vmatprep.subr.mxu0 %v4858_v57  ;;  %v4870_v53 = vld [vmem:[%s5920_s2 + $0xa8] sm:$0xff] }
 0x56f   :  { %1748 = vmatprep.subr.mxu1 %v4579_v9  ;;  %1674 = vmatpush1.msra.mxu0 %v4864_v44  ;;  %v4876_v9 = vld [vmem:[%s5920_s2 + $0xa0] sm:$0xff] }
 0x570   :  { %1749 = vmatpush1.msra.mxu1 %v6079_v13  ;;  %1675 = vmatprep.subr.mxu0 %v4870_v53  ;;  %v4888_v13 = vld [vmem:[%s5920_s2 + $0x80] sm:$0xff] }
 0x571   :  { %1750 = vmatprep.subr.mxu1 %v6081_v16  ;;  %1676 = vmatpush1.msra.mxu0 %v4876_v9  ;;  %v4894_v16 = vld [vmem:[%s5920_s2 + $0x68] sm:$0xff] }
 0x572   :  { %1751 = vmatpush1.msra.mxu1 %v6083_v19  ;;  %1677 = vmatprep.subr.mxu0 %v4882_v56  ;;  %6098 = vst [vmem:[#allocation19_spill] sm:$0xff] %v4894_v16  ;;  %v4899_v19 = vld [vmem:[%s5920_s2 + $0x60] sm:$0xff] }
 0x573   :  { %1752 = vmatprep.subr.mxu1 %v6085_v23  ;;  %1678 = vmatpush1.msra.mxu0 %v4888_v13  ;;  %6099 = vst [vmem:[#allocation10_spill] sm:$0xff] %v4899_v19  ;;  %v4904_v23 = vld [vmem:[%s5920_s2 + $0x48] sm:$0xff] }
 0x574   :  { %1753 = vmatpush1.msra.mxu1 %v6087_v27  ;;  %6100 = vst [vmem:[#allocation13_spill] sm:$0xff] %v4904_v23  ;;  %1679 = vmatprep.subr.mxu0 %v4894_v16  ;;  %v4910_v27 = vld [vmem:[%s5920_s2 + $0x40] sm:$0xff] }
 0x575   :  { %1754 = vmatprep.subr.mxu1 %v6089_v31  ;;  %6101 = vst [vmem:[#allocation5_spill] sm:$0xff] %v4910_v27  ;;  %1680 = vmatpush1.msra.mxu0 %v4899_v19  ;;  %v4916_v31 = vld [vmem:[%s5920_s2 + $0x28] sm:$0xff] }
 0x576   :  { %6102 = vst [vmem:[#allocation20_spill] sm:$0xff] %v4916_v31  ;;  %1681 = vmatprep.subr.mxu0 %v4904_v23  ;;  %1755 = vmatpush1.msra.mxu1 %v4921_v8 }
 0x577   :  { %1682 = vmatpush1.msra.mxu0 %v4910_v27  ;;  %1756 = vmatprep.subr.mxu1 %v4926_v30 }
 0x578   :  { %1683 = vmatprep.subr.mxu0 %v4916_v31  ;;  %1757 = vmatpush1.msra.mxu1 %v4938_v63 }
 0x579   :  { %1684 = vmatpush1.msra.mxu0 %v4932_v62 }
 0x57a   :  { %1685 = vmatprep.subr.mxu0 %v4944_v46 }
 0x57b   :  { %1686 = vmatpush1.msra.mxu0 %v4951_v54 }
 0x57c   :  { %1916 = vmatprep.subr.mxu0 %v4750_v5 }
 0x619   :  { %v1460_v52 = vpop.f32.mrf.mxu0  ;;  %v1531_v50 = vpop.f32.mrf.mxu1 }
 0x61b   :  { %v1462_v4 = vpop.f32.mrf.mxu0  ;;  %v1533_v58 = vpop.f32.mrf.mxu1 }
 0x61c   :  { %v1540_v61 = vcombine.low %v1460_v52, %v1462_v4  ;;  %v1541_v12 = vcombine.low %v1531_v50, %v1533_v58  ;;  %v3283_v50 = vld [vmem:[%s5922_s1 + $0x14] sm:$0xf] }
 0x61e   :  { %v1544_v60 = vadd.f32 %v3278_v6, %v1540_v61  ;;  %v1545_v18 = vadd.f32 %v3279_v14, %v1541_v12 }
 0x620   :  { %v3280_v59 = vmul.f32 -1.442695, %v1544_v60  ;;  %v1553_v0 = vrot.slane %v1544_v60, 4  ;;  %v1563_v21 = vrot.slane %v1545_v18, 4 }
 0x622   :  { %3455 = vpow2.f32 %v3280_v59  ;;  %v3281_v17 = vmul.f32 -1.442695, %v1553_v0  ;;  %v3282_v25 = vmul.f32 -1.442695, %v1563_v21  ;;  %v5022_v21 = vld [vmem:[%s5920_s2 + $0x1d8] sm:$0xff] }
 0x624   :  { %3457 = vpow2.f32 %v3281_v17 }
 0x625   :  { %3459 = vpow2.f32 %v3282_v25  ;;  %v5034_v25 = vld [vmem:[%s5920_s2 + $0x1b8] sm:$0xff] }
 0x62f   :  { %v3456_v29 = vpop.eup %3455 }
 0x630   :  { %v1549_v33 = vadd.f32 1.0, %v3456_v29  ;;  %v5040_v29 = vld [vmem:[%s5920_s2 + $0x1b0] sm:$0xff] }
 0x631   :  { %v3458_v35 = vpop.eup %3457 }
 0x632   :  { %3461 = vrcp.f32 %v1549_v33  ;;  %v1558_v37 = vadd.f32 1.0, %v3458_v35  ;;  %v3460_v39 = vpop.eup %3459  ;;  %v5046_v33 = vld [vmem:[%s5920_s2 + $0x198] sm:$0xff]  ;;  %v5052_v35 = vld [vmem:[%s5920_s2 + $0x190] sm:$0xff] }
 0x633   :  { %3463 = vtanh.f32 %v1545_v18  ;;  %v1568_v51 = vadd.f32 1.0, %v3460_v39  ;;  %v5016_v18 = vld [vmem:[%s5920_s2 + $0x1f0] sm:$0xff] }
 0x634   :  { %3465 = vrcp.f32 %v1558_v37  ;;  %v5058_v37 = vld [vmem:[%s5920_s2 + $0x178] sm:$0xff]  ;;  %v5064_v39 = vld [vmem:[%s5920_s2 + $0x170] sm:$0xff] }
 0x635   :  { %3467 = vrcp.f32 %v1568_v51  ;;  %v5094_v51 = vld [vmem:[%s5920_s2 + $0x118] sm:$0xff] }
 0x63f   :  { %v3462_v41 = vpop.eup %3461 }
 0x640   :  { %v3464_v45 = vpop.eup %3463 }
 0x641   :  { %v3466_v47 = vpop.eup %3465  ;;  %v1572_v1 = vmul.f32 %v3464_v45, %v3462_v41  ;;  %v5070_v41 = vld [vmem:[%s5920_s2 + $0x158] sm:$0xff]  ;;  %v5076_v45 = vld [vmem:[%s5920_s2 + $0x150] sm:$0xff] }
 0x642   :  { %v1571_v3 = vmul.f32 %v3466_v47, %v1326_v49  ;;  %v3468_v60 = vpop.eup %3467  ;;  %v5082_v47 = vld [vmem:[%s5920_s2 + $0x138] sm:$0xff] }
 0x644   :  { %v1573_v52 = vadd.f32 %v1572_v1, %v1571_v3  ;;  %v5100_v3 = vld [vmem:[%s5920_s2 + $0x110] sm:$0xff]  ;;  %v5106_v1 = vld [vmem:[%s5920_s2 + $0xf8] sm:$0xff] }
 0x646   :  { %3469 = vtanh.f32 %v1573_v52  ;;  %v1578_v6 = vsub.f32 %v1573_v52, %v1326_v49  ;;  %v5112_v52 = vld [vmem:[%s5920_s2 + $0xf0] sm:$0xff] }
 0x648   :  { %v1579_v4 = vmul.f32 %v3283_v50, %v1578_v6  ;;  %v5124_v6 = vld [vmem:[%s5920_s2 + $0xd0] sm:$0xff] }
 0x64a   :  { %v1580_v61 = vadd.f32 %v1579_v4, %v1326_v49  ;;  %v5088_v49 = vld [vmem:[%s5920_s2 + $0x130] sm:$0xff]  ;;  %v5130_v4 = vld [vmem:[%s5920_s2 + $0xb8] sm:$0xff] }
 0x64c   :  { %1581 = vst [vmem:[#allocation3] sm:$0xf] %v1580_v61  ;;  %v5136_v61 = vld [vmem:[%s5920_s2 + $0xb0] sm:$0xff] }
 0x653   :  { %v3470_v58 = vpop.eup %3469 }
 0x654   :  { %v1575_v59 = vmul.f32 %v3470_v58, %v3468_v60  ;;  %v5142_v60 = vld [vmem:[%s5920_s2 + $0x98] sm:$0xff]  ;;  %v5148_v58 = vld [vmem:[%s5920_s2 + $0x90] sm:$0xff] }
 0x655   :  { %6110 = vst [vmem:[#allocation7_spill] sm:$0xff] %v5148_v58 }
 0x656   :  { %v1582_v0 = vsub.f32 %v1575_v59, %v4713_v2  ;;  %v5154_v59 = vld [vmem:[%s5920_s2 + $0x78] sm:$0xff] }
 0x657   :  { %6111 = vst [vmem:[#allocation9_spill] sm:$0xff] %v5154_v59 }
 0x658   :  { %v1583_v12 = vmul.f32 %v3283_v50, %v1582_v0  ;;  %v5118_v50 = vld [vmem:[%s5920_s2 + $0xd8] sm:$0xff]  ;;  %v5159_v0 = vld [vmem:[%s5920_s2 + $0x70] sm:$0xff] }
 0x659   :  { %6112 = vst [vmem:[#allocation16_spill] sm:$0xff] %v5159_v0 }
 0x65a   :  { %v1584_v17 = vadd.f32 %v1583_v12, %v4713_v2  ;;  %v5010_v2 = vld [vmem:[%s5920_s2 + $0x1f8] sm:$0xff] }
 0x65b   :  { %6109 = vst [vmem:[#allocation8_spill] sm:$0xff] %v5010_v2  ;;  %1987 = vmatprep.subr.mxu1 %v5010_v2  ;;  %v5164_v12 = vld [vmem:[%s5920_s2 + $0x58] sm:$0xff] }
 0x65c   :  { %1585 = vst [vmem:[#allocation2] sm:$0xf] %v1584_v17  ;;  %6113 = vst [vmem:[#allocation18_spill] sm:$0xff] %v5164_v12  ;;  %v5170_v17 = vld [vmem:[%s5920_s2 + $0x50] sm:$0xff] }
 0x65d   :  { %6114 = vst [vmem:[#allocation17_spill] sm:$0xff] %v5170_v17 }
 0x663   :  { %v4969_v14 = vld [vmem:[#allocation2] sm:$0xf] }
 0x664   :  { %1720 = vmatmul.mubr.f32.vlgmr.msra.gmra.mxu0 %v4969_v14  ;;  %1791 = vmatmul.mubr.f32.vlgmr.msra.gmra.mxu1 %v4969_v14 }
 0x665   :  { %1917 = vmatpush1.msra.mxu0 %v4756_v7  ;;  %1980 = vmatprep.mubr.f32.mxu0 %v6095_v43 }
 0x666   :  { %1918 = vmatprep.subr.mxu0 %v4762_v11  ;;  %2051 = vmatprep.mubr.f32.mxu1 %v6095_v43  ;;  %v5176_v43 = vld [vmem:[%s5920_s2 + $0x38] sm:$0xff] }
 0x667   :  { %1919 = vmatpush1.msra.mxu0 %v4768_v10  ;;  %1988 = vmatpush1.msra.mxu1 %v5016_v18  ;;  %6115 = vst [vmem:[#allocation11_spill] sm:$0xff] %v5176_v43 }
 0x668   :  { %1920 = vmatprep.subr.mxu0 %v4774_v15  ;;  %1989 = vmatprep.subr.mxu1 %v5022_v21 }
 0x669   :  { %1921 = vmatpush1.msra.mxu0 %v4780_v20 }
 0x66a   :  { %1922 = vmatprep.subr.mxu0 %v4786_v22 }
 0x66b   :  { %1923 = vmatpush1.msra.mxu0 %v4792_v24 }
 0x66c   :  { %1924 = vmatprep.subr.mxu0 %v4798_v26 }
 0x66d   :  { %1925 = vmatpush1.msra.mxu0 %v4804_v28 }
 0x66e   :  { %1926 = vmatprep.subr.mxu0 %v4810_v32 }
 0x66f   :  { %1927 = vmatpush1.msra.mxu0 %v4816_v34 }
 0x670   :  { %1928 = vmatprep.subr.mxu0 %v4822_v36 }
 0x671   :  { %1929 = vmatpush1.msra.mxu0 %v4828_v38 }
 0x672   :  { %1930 = vmatprep.subr.mxu0 %v4834_v40 }
 0x673   :  { %1931 = vmatpush1.msra.mxu0 %v4840_v42 }
 0x674   :  { %1932 = vmatprep.subr.mxu0 %v4846_v48 }
 0x675   :  { %1933 = vmatpush1.msra.mxu0 %v4852_v55 }
 0x676   :  { %1934 = vmatprep.subr.mxu0 %v4858_v57 }
 0x677   :  { %1935 = vmatpush1.msra.mxu0 %v4864_v44 }
 0x678   :  { %1936 = vmatprep.subr.mxu0 %v4870_v53 }
 0x679   :  { %1937 = vmatpush1.msra.mxu0 %v4876_v9 }
 0x67a   :  { %1938 = vmatprep.subr.mxu0 %v4882_v56 }
 0x67b   :  { %1939 = vmatpush1.msra.mxu0 %v4888_v13 }
 0x67c   :  { %1940 = vmatprep.subr.mxu0 %v4894_v16 }
 0x67d   :  { %1941 = vmatpush1.msra.mxu0 %v4899_v19 }
 0x67e   :  { %1942 = vmatprep.subr.mxu0 %v4904_v23 }
 0x67f   :  { %1943 = vmatpush1.msra.mxu0 %v4910_v27 }
 0x680   :  { %1944 = vmatprep.subr.mxu0 %v4916_v31 }
 0x681   :  { %1945 = vmatpush1.msra.mxu0 %v4932_v62  ;;  %v3284_v62 = vld [vmem:[%s5921_s0 + $0x60] sm:$0xff] }
 0x682   :  { %1946 = vmatprep.subr.mxu0 %v4944_v46 }
 0x683   :  { %1947 = vmatpush1.msra.mxu0 %v4951_v54 }
 0x684   :  { %2177 = vmatprep.subr.mxu0 %v4750_v5  ;;  %v5028_v5 = vld [vmem:[%s5920_s2 + $0x1d0] sm:$0xff] }
 0x685   :  { %1990 = vmatpush1.msra.mxu1 %v5028_v5 }
 0x686   :  { %1991 = vmatprep.subr.mxu1 %v5034_v25 }
 0x687   :  { %1992 = vmatpush1.msra.mxu1 %v5040_v29 }
 0x688   :  { %1993 = vmatprep.subr.mxu1 %v5046_v33 }
 0x689   :  { %1994 = vmatpush1.msra.mxu1 %v5052_v35 }
 0x68a   :  { %1995 = vmatprep.subr.mxu1 %v5058_v37 }
 0x68b   :  { %1996 = vmatpush1.msra.mxu1 %v5064_v39 }
 0x68c   :  { %1997 = vmatprep.subr.mxu1 %v5070_v41 }
 0x68d   :  { %1998 = vmatpush1.msra.mxu1 %v5076_v45 }
 0x68e   :  { %1999 = vmatprep.subr.mxu1 %v5082_v47 }
 0x68f   :  { %2000 = vmatpush1.msra.mxu1 %v5088_v49 }
 0x690   :  { %2001 = vmatprep.subr.mxu1 %v5094_v51 }
 0x691   :  { %2002 = vmatpush1.msra.mxu1 %v5100_v3 }
 0x692   :  { %2003 = vmatprep.subr.mxu1 %v5106_v1 }
 0x693   :  { %2004 = vmatpush1.msra.mxu1 %v5112_v52 }
 0x694   :  { %2005 = vmatprep.subr.mxu1 %v5118_v50 }
 0x695   :  { %2006 = vmatpush1.msra.mxu1 %v5124_v6 }
 0x696   :  { %2007 = vmatprep.subr.mxu1 %v5130_v4 }
 0x697   :  { %2008 = vmatpush1.msra.mxu1 %v5136_v61 }
 0x698   :  { %2009 = vmatprep.subr.mxu1 %v5142_v60 }
 0x699   :  { %2010 = vmatpush1.msra.mxu1 %v5148_v58 }
 0x69a   :  { %2011 = vmatprep.subr.mxu1 %v5154_v59 }
 0x69b   :  { %2012 = vmatpush1.msra.mxu1 %v5159_v0 }
 0x69c   :  { %2013 = vmatprep.subr.mxu1 %v5164_v12 }
 0x69d   :  { %2014 = vmatpush1.msra.mxu1 %v5170_v17 }
 0x69e   :  { %2015 = vmatprep.subr.mxu1 %v5176_v43 }
 0x69f   :  { %2016 = vmatpush1.msra.mxu1 %v4921_v8 }
 0x6a0   :  { %2017 = vmatprep.subr.mxu1 %v4926_v30 }
 0x6a1   :  { %2018 = vmatpush1.msra.mxu1 %v4938_v63  ;;  %v3285_v63 = vld [vmem:[%s5921_s0 + $0x68] sm:$0xff] }
 0x6a2   :  { %2248 = vmatprep.subr.mxu1 %v5010_v2 }
 0x724   :  { %v1721_v54 = vpop.f32.mrf.mxu0  ;;  %v1792_v46 = vpop.f32.mrf.mxu1 }
 0x726   :  { %v1723_v31 = vpop.f32.mrf.mxu0  ;;  %v1794_v17 = vpop.f32.mrf.mxu1 }
 0x727   :  { %v1801_v27 = vcombine.low %v1721_v54, %v1723_v31  ;;  %v1802_v0 = vcombine.low %v1792_v46, %v1794_v17  ;;  %v1587_v46 = vld [vmem:[#allocation3] sm:$0xf] }
 0x729   :  { %v1805_v12 = vadd.f32 %v3284_v62, %v1801_v27  ;;  %v1806_v2 = vadd.f32 %v3285_v63, %v1802_v0 }
 0x72b   :  { %v3286_v23 = vmul.f32 -1.442695, %v1805_v12  ;;  %v1814_v43 = vrot.slane %v1805_v12, 4  ;;  %v1824_v30 = vrot.slane %v1806_v2, 4 }
 0x72d   :  { %3471 = vpow2.f32 %v3286_v23  ;;  %v3287_v8 = vmul.f32 -1.442695, %v1814_v43  ;;  %v3288_v19 = vmul.f32 -1.442695, %v1824_v30  ;;  %v3289_v30 = vld [vmem:[%s5922_s1 + $0x18] sm:$0xf] }
 0x72f   :  { %3473 = vpow2.f32 %v3287_v8 }
 0x730   :  { %3475 = vpow2.f32 %v3288_v19 }
 0x73a   :  { %v3472_v59 = vpop.eup %3471 }
 0x73b   :  { %v1810_v16 = vadd.f32 1.0, %v3472_v59 }
 0x73c   :  { %v3474_v58 = vpop.eup %3473 }
 0x73d   :  { %3477 = vrcp.f32 %v1810_v16  ;;  %v1819_v27 = vadd.f32 1.0, %v3474_v58  ;;  %v3476_v31 = vpop.eup %3475 }
 0x73e   :  { %3479 = vtanh.f32 %v1806_v2  ;;  %v1829_v54 = vadd.f32 1.0, %v3476_v31 }
 0x73f   :  { %3481 = vrcp.f32 %v1819_v27 }
 0x740   :  { %3483 = vrcp.f32 %v1829_v54 }
 0x74a   :  { %v3478_v62 = vpop.eup %3477 }
 0x74b   :  { %v3480_v23 = vpop.eup %3479 }
 0x74c   :  { %v3482_v43 = vpop.eup %3481  ;;  %v1833_v17 = vmul.f32 %v3480_v23, %v3478_v62 }
 0x74d   :  { %v1832_v12 = vmul.f32 %v3482_v43, %v1587_v46  ;;  %v3484_v2 = vpop.eup %3483 }
 0x74f   :  { %v1834_v8 = vadd.f32 %v1833_v17, %v1832_v12 }
 0x751   :  { %3485 = vtanh.f32 %v1834_v8  ;;  %v1839_v19 = vsub.f32 %v1834_v8, %v1587_v46  ;;  %v3291_v8 = vld [vmem:[%s5921_s0 + $0x78] sm:$0xff] }
 0x753   :  { %v1840_v16 = vmul.f32 %v3289_v30, %v1839_v19 }
 0x755   :  { %v1841_v63 = vadd.f32 %v1840_v16, %v1587_v46 }
 0x757   :  { %1842 = vst [vmem:[#allocation3] sm:$0xf] %v1841_v63 }
 0x75e   :  { %v3486_v58 = vpop.eup %3485 }
 0x75f   :  { %v1836_v59 = vmul.f32 %v3486_v58, %v3484_v2 }
 0x761   :  { %v1843_v0 = vsub.f32 %v1836_v59, %v4969_v14 }
 0x763   :  { %v1844_v27 = vmul.f32 %v3289_v30, %v1843_v0 }
 0x765   :  { %v1845_v31 = vadd.f32 %v1844_v27, %v4969_v14 }
 0x767   :  { %1846 = vst [vmem:[#allocation2] sm:$0xf] %v1845_v31 }
 0x76e   :  { %v5196_v62 = vld [vmem:[#allocation2] sm:$0xf] }
 0x76f   :  { %1981 = vmatmul.mubr.f32.vlgmr.msra.gmra.mxu0 %v5196_v62  ;;  %2052 = vmatmul.mubr.f32.vlgmr.msra.gmra.mxu1 %v5196_v62 }
 0x770   :  { %2178 = vmatpush1.msra.mxu0 %v4756_v7  ;;  %2249 = vmatpush1.msra.mxu1 %v5016_v18  ;;  %v6116_v7 = vld [vmem:[#allocation7_spill] sm:$0xff] }
 0x771   :  { %2179 = vmatprep.subr.mxu0 %v4762_v11  ;;  %2250 = vmatprep.subr.mxu1 %v5022_v21  ;;  %v6117_v11 = vld [vmem:[#allocation19_spill] sm:$0xff] }
 0x772   :  { %2180 = vmatpush1.msra.mxu0 %v4768_v10  ;;  %2251 = vmatpush1.msra.mxu1 %v5028_v5  ;;  %v6118_v10 = vld [vmem:[#allocation9_spill] sm:$0xff] }
 0x773   :  { %2181 = vmatprep.subr.mxu0 %v4774_v15  ;;  %2252 = vmatprep.subr.mxu1 %v5034_v25  ;;  %v6119_v15 = vld [vmem:[#allocation10_spill] sm:$0xff] }
 0x774   :  { %2182 = vmatpush1.msra.mxu0 %v4780_v20  ;;  %2253 = vmatpush1.msra.mxu1 %v5040_v29  ;;  %v6120_v20 = vld [vmem:[#allocation16_spill] sm:$0xff] }
 0x775   :  { %2183 = vmatprep.subr.mxu0 %v4786_v22  ;;  %2254 = vmatprep.subr.mxu1 %v5046_v33  ;;  %v6121_v22 = vld [vmem:[#allocation13_spill] sm:$0xff] }
 0x776   :  { %2184 = vmatpush1.msra.mxu0 %v4792_v24  ;;  %2255 = vmatpush1.msra.mxu1 %v5052_v35  ;;  %v6122_v24 = vld [vmem:[#allocation18_spill] sm:$0xff] }
 0x777   :  { %2185 = vmatprep.subr.mxu0 %v4798_v26  ;;  %2256 = vmatprep.subr.mxu1 %v5058_v37  ;;  %v6123_v26 = vld [vmem:[#allocation5_spill] sm:$0xff] }
 0x778   :  { %2186 = vmatpush1.msra.mxu0 %v4804_v28  ;;  %2257 = vmatpush1.msra.mxu1 %v5064_v39  ;;  %v6124_v28 = vld [vmem:[#allocation17_spill] sm:$0xff] }
 0x779   :  { %2187 = vmatprep.subr.mxu0 %v4810_v32  ;;  %2258 = vmatprep.subr.mxu1 %v5070_v41  ;;  %v6125_v32 = vld [vmem:[#allocation20_spill] sm:$0xff] }
 0x77a   :  { %2188 = vmatpush1.msra.mxu0 %v4816_v34  ;;  %2259 = vmatpush1.msra.mxu1 %v5076_v45  ;;  %v6126_v34 = vld [vmem:[#allocation11_spill] sm:$0xff] }
 0x77b   :  { %2189 = vmatprep.subr.mxu0 %v4822_v36  ;;  %2260 = vmatprep.subr.mxu1 %v5082_v47  ;;  %v6127_v36 = vld [vmem:[#allocation6_spill] sm:$0xff] }
 0x77c   :  { %2190 = vmatpush1.msra.mxu0 %v4828_v38  ;;  %2261 = vmatpush1.msra.mxu1 %v5088_v49  ;;  %v6128_v38 = vld [vmem:[#allocation12_spill] sm:$0xff] }
 0x77d   :  { %2191 = vmatprep.subr.mxu0 %v4834_v40  ;;  %2262 = vmatprep.subr.mxu1 %v5094_v51  ;;  %v6129_v40 = vld [vmem:[#allocation14_spill] sm:$0xff] }
 0x77e   :  { %2192 = vmatpush1.msra.mxu0 %v4840_v42  ;;  %2263 = vmatpush1.msra.mxu1 %v5100_v3  ;;  %v6130_v42 = vld [vmem:[#allocation15_spill] sm:$0xff] }
 0x77f   :  { %2193 = vmatprep.subr.mxu0 %v4846_v48  ;;  %2264 = vmatprep.subr.mxu1 %v5106_v1  ;;  %v6131_v48 = vld [vmem:[#allocation4_spill] sm:$0xff] }
 0x780   :  { %2194 = vmatpush1.msra.mxu0 %v4852_v55  ;;  %2265 = vmatpush1.msra.mxu1 %v5112_v52  ;;  %v6132_v55 = vmov 0.0  }
 0x781   :  { %2195 = vmatprep.subr.mxu0 %v4858_v57  ;;  %2266 = vmatprep.subr.mxu1 %v5118_v50  ;;  %v6133_v57 = vld [vmem:[#allocation21_spill] sm:$0xff] }
 0x782   :  { %2196 = vmatpush1.msra.mxu0 %v4864_v44  ;;  %2267 = vmatpush1.msra.mxu1 %v5124_v6  ;;  %v6134_v44 = vld [vmem:[#allocation8_spill] sm:$0xff] }
 0x783   :  { %2197 = vmatprep.subr.mxu0 %v4870_v53  ;;  %2268 = vmatprep.subr.mxu1 %v5130_v4 }
 0x784   :  { %2198 = vmatpush1.msra.mxu0 %v4876_v9  ;;  %2269 = vmatpush1.msra.mxu1 %v5136_v61 }
 0x785   :  { %2199 = vmatprep.subr.mxu0 %v4882_v56  ;;  %2270 = vmatprep.subr.mxu1 %v5142_v60  ;;  %v3290_v56 = vld [vmem:[%s5921_s0 + $0x70] sm:$0xff] }
 0x786   :  { %2200 = vmatpush1.msra.mxu0 %v4888_v13  ;;  %2271 = vmatpush1.msra.mxu1 %v6116_v7 }
 0x787   :  { %2201 = vmatprep.subr.mxu0 %v6117_v11  ;;  %2272 = vmatprep.subr.mxu1 %v6118_v10 }
 0x788   :  { %2202 = vmatpush1.msra.mxu0 %v6119_v15  ;;  %2273 = vmatpush1.msra.mxu1 %v6120_v20  ;;  %v1848_v15 = vld [vmem:[#allocation3] sm:$0xf] }
 0x789   :  { %2203 = vmatprep.subr.mxu0 %v6121_v22  ;;  %2274 = vmatprep.subr.mxu1 %v6122_v24 }
 0x78a   :  { %2204 = vmatpush1.msra.mxu0 %v6123_v26  ;;  %2275 = vmatpush1.msra.mxu1 %v6124_v28 }
 0x78b   :  { %2205 = vmatprep.subr.mxu0 %v6125_v32  ;;  %2276 = vmatprep.subr.mxu1 %v6126_v34 }
 0x78c   :  { %2206 = vmatpush1.msra.mxu0 %v6127_v36  ;;  %2277 = vmatpush1.msra.mxu1 %v6128_v38  ;;  %v3295_v38 = vld [vmem:[%s5922_s1 + $0x1c] sm:$0xf] }
 0x78d   :  { %2207 = vmatprep.subr.mxu0 %v6129_v40  ;;  %2278 = vmatprep.subr.mxu1 %v6130_v42 }
 0x78e   :  { %2208 = vmatpush1.msra.mxu0 %v6131_v48  ;;  %2241 = vmatprep.mubr.f32.mxu0 %v6132_v55 }
 0x78f   :  { %2279 = vmatpush1.msra.mxu1 %v6133_v57  ;;  %2312 = vmatprep.mubr.f32.mxu1 %v6132_v55 }
 0x790   :  { %2509 = vmatprep.subr.mxu1 %v6134_v44 }
 0x82f   :  { %v1982_v53 = vpop.f32.mrf.mxu0  ;;  %v2053_v9 = vpop.f32.mrf.mxu1 }
 0x831   :  { %v1984_v13 = vpop.f32.mrf.mxu0  ;;  %v2055_v43 = vpop.f32.mrf.mxu1 }
 0x832   :  { %v2062_v14 = vcombine.low %v1982_v53, %v1984_v13  ;;  %v2063_v12 = vcombine.low %v2053_v9, %v2055_v43  ;;  %v5489_v43 = vld [vmem:[%s5920_s2 + $0x18] sm:$0xff] }
 0x833   :  { %6141 = vst [vmem:[#allocation18_spill] sm:$0xff] %v5489_v43 }
 0x834   :  { %v2066_v23 = vadd.f32 %v3290_v56, %v2062_v14  ;;  %v2067_v30 = vadd.f32 %v3291_v8, %v2063_v12  ;;  %v5507_v12 = vld [vmem:[%s5920_s2 + $0x8] sm:$0xff] }
 0x835   :  { %6144 = vst [vmem:[#allocation20_spill] sm:$0xff] %v5507_v12 }
 0x836   :  { %v3292_v46 = vmul.f32 -1.442695, %v2066_v23  ;;  %v2075_v54 = vrot.slane %v2066_v23, 4  ;;  %v2085_v19 = vrot.slane %v2067_v30, 4  ;;  %v5484_v23 = vld [vmem:[%s5920_s2 + $0x30] sm:$0xff] }
 0x837   :  { %6140 = vst [vmem:[#allocation13_spill] sm:$0xff] %v5484_v23 }
 0x838   :  { %3487 = vpow2.f32 %v3292_v46  ;;  %v3293_v17 = vmul.f32 -1.442695, %v2075_v54  ;;  %v3294_v16 = vmul.f32 -1.442695, %v2085_v19  ;;  %v5495_v46 = vld [vmem:[%s5920_s2 + $0x20] sm:$0xff]  ;;  %v5501_v54 = vld [vmem:[%s5920_s2 + $0x10] sm:$0xff] }
 0x839   :  { %6142 = vst [vmem:[#allocation5_spill] sm:$0xff] %v5495_v46  ;;  %6143 = vst [vmem:[#allocation17_spill] sm:$0xff] %v5501_v54  ;;  %v3296_v19 = vld [vmem:[%s5921_s0 + $0x80] sm:$0xff] }
 0x83a   :  { %3489 = vpow2.f32 %v3293_v17  ;;  %v5514_v17 = vld [vmem:[%s5920_s2] sm:$0xff] }
 0x83b   :  { %3491 = vpow2.f32 %v3294_v16  ;;  %6145 = vst [vmem:[#allocation11_spill] sm:$0xff] %v5514_v17 }
 0x845   :  { %v3488_v63 = vpop.eup %3487 }
 0x846   :  { %v2071_v2 = vadd.f32 1.0, %v3488_v63 }
 0x847   :  { %v3490_v58 = vpop.eup %3489 }
 0x848   :  { %3493 = vrcp.f32 %v2071_v2  ;;  %v2080_v59 = vadd.f32 1.0, %v3490_v58  ;;  %v3492_v0 = vpop.eup %3491 }
 0x849   :  { %3495 = vtanh.f32 %v2067_v30  ;;  %v2090_v22 = vadd.f32 1.0, %v3492_v0 }
 0x84a   :  { %3497 = vrcp.f32 %v2080_v59 }
 0x84b   :  { %3499 = vrcp.f32 %v2090_v22 }
 0x855   :  { %v3494_v27 = vpop.eup %3493 }
 0x856   :  { %v3496_v31 = vpop.eup %3495 }
 0x857   :  { %v3498_v11 = vpop.eup %3497  ;;  %v2094_v32 = vmul.f32 %v3496_v31, %v3494_v27 }
 0x858   :  { %v2093_v26 = vmul.f32 %v3498_v11, %v1848_v15  ;;  %v3500_v57 = vpop.eup %3499  ;;  %v3297_v11 = vld [vmem:[%s5921_s0 + $0x88] sm:$0xff] }
 0x85a   :  { %v2095_v36 = vadd.f32 %v2094_v32, %v2093_v26 }
 0x85c   :  { %3501 = vtanh.f32 %v2095_v36  ;;  %v2100_v40 = vsub.f32 %v2095_v36, %v1848_v15 }
 0x85e   :  { %v2101_v42 = vmul.f32 %v3295_v38, %v2100_v40 }
 0x860   :  { %v2102_v48 = vadd.f32 %v2101_v42, %v1848_v15 }
 0x862   :  { %2103 = vst [vmem:[#allocation3] sm:$0xf] %v2102_v48 }
 0x869   :  { %v3502_v44 = vpop.eup %3501 }
 0x86a   :  { %v2097_v53 = vmul.f32 %v3502_v44, %v3500_v57 }
 0x86c   :  { %v2104_v9 = vsub.f32 %v2097_v53, %v5196_v62  ;;  %v2109_v53 = vld [vmem:[#allocation3] sm:$0xf] }
 0x86e   :  { %v2105_v56 = vmul.f32 %v3295_v38, %v2104_v9 }
 0x870   :  { %v2106_v13 = vadd.f32 %v2105_v56, %v5196_v62  ;;  %v5445_v62 = vld [vmem:[%s5920_s2 + $0x88] sm:$0xff] }
 0x872   :  { %2107 = vst [vmem:[#allocation2] sm:$0xf] %v2106_v13 }
 0x879   :  { %v5276_v14 = vld [vmem:[#allocation2] sm:$0xf] }
 0x87a   :  { %2242 = vmatmul.mubr.f32.vlgmr.msra.gmra.mxu0 %v5276_v14  ;;  %2313 = vmatmul.mubr.f32.vlgmr.msra.gmra.mxu1 %v5276_v14 }
 0x87b   :  { %2510 = vmatpush1.msra.mxu1 %v5016_v18  ;;  %2502 = vmatprep.mubr.f32.mxu0 %v6132_v55  ;;  %v5313_v18 = vld [vmem:[%s5920_s2 + $0x1e8] sm:$0xff] }
 0x87c   :  { %2511 = vmatprep.subr.mxu1 %v5022_v21  ;;  %2573 = vmatprep.mubr.f32.mxu1 %v6132_v55  ;;  %v5319_v21 = vld [vmem:[%s5920_s2 + $0x1e0] sm:$0xff] }
 0x87d   :  { %2512 = vmatpush1.msra.mxu1 %v5028_v5  ;;  %2438 = vmatprep.subr.mxu0 %v5313_v18  ;;  %v5325_v5 = vld [vmem:[%s5920_s2 + $0x1c8] sm:$0xff] }
 0x87e   :  { %2513 = vmatprep.subr.mxu1 %v5034_v25  ;;  %2439 = vmatpush1.msra.mxu0 %v5319_v21  ;;  %v5331_v25 = vld [vmem:[%s5920_s2 + $0x1c0] sm:$0xff] }
 0x87f   :  { %2514 = vmatpush1.msra.mxu1 %v5040_v29  ;;  %2440 = vmatprep.subr.mxu0 %v5325_v5  ;;  %v5337_v29 = vld [vmem:[%s5920_s2 + $0x1a8] sm:$0xff] }
 0x880   :  { %2515 = vmatprep.subr.mxu1 %v5046_v33  ;;  %2441 = vmatpush1.msra.mxu0 %v5331_v25  ;;  %v5343_v33 = vld [vmem:[%s5920_s2 + $0x1a0] sm:$0xff] }
 0x881   :  { %2516 = vmatpush1.msra.mxu1 %v5052_v35  ;;  %2442 = vmatprep.subr.mxu0 %v5337_v29  ;;  %v5349_v35 = vld [vmem:[%s5920_s2 + $0x188] sm:$0xff] }
 0x882   :  { %2517 = vmatprep.subr.mxu1 %v5058_v37  ;;  %2443 = vmatpush1.msra.mxu0 %v5343_v33  ;;  %v5355_v37 = vld [vmem:[%s5920_s2 + $0x180] sm:$0xff] }
 0x883   :  { %2518 = vmatpush1.msra.mxu1 %v5064_v39  ;;  %2444 = vmatprep.subr.mxu0 %v5349_v35  ;;  %v5361_v39 = vld [vmem:[%s5920_s2 + $0x168] sm:$0xff] }
 0x884   :  { %2519 = vmatprep.subr.mxu1 %v5070_v41  ;;  %2445 = vmatpush1.msra.mxu0 %v5355_v37  ;;  %v5367_v41 = vld [vmem:[%s5920_s2 + $0x160] sm:$0xff] }
 0x885   :  { %2520 = vmatpush1.msra.mxu1 %v5076_v45  ;;  %2446 = vmatprep.subr.mxu0 %v5361_v39  ;;  %v5373_v45 = vld [vmem:[%s5920_s2 + $0x148] sm:$0xff] }
 0x886   :  { %2521 = vmatprep.subr.mxu1 %v5082_v47  ;;  %2447 = vmatpush1.msra.mxu0 %v5367_v41  ;;  %v5379_v47 = vld [vmem:[%s5920_s2 + $0x140] sm:$0xff] }
 0x887   :  { %2522 = vmatpush1.msra.mxu1 %v5088_v49  ;;  %2448 = vmatprep.subr.mxu0 %v5373_v45  ;;  %v5385_v49 = vld [vmem:[%s5920_s2 + $0x128] sm:$0xff] }
 0x888   :  { %2523 = vmatprep.subr.mxu1 %v5094_v51  ;;  %2449 = vmatpush1.msra.mxu0 %v5379_v47  ;;  %v5391_v51 = vld [vmem:[%s5920_s2 + $0x120] sm:$0xff] }
 0x889   :  { %2524 = vmatpush1.msra.mxu1 %v5100_v3  ;;  %2450 = vmatprep.subr.mxu0 %v5385_v49  ;;  %v5397_v3 = vld [vmem:[%s5920_s2 + $0x108] sm:$0xff] }
 0x88a   :  { %2525 = vmatprep.subr.mxu1 %v5106_v1  ;;  %2451 = vmatpush1.msra.mxu0 %v5391_v51  ;;  %v5403_v1 = vld [vmem:[%s5920_s2 + $0x100] sm:$0xff] }
 0x88b   :  { %2526 = vmatpush1.msra.mxu1 %v5112_v52  ;;  %2452 = vmatprep.subr.mxu0 %v5397_v3  ;;  %v5409_v52 = vld [vmem:[%s5920_s2 + $0xe8] sm:$0xff] }
 0x88c   :  { %2527 = vmatprep.subr.mxu1 %v5118_v50  ;;  %2453 = vmatpush1.msra.mxu0 %v5403_v1  ;;  %v5415_v50 = vld [vmem:[%s5920_s2 + $0xe0] sm:$0xff] }
 0x88d   :  { %2528 = vmatpush1.msra.mxu1 %v5124_v6  ;;  %2454 = vmatprep.subr.mxu0 %v5409_v52  ;;  %v5421_v6 = vld [vmem:[%s5920_s2 + $0xc8] sm:$0xff] }
 0x88e   :  { %2529 = vmatprep.subr.mxu1 %v5130_v4  ;;  %2455 = vmatpush1.msra.mxu0 %v5415_v50  ;;  %v5427_v4 = vld [vmem:[%s5920_s2 + $0xc0] sm:$0xff] }
 0x88f   :  { %2530 = vmatpush1.msra.mxu1 %v5136_v61  ;;  %2456 = vmatprep.subr.mxu0 %v5421_v6  ;;  %v5433_v61 = vld [vmem:[%s5920_s2 + $0xa8] sm:$0xff] }
 0x890   :  { %2531 = vmatprep.subr.mxu1 %v5142_v60  ;;  %2457 = vmatpush1.msra.mxu0 %v5427_v4  ;;  %v5439_v60 = vld [vmem:[%s5920_s2 + $0xa0] sm:$0xff] }
 0x891   :  { %2532 = vmatpush1.msra.mxu1 %v6116_v7  ;;  %2458 = vmatprep.subr.mxu0 %v5433_v61  ;;  %v5451_v7 = vld [vmem:[%s5920_s2 + $0x80] sm:$0xff] }
 0x892   :  { %2533 = vmatprep.subr.mxu1 %v6118_v10  ;;  %2459 = vmatpush1.msra.mxu0 %v5439_v60  ;;  %v5457_v10 = vld [vmem:[%s5920_s2 + $0x68] sm:$0xff] }
 0x893   :  { %2534 = vmatpush1.msra.mxu1 %v6120_v20  ;;  %2460 = vmatprep.subr.mxu0 %v5445_v62  ;;  %6135 = vst [vmem:[#allocation7_spill] sm:$0xff] %v5457_v10  ;;  %v5462_v20 = vld [vmem:[%s5920_s2 + $0x60] sm:$0xff] }
 0x894   :  { %2535 = vmatprep.subr.mxu1 %v6122_v24  ;;  %2461 = vmatpush1.msra.mxu0 %v5451_v7  ;;  %6136 = vst [vmem:[#allocation19_spill] sm:$0xff] %v5462_v20  ;;  %v5467_v24 = vld [vmem:[%s5920_s2 + $0x48] sm:$0xff] }
 0x895   :  { %2536 = vmatpush1.msra.mxu1 %v6124_v28  ;;  %6137 = vst [vmem:[#allocation9_spill] sm:$0xff] %v5467_v24  ;;  %2462 = vmatprep.subr.mxu0 %v5457_v10  ;;  %v5473_v28 = vld [vmem:[%s5920_s2 + $0x40] sm:$0xff] }
 0x896   :  { %2537 = vmatprep.subr.mxu1 %v6126_v34  ;;  %6138 = vst [vmem:[#allocation10_spill] sm:$0xff] %v5473_v28  ;;  %2463 = vmatpush1.msra.mxu0 %v5462_v20  ;;  %v5479_v34 = vld [vmem:[%s5920_s2 + $0x28] sm:$0xff] }
 0x897   :  { %6139 = vst [vmem:[#allocation16_spill] sm:$0xff] %v5479_v34  ;;  %2464 = vmatprep.subr.mxu0 %v5467_v24  ;;  %2538 = vmatpush1.msra.mxu1 %v5484_v23 }
 0x898   :  { %2465 = vmatpush1.msra.mxu0 %v5473_v28  ;;  %2539 = vmatprep.subr.mxu1 %v5489_v43 }
 0x899   :  { %2466 = vmatprep.subr.mxu0 %v5479_v34  ;;  %2540 = vmatpush1.msra.mxu1 %v5501_v54 }
 0x89a   :  { %2467 = vmatpush1.msra.mxu0 %v5495_v46 }
 0x89b   :  { %2468 = vmatprep.subr.mxu0 %v5507_v12 }
 0x89c   :  { %2469 = vmatpush1.msra.mxu0 %v5514_v17 }
 0x89d   :  { %2699 = vmatprep.subr.mxu0 %v5313_v18 }
 0x93a   :  { %v2243_v8 = vpop.f32.mrf.mxu0  ;;  %v2314_v30 = vpop.f32.mrf.mxu1 }
 0x93c   :  { %v2245_v16 = vpop.f32.mrf.mxu0  ;;  %v2316_v58 = vpop.f32.mrf.mxu1 }
 0x93d   :  { %v2323_v63 = vcombine.low %v2243_v8, %v2245_v16  ;;  %v2324_v27 = vcombine.low %v2314_v30, %v2316_v58  ;;  %v3301_v30 = vld [vmem:[%s5922_s1 + $0x20] sm:$0xf] }
 0x93f   :  { %v2327_v2 = vadd.f32 %v3296_v19, %v2323_v63  ;;  %v2328_v15 = vadd.f32 %v3297_v11, %v2324_v27 }
 0x941   :  { %v3298_v59 = vmul.f32 -1.442695, %v2327_v2  ;;  %v2336_v0 = vrot.slane %v2327_v2, 4  ;;  %v2346_v22 = vrot.slane %v2328_v15, 4 }
 0x943   :  { %3503 = vpow2.f32 %v3298_v59  ;;  %v3299_v31 = vmul.f32 -1.442695, %v2336_v0  ;;  %v3300_v26 = vmul.f32 -1.442695, %v2346_v22  ;;  %v5582_v22 = vld [vmem:[%s5920_s2 + $0x1d8] sm:$0xff] }
 0x945   :  { %3505 = vpow2.f32 %v3299_v31 }
 0x946   :  { %3507 = vpow2.f32 %v3300_v26  ;;  %v5594_v26 = vld [vmem:[%s5920_s2 + $0x1b8] sm:$0xff] }
 0x950   :  { %v3504_v32 = vpop.eup %3503 }
 0x951   :  { %v2332_v36 = vadd.f32 1.0, %v3504_v32  ;;  %v5600_v32 = vld [vmem:[%s5920_s2 + $0x1b0] sm:$0xff] }
 0x952   :  { %v3506_v38 = vpop.eup %3505 }
 0x953   :  { %3509 = vrcp.f32 %v2332_v36  ;;  %v2341_v40 = vadd.f32 1.0, %v3506_v38  ;;  %v3508_v42 = vpop.eup %3507  ;;  %v5606_v36 = vld [vmem:[%s5920_s2 + $0x198] sm:$0xff]  ;;  %v5612_v38 = vld [vmem:[%s5920_s2 + $0x190] sm:$0xff] }
 0x954   :  { %3511 = vtanh.f32 %v2328_v15  ;;  %v2351_v9 = vadd.f32 1.0, %v3508_v42  ;;  %v5576_v15 = vld [vmem:[%s5920_s2 + $0x1f0] sm:$0xff] }
 0x955   :  { %3513 = vrcp.f32 %v2341_v40  ;;  %v5618_v40 = vld [vmem:[%s5920_s2 + $0x178] sm:$0xff]  ;;  %v5624_v42 = vld [vmem:[%s5920_s2 + $0x170] sm:$0xff] }
 0x956   :  { %3515 = vrcp.f32 %v2351_v9  ;;  %v5654_v9 = vld [vmem:[%s5920_s2 + $0x118] sm:$0xff] }
 0x960   :  { %v3510_v48 = vpop.eup %3509 }
 0x961   :  { %v3512_v57 = vpop.eup %3511 }
 0x962   :  { %v3514_v44 = vpop.eup %3513  ;;  %v2355_v13 = vmul.f32 %v3512_v57, %v3510_v48  ;;  %v5630_v48 = vld [vmem:[%s5920_s2 + $0x158] sm:$0xff]  ;;  %v5636_v57 = vld [vmem:[%s5920_s2 + $0x150] sm:$0xff] }
 0x963   :  { %v2354_v56 = vmul.f32 %v3514_v44, %v2109_v53  ;;  %v3516_v2 = vpop.eup %3515  ;;  %v5642_v44 = vld [vmem:[%s5920_s2 + $0x138] sm:$0xff] }
 0x965   :  { %v2356_v8 = vadd.f32 %v2355_v13, %v2354_v56  ;;  %v5660_v56 = vld [vmem:[%s5920_s2 + $0x110] sm:$0xff]  ;;  %v5666_v13 = vld [vmem:[%s5920_s2 + $0xf8] sm:$0xff] }
 0x967   :  { %3517 = vtanh.f32 %v2356_v8  ;;  %v2361_v19 = vsub.f32 %v2356_v8, %v2109_v53  ;;  %v5672_v8 = vld [vmem:[%s5920_s2 + $0xf0] sm:$0xff] }
 0x969   :  { %v2362_v16 = vmul.f32 %v3301_v30, %v2361_v19  ;;  %v5684_v19 = vld [vmem:[%s5920_s2 + $0xd0] sm:$0xff] }
 0x96b   :  { %v2363_v63 = vadd.f32 %v2362_v16, %v2109_v53  ;;  %v5648_v53 = vld [vmem:[%s5920_s2 + $0x130] sm:$0xff]  ;;  %v5690_v16 = vld [vmem:[%s5920_s2 + $0xb8] sm:$0xff] }
 0x96d   :  { %2364 = vst [vmem:[#allocation3] sm:$0xf] %v2363_v63  ;;  %v5696_v63 = vld [vmem:[%s5920_s2 + $0xb0] sm:$0xff] }
 0x974   :  { %v3518_v58 = vpop.eup %3517 }
 0x975   :  { %v2358_v59 = vmul.f32 %v3518_v58, %v3516_v2  ;;  %v5702_v2 = vld [vmem:[%s5920_s2 + $0x98] sm:$0xff]  ;;  %v5708_v58 = vld [vmem:[%s5920_s2 + $0x90] sm:$0xff] }
 0x976   :  { %6146 = vst [vmem:[#allocation6_spill] sm:$0xff] %v5708_v58 }
 0x977   :  { %v2365_v0 = vsub.f32 %v2358_v59, %v5276_v14  ;;  %v5714_v59 = vld [vmem:[%s5920_s2 + $0x78] sm:$0xff] }
 0x978   :  { %6147 = vst [vmem:[#allocation12_spill] sm:$0xff] %v5714_v59 }
 0x979   :  { %v2366_v27 = vmul.f32 %v3301_v30, %v2365_v0  ;;  %v5678_v30 = vld [vmem:[%s5920_s2 + $0xd8] sm:$0xff]  ;;  %v5719_v0 = vld [vmem:[%s5920_s2 + $0x70] sm:$0xff] }
 0x97a   :  { %6148 = vst [vmem:[#allocation14_spill] sm:$0xff] %v5719_v0 }
 0x97b   :  { %v2367_v31 = vadd.f32 %v2366_v27, %v5276_v14  ;;  %v2698_v14 = vld [vmem:[%s5920_s2 + $0x1f8] sm:$0xff] }
 0x97c   :  { %2770 = vmatprep.subr.mxu1 %v2698_v14  ;;  %v5724_v27 = vld [vmem:[%s5920_s2 + $0x58] sm:$0xff] }
 0x97d   :  { %2368 = vst [vmem:[#allocation2] sm:$0xf] %v2367_v31  ;;  %6149 = vst [vmem:[#allocation15_spill] sm:$0xff] %v5724_v27  ;;  %v5730_v31 = vld [vmem:[%s5920_s2 + $0x50] sm:$0xff] }
 0x97e   :  { %6150 = vst [vmem:[#allocation4_spill] sm:$0xff] %v5730_v31 }
 0x984   :  { %v5532_v11 = vld [vmem:[#allocation2] sm:$0xf] }
 0x985   :  { %2503 = vmatmul.mubr.f32.vlgmr.msra.gmra.mxu0 %v5532_v11  ;;  %2574 = vmatmul.mubr.f32.vlgmr.msra.gmra.mxu1 %v5532_v11 }
 0x986   :  { %2700 = vmatpush1.msra.mxu0 %v5319_v21  ;;  %2763 = vmatprep.mubr.f32.mxu0 %v6132_v55 }
 0x987   :  { %2701 = vmatprep.subr.mxu0 %v5325_v5  ;;  %2834 = vmatprep.mubr.f32.mxu1 %v6132_v55  ;;  %v5736_v55 = vld [vmem:[%s5920_s2 + $0x38] sm:$0xff] }
 0x988   :  { %2702 = vmatpush1.msra.mxu0 %v5331_v25  ;;  %2771 = vmatpush1.msra.mxu1 %v5576_v15  ;;  %6151 = vst [vmem:[#allocation21_spill] sm:$0xff] %v5736_v55 }
 0x989   :  { %2703 = vmatprep.subr.mxu0 %v5337_v29  ;;  %2772 = vmatprep.subr.mxu1 %v5582_v22 }
 0x98a   :  { %2704 = vmatpush1.msra.mxu0 %v5343_v33 }
 0x98b   :  { %2705 = vmatprep.subr.mxu0 %v5349_v35 }
 0x98c   :  { %2706 = vmatpush1.msra.mxu0 %v5355_v37 }
 0x98d   :  { %2707 = vmatprep.subr.mxu0 %v5361_v39 }
 0x98e   :  { %2708 = vmatpush1.msra.mxu0 %v5367_v41 }
 0x98f   :  { %2709 = vmatprep.subr.mxu0 %v5373_v45 }
 0x990   :  { %2710 = vmatpush1.msra.mxu0 %v5379_v47 }
 0x991   :  { %2711 = vmatprep.subr.mxu0 %v5385_v49 }
 0x992   :  { %2712 = vmatpush1.msra.mxu0 %v5391_v51 }
 0x993   :  { %2713 = vmatprep.subr.mxu0 %v5397_v3 }
 0x994   :  { %2714 = vmatpush1.msra.mxu0 %v5403_v1 }
 0x995   :  { %2715 = vmatprep.subr.mxu0 %v5409_v52 }
 0x996   :  { %2716 = vmatpush1.msra.mxu0 %v5415_v50 }
 0x997   :  { %2717 = vmatprep.subr.mxu0 %v5421_v6 }
 0x998   :  { %2718 = vmatpush1.msra.mxu0 %v5427_v4 }
 0x999   :  { %2719 = vmatprep.subr.mxu0 %v5433_v61 }
 0x99a   :  { %2720 = vmatpush1.msra.mxu0 %v5439_v60 }
 0x99b   :  { %2721 = vmatprep.subr.mxu0 %v5445_v62 }
 0x99c   :  { %2722 = vmatpush1.msra.mxu0 %v5451_v7 }
 0x99d   :  { %2723 = vmatprep.subr.mxu0 %v5457_v10 }
 0x99e   :  { %2724 = vmatpush1.msra.mxu0 %v5462_v20 }
 0x99f   :  { %2725 = vmatprep.subr.mxu0 %v5467_v24 }
 0x9a0   :  { %2726 = vmatpush1.msra.mxu0 %v5473_v28 }
 0x9a1   :  { %2727 = vmatprep.subr.mxu0 %v5479_v34 }
 0x9a2   :  { %2728 = vmatpush1.msra.mxu0 %v5495_v46  ;;  %v3302_v46 = vld [vmem:[%s5921_s0 + $0x90] sm:$0xff] }
 0x9a3   :  { %2729 = vmatprep.subr.mxu0 %v5507_v12 }
 0x9a4   :  { %2730 = vmatpush1.msra.mxu0 %v5514_v17 }
 0x9a5   :  { %2960 = vmatprep.subr.mxu0 %v5313_v18  ;;  %v5588_v18 = vld [vmem:[%s5920_s2 + $0x1d0] sm:$0xff] }
 0x9a6   :  { %2773 = vmatpush1.msra.mxu1 %v5588_v18 }
 0x9a7   :  { %2774 = vmatprep.subr.mxu1 %v5594_v26 }
 0x9a8   :  { %2775 = vmatpush1.msra.mxu1 %v5600_v32 }
 0x9a9   :  { %2776 = vmatprep.subr.mxu1 %v5606_v36 }
 0x9aa   :  { %2777 = vmatpush1.msra.mxu1 %v5612_v38 }
 0x9ab   :  { %2778 = vmatprep.subr.mxu1 %v5618_v40 }
 0x9ac   :  { %2779 = vmatpush1.msra.mxu1 %v5624_v42 }
 0x9ad   :  { %2780 = vmatprep.subr.mxu1 %v5630_v48 }
 0x9ae   :  { %2781 = vmatpush1.msra.mxu1 %v5636_v57 }
 0x9af   :  { %2782 = vmatprep.subr.mxu1 %v5642_v44 }
 0x9b0   :  { %2783 = vmatpush1.msra.mxu1 %v5648_v53 }
 0x9b1   :  { %2784 = vmatprep.subr.mxu1 %v5654_v9 }
 0x9b2   :  { %2785 = vmatpush1.msra.mxu1 %v5660_v56 }
 0x9b3   :  { %2786 = vmatprep.subr.mxu1 %v5666_v13 }
 0x9b4   :  { %2787 = vmatpush1.msra.mxu1 %v5672_v8 }
 0x9b5   :  { %2788 = vmatprep.subr.mxu1 %v5678_v30 }
 0x9b6   :  { %2789 = vmatpush1.msra.mxu1 %v5684_v19 }
 0x9b7   :  { %2790 = vmatprep.subr.mxu1 %v5690_v16 }
 0x9b8   :  { %2791 = vmatpush1.msra.mxu1 %v5696_v63 }
 0x9b9   :  { %2792 = vmatprep.subr.mxu1 %v5702_v2 }
 0x9ba   :  { %2793 = vmatpush1.msra.mxu1 %v5708_v58 }
 0x9bb   :  { %2794 = vmatprep.subr.mxu1 %v5714_v59 }
 0x9bc   :  { %2795 = vmatpush1.msra.mxu1 %v5719_v0 }
 0x9bd   :  { %2796 = vmatprep.subr.mxu1 %v5724_v27 }
 0x9be   :  { %2797 = vmatpush1.msra.mxu1 %v5730_v31 }
 0x9bf   :  { %2798 = vmatprep.subr.mxu1 %v5736_v55 }
 0x9c0   :  { %2799 = vmatpush1.msra.mxu1 %v5484_v23 }
 0x9c1   :  { %2800 = vmatprep.subr.mxu1 %v5489_v43 }
 0x9c2   :  { %2801 = vmatpush1.msra.mxu1 %v5501_v54  ;;  %v3303_v54 = vld [vmem:[%s5921_s0 + $0x98] sm:$0xff] }
 0x9c3   :  { %3031 = vmatprep.subr.mxu1 %v2698_v14 }
 0xa45   :  { %v2504_v17 = vpop.f32.mrf.mxu0  ;;  %v2575_v12 = vpop.f32.mrf.mxu1 }
 0xa47   :  { %v2506_v34 = vpop.f32.mrf.mxu0  ;;  %v2577_v24 = vpop.f32.mrf.mxu1 }
 0xa48   :  { %v2584_v28 = vcombine.low %v2504_v17, %v2506_v34  ;;  %v2585_v55 = vcombine.low %v2575_v12, %v2577_v24  ;;  %v2370_v17 = vld [vmem:[#allocation3] sm:$0xf] }
 0xa4a   :  { %v2588_v27 = vadd.f32 %v3302_v46, %v2584_v28  ;;  %v2589_v14 = vadd.f32 %v3303_v54, %v2585_v55  ;;  %v3307_v55 = vld [vmem:[%s5922_s1 + $0x24] sm:$0xf] }
 0xa4c   :  { %v3304_v31 = vmul.f32 -1.442695, %v2588_v27  ;;  %v2597_v0 = vrot.slane %v2588_v27, 4  ;;  %v2607_v43 = vrot.slane %v2589_v14, 4 }
 0xa4e   :  { %3519 = vpow2.f32 %v3304_v31  ;;  %v3305_v23 = vmul.f32 -1.442695, %v2597_v0  ;;  %v3306_v20 = vmul.f32 -1.442695, %v2607_v43 }
 0xa50   :  { %3521 = vpow2.f32 %v3305_v23 }
 0xa51   :  { %3523 = vpow2.f32 %v3306_v20 }
 0xa5b   :  { %v3520_v59 = vpop.eup %3519 }
 0xa5c   :  { %v2593_v10 = vadd.f32 1.0, %v3520_v59 }
 0xa5d   :  { %v3522_v58 = vpop.eup %3521 }
 0xa5e   :  { %3525 = vrcp.f32 %v2593_v10  ;;  %v2602_v28 = vadd.f32 1.0, %v3522_v58  ;;  %v3524_v34 = vpop.eup %3523 }
 0xa5f   :  { %3527 = vtanh.f32 %v2589_v14  ;;  %v2612_v0 = vadd.f32 1.0, %v3524_v34 }
 0xa60   :  { %3529 = vrcp.f32 %v2602_v28 }
 0xa61   :  { %3531 = vrcp.f32 %v2612_v0 }
 0xa6b   :  { %v3526_v24 = vpop.eup %3525 }
 0xa6c   :  { %v3528_v46 = vpop.eup %3527 }
 0xa6d   :  { %v3530_v12 = vpop.eup %3529  ;;  %v2616_v31 = vmul.f32 %v3528_v46, %v3526_v24  ;;  %v3313_v46 = vld [vmem:[%s5922_s1 + $0x28] sm:$0xf] }
 0xa6e   :  { %v2615_v27 = vmul.f32 %v3530_v12, %v2370_v17  ;;  %v3532_v54 = vpop.eup %3531 }
 0xa70   :  { %v2617_v23 = vadd.f32 %v2616_v31, %v2615_v27 }
 0xa72   :  { %3533 = vtanh.f32 %v2617_v23  ;;  %v2622_v20 = vsub.f32 %v2617_v23, %v2370_v17 }
 0xa74   :  { %v2623_v10 = vmul.f32 %v3307_v55, %v2622_v20 }
 0xa76   :  { %v2624_v43 = vadd.f32 %v2623_v10, %v2370_v17 }
 0xa78   :  { %2625 = vst [vmem:[#allocation3] sm:$0xf] %v2624_v43 }
 0xa7f   :  { %v3534_v58 = vpop.eup %3533 }
 0xa80   :  { %v2619_v59 = vmul.f32 %v3534_v58, %v3532_v54  ;;  %v3168_v54 = vld [vmem:[%s5923_s3 + $0x78] sm:$0xff]  ;;  %v3167_v58 = vld [vmem:[%s5923_s3 + $0x70] sm:$0xff] }
 0xa82   :  { %v2626_v14 = vsub.f32 %v2619_v59, %v5532_v11  ;;  %v3166_v59 = vld [vmem:[%s5923_s3 + $0x68] sm:$0xff] }
 0xa84   :  { %v2627_v28 = vmul.f32 %v3307_v55, %v2626_v14  ;;  %v3165_v14 = vld [vmem:[%s5923_s3 + $0x60] sm:$0xff] }
 0xa86   :  { %v2628_v34 = vadd.f32 %v2627_v28, %v5532_v11  ;;  %v3164_v28 = vld [vmem:[%s5923_s3 + $0x58] sm:$0xff] }
 0xa88   :  { %2629 = vst [vmem:[#allocation2] sm:$0xf] %v2628_v34  ;;  %v3163_v34 = vld [vmem:[%s5923_s3 + $0x50] sm:$0xff] }
 0xa8f   :  { %v5755_v24 = vld [vmem:[#allocation2] sm:$0xf] }
 0xa90   :  { %2764 = vmatmul.mubr.f32.vlgmr.msra.gmra.mxu0 %v5755_v24  ;;  %2835 = vmatmul.mubr.f32.vlgmr.msra.gmra.mxu1 %v5755_v24 }
 0xa91   :  { %2961 = vmatpush1.msra.mxu0 %v5319_v21  ;;  %3032 = vmatpush1.msra.mxu1 %v5576_v15  ;;  %v6152_v21 = vld [vmem:[#allocation6_spill] sm:$0xff] }
 0xa92   :  { %2962 = vmatprep.subr.mxu0 %v5325_v5  ;;  %3033 = vmatprep.subr.mxu1 %v5582_v22  ;;  %v6153_v5 = vld [vmem:[#allocation7_spill] sm:$0xff] }
 0xa93   :  { %2963 = vmatpush1.msra.mxu0 %v5331_v25  ;;  %3034 = vmatpush1.msra.mxu1 %v5588_v18  ;;  %v6154_v25 = vld [vmem:[#allocation12_spill] sm:$0xff] }
 0xa94   :  { %2964 = vmatprep.subr.mxu0 %v5337_v29  ;;  %3035 = vmatprep.subr.mxu1 %v5594_v26  ;;  %v6155_v29 = vld [vmem:[#allocation19_spill] sm:$0xff] }
 0xa95   :  { %2965 = vmatpush1.msra.mxu0 %v5343_v33  ;;  %3036 = vmatpush1.msra.mxu1 %v5600_v32  ;;  %v6156_v33 = vld [vmem:[#allocation14_spill] sm:$0xff] }
 0xa96   :  { %2966 = vmatprep.subr.mxu0 %v5349_v35  ;;  %3037 = vmatprep.subr.mxu1 %v5606_v36  ;;  %v6157_v35 = vld [vmem:[#allocation9_spill] sm:$0xff]  ;;  %v3309_v36 = vld [vmem:[%s5921_s0 + $0xa8] sm:$0xff] }
 0xa97   :  { %2967 = vmatpush1.msra.mxu0 %v5355_v37  ;;  %3038 = vmatpush1.msra.mxu1 %v5612_v38  ;;  %v6158_v37 = vld [vmem:[#allocation15_spill] sm:$0xff] }
 0xa98   :  { %2968 = vmatprep.subr.mxu0 %v5361_v39  ;;  %3039 = vmatprep.subr.mxu1 %v5618_v40  ;;  %v6159_v39 = vld [vmem:[#allocation10_spill] sm:$0xff] }
 0xa99   :  { %2969 = vmatpush1.msra.mxu0 %v5367_v41  ;;  %3040 = vmatpush1.msra.mxu1 %v5624_v42  ;;  %v6160_v41 = vld [vmem:[#allocation4_spill] sm:$0xff] }
 0xa9a   :  { %2970 = vmatprep.subr.mxu0 %v5373_v45  ;;  %3041 = vmatprep.subr.mxu1 %v5630_v48  ;;  %v6161_v45 = vld [vmem:[#allocation16_spill] sm:$0xff] }
 0xa9b   :  { %2971 = vmatpush1.msra.mxu0 %v5379_v47  ;;  %3042 = vmatpush1.msra.mxu1 %v5636_v57  ;;  %v6162_v47 = vld [vmem:[#allocation21_spill] sm:$0xff] }
 0xa9c   :  { %2972 = vmatprep.subr.mxu0 %v5385_v49  ;;  %3043 = vmatprep.subr.mxu1 %v5642_v44  ;;  %v6163_v49 = vld [vmem:[#allocation5_spill] sm:$0xff] }
 0xa9d   :  { %2973 = vmatpush1.msra.mxu0 %v5391_v51  ;;  %3044 = vmatpush1.msra.mxu1 %v5648_v53  ;;  %v6164_v51 = vld [vmem:[#allocation13_spill] sm:$0xff] }
 0xa9e   :  { %2974 = vmatprep.subr.mxu0 %v5397_v3  ;;  %3045 = vmatprep.subr.mxu1 %v5654_v9  ;;  %v6165_v3 = vld [vmem:[#allocation20_spill] sm:$0xff] }
 0xa9f   :  { %2975 = vmatpush1.msra.mxu0 %v5403_v1  ;;  %3046 = vmatpush1.msra.mxu1 %v5660_v56  ;;  %v6166_v1 = vld [vmem:[#allocation18_spill] sm:$0xff] }
 0xaa0   :  { %2976 = vmatprep.subr.mxu0 %v5409_v52  ;;  %3047 = vmatprep.subr.mxu1 %v5666_v13  ;;  %v6167_v52 = vld [vmem:[#allocation11_spill] sm:$0xff] }
 0xaa1   :  { %2977 = vmatpush1.msra.mxu0 %v5415_v50  ;;  %3048 = vmatpush1.msra.mxu1 %v5672_v8  ;;  %v6168_v50 = vmov 0.0  }
 0xaa2   :  { %2978 = vmatprep.subr.mxu0 %v5421_v6  ;;  %3049 = vmatprep.subr.mxu1 %v5678_v30  ;;  %v6169_v6 = vld [vmem:[#allocation17_spill] sm:$0xff]  ;;  %v2631_v30 = vld [vmem:[#allocation3] sm:$0xf] }
 0xaa3   :  { %2979 = vmatpush1.msra.mxu0 %v5427_v4  ;;  %3050 = vmatpush1.msra.mxu1 %v5684_v19 }
 0xaa4   :  { %2980 = vmatprep.subr.mxu0 %v5433_v61  ;;  %3051 = vmatprep.subr.mxu1 %v5690_v16 }
 0xaa5   :  { %2981 = vmatpush1.msra.mxu0 %v5439_v60  ;;  %3052 = vmatpush1.msra.mxu1 %v5696_v63  ;;  %v3308_v60 = vld [vmem:[%s5921_s0 + $0xa0] sm:$0xff] }
 0xaa6   :  { %2982 = vmatprep.subr.mxu0 %v5445_v62  ;;  %3053 = vmatprep.subr.mxu1 %v5702_v2 }
 0xaa7   :  { %2983 = vmatpush1.msra.mxu0 %v5451_v7  ;;  %3054 = vmatpush1.msra.mxu1 %v6152_v21  ;;  %v3161_v21 = vld [vmem:[%s5923_s3 + $0x40] sm:$0xff] }
 0xaa8   :  { %2984 = vmatprep.subr.mxu0 %v6153_v5  ;;  %3055 = vmatprep.subr.mxu1 %v6154_v25  ;;  %v3160_v5 = vld [vmem:[%s5923_s3 + $0x38] sm:$0xff]  ;;  %v3159_v25 = vld [vmem:[%s5923_s3 + $0x30] sm:$0xff] }
 0xaa9   :  { %2985 = vmatpush1.msra.mxu0 %v6155_v29  ;;  %3056 = vmatpush1.msra.mxu1 %v6156_v33  ;;  %v3158_v29 = vld [vmem:[%s5923_s3 + $0x28] sm:$0xff]  ;;  %v3157_v33 = vld [vmem:[%s5923_s3 + $0x20] sm:$0xff] }
 0xaaa   :  { %2986 = vmatprep.subr.mxu0 %v6157_v35  ;;  %3057 = vmatprep.subr.mxu1 %v6158_v37  ;;  %v3156_v35 = vld [vmem:[%s5923_s3 + $0x18] sm:$0xff]  ;;  %v3155_v37 = vld [vmem:[%s5923_s3 + $0x10] sm:$0xff] }
 0xaab   :  { %2987 = vmatpush1.msra.mxu0 %v6159_v39  ;;  %3058 = vmatpush1.msra.mxu1 %v6160_v41  ;;  %v3154_v39 = vld [vmem:[%s5923_s3 + $0x8] sm:$0xff]  ;;  %v3153_v41 = vld [vmem:[%s5923_s3] sm:$0xff] }
 0xaac   :  { %2988 = vmatprep.subr.mxu0 %v6161_v45  ;;  %3059 = vmatprep.subr.mxu1 %v6162_v47 }
 0xaad   :  { %2989 = vmatpush1.msra.mxu0 %v6163_v49  ;;  %3060 = vmatpush1.msra.mxu1 %v6164_v51  ;;  %v3314_v49 = vld [vmem:[%s5921_s0 + $0xb0] sm:$0xff] }
 0xaae   :  { %2990 = vmatprep.subr.mxu0 %v6165_v3  ;;  %3061 = vmatprep.subr.mxu1 %v6166_v1 }
 0xaaf   :  { %2991 = vmatpush1.msra.mxu0 %v6167_v52  ;;  %3024 = vmatprep.mubr.f32.mxu0 %v6168_v50 }
 0xab0   :  { %3062 = vmatpush1.msra.mxu1 %v6169_v6  ;;  %3095 = vmatprep.mubr.f32.mxu1 %v6168_v50 }
 0xab1   :  { %3338 = vmatprep.subr.mxu0 %v6168_v50 }
 0xb50   :  { %v2765_v4 = vpop.f32.mrf.mxu0  ;;  %v2836_v61 = vpop.f32.mrf.mxu1 }
 0xb52   :  { %v2767_v62 = vpop.f32.mrf.mxu0  ;;  %v2838_v15 = vpop.f32.mrf.mxu1 }
 0xb53   :  { %v2845_v7 = vcombine.low %v2765_v4, %v2767_v62  ;;  %v2846_v26 = vcombine.low %v2836_v61, %v2838_v15  ;;  %v3315_v62 = vld [vmem:[%s5921_s0 + $0xb8] sm:$0xff] }
 0xb55   :  { %v2849_v11 = vadd.f32 %v3308_v60, %v2845_v7  ;;  %v2850_v38 = vadd.f32 %v3309_v36, %v2846_v26 }
 0xb57   :  { %v3310_v22 = vmul.f32 -1.442695, %v2849_v11  ;;  %v2858_v18 = vrot.slane %v2849_v11, 4  ;;  %v2868_v40 = vrot.slane %v2850_v38, 4 }
 0xb59   :  { %3535 = vpow2.f32 %v3310_v22  ;;  %v3311_v32 = vmul.f32 -1.442695, %v2858_v18  ;;  %v3312_v42 = vmul.f32 -1.442695, %v2868_v40 }
 0xb5b   :  { %3537 = vpow2.f32 %v3311_v32 }
 0xb5c   :  { %3539 = vpow2.f32 %v3312_v42 }
 0xb66   :  { %v3536_v48 = vpop.eup %3535 }
 0xb67   :  { %v2854_v57 = vadd.f32 1.0, %v3536_v48 }
 0xb68   :  { %v3538_v44 = vpop.eup %3537 }
 0xb69   :  { %3541 = vrcp.f32 %v2854_v57  ;;  %v2863_v53 = vadd.f32 1.0, %v3538_v44  ;;  %v3540_v9 = vpop.eup %3539 }
 0xb6a   :  { %3543 = vtanh.f32 %v2850_v38  ;;  %v2873_v19 = vadd.f32 1.0, %v3540_v9  ;;  %v3319_v9 = vld [vmem:[%s5922_s1 + $0x2c] sm:$0xf] }
 0xb6b   :  { %3545 = vrcp.f32 %v2863_v53 }
 0xb6c   :  { %3547 = vrcp.f32 %v2873_v19 }
 0xb76   :  { %v3542_v56 = vpop.eup %3541 }
 0xb77   :  { %v3544_v13 = vpop.eup %3543 }
 0xb78   :  { %v3546_v8 = vpop.eup %3545  ;;  %v2877_v63 = vmul.f32 %v3544_v13, %v3542_v56 }
 0xb79   :  { %v2876_v16 = vmul.f32 %v3546_v8, %v2631_v30  ;;  %v3548_v27 = vpop.eup %3547 }
 0xb7b   :  { %v2878_v2 = vadd.f32 %v2877_v63, %v2876_v16 }
 0xb7d   :  { %3549 = vtanh.f32 %v2878_v2  ;;  %v2883_v12 = vsub.f32 %v2878_v2, %v2631_v30 }
 0xb7f   :  { %v2884_v17 = vmul.f32 %v3313_v46, %v2883_v12 }
 0xb81   :  { %v2885_v0 = vadd.f32 %v2884_v17, %v2631_v30  ;;  %v3320_v17 = vld [vmem:[%s5924_s4] ss:$0 sm:$0xff] }
 0xb83   :  { %2886 = vst [vmem:[#allocation3] sm:$0xf] %v2885_v0 }
 0xb8a   :  { %v3550_v31 = vpop.eup %3549  ;;  %v2892_v42 = vld [vmem:[#allocation3] sm:$0xf] }
 0xb8b   :  { %v2880_v23 = vmul.f32 %v3550_v31, %v3548_v27 }
 0xb8d   :  { %v2887_v55 = vsub.f32 %v2880_v23, %v5755_v24 }
 0xb8f   :  { %v2888_v20 = vmul.f32 %v3313_v46, %v2887_v55 }
 0xb91   :  { %v2889_v10 = vadd.f32 %v2888_v20, %v5755_v24  ;;  %v3162_v24 = vld [vmem:[%s5923_s3 + $0x48] sm:$0xff] }
 0xb93   :  { %2890 = vst [vmem:[#allocation2] sm:$0xf] %v2889_v10 }
 0xb9a   :  { %v5835_v43 = vld [vmem:[#allocation2] sm:$0xf] }
 0xb9b   :  { %3025 = vmatmul.mubr.f32.vlgmr.msra.gmra.mxu0 %v5835_v43  ;;  %3096 = vmatmul.mubr.f32.vlgmr.msra.gmra.mxu1 %v5835_v43 }
 0xb9c   :  { %3339 = vmatpush3.msra.mxu0 %v3168_v54  ;;  %3370 = vmatprep.mubr.msk.f32.mxu0 %vm3568_vm0, %v6168_v50 }
 0xb9d   :  { %3340 = vmatprep.subr.mxu0 %v6168_v50 }
 0xb9e   :  { %3341 = vmatpush3.msra.mxu0 %v3167_v58 }
 0xb9f   :  { %3342 = vmatprep.subr.mxu0 %v6168_v50 }
 0xba0   :  { %3343 = vmatpush3.msra.mxu0 %v3166_v59 }
 0xba1   :  { %3344 = vmatprep.subr.mxu0 %v6168_v50 }
 0xba2   :  { %3345 = vmatpush3.msra.mxu0 %v3165_v14 }
 0xba3   :  { %3346 = vmatprep.subr.mxu0 %v6168_v50 }
 0xba4   :  { %3347 = vmatpush3.msra.mxu0 %v3164_v28 }
 0xba5   :  { %3348 = vmatprep.subr.mxu0 %v6168_v50 }
 0xba6   :  { %3349 = vmatpush3.msra.mxu0 %v3163_v34 }
 0xba7   :  { %3350 = vmatprep.subr.mxu0 %v6168_v50 }
 0xba8   :  { %3351 = vmatpush3.msra.mxu0 %v3162_v24 }
 0xba9   :  { %3352 = vmatprep.subr.mxu0 %v6168_v50 }
 0xbaa   :  { %3353 = vmatpush3.msra.mxu0 %v3161_v21 }
 0xbab   :  { %3354 = vmatprep.subr.mxu0 %v6168_v50 }
 0xbac   :  { %3355 = vmatpush3.msra.mxu0 %v3160_v5 }
 0xbad   :  { %3356 = vmatprep.subr.mxu0 %v6168_v50 }
 0xbae   :  { %3357 = vmatpush3.msra.mxu0 %v3159_v25 }
 0xbaf   :  { %3358 = vmatprep.subr.mxu0 %v6168_v50 }
 0xbb0   :  { %3359 = vmatpush3.msra.mxu0 %v3158_v29 }
 0xbb1   :  { %3360 = vmatprep.subr.mxu0 %v6168_v50 }
 0xbb2   :  { %3361 = vmatpush3.msra.mxu0 %v3157_v33 }
 0xbb3   :  { %3362 = vmatprep.subr.mxu0 %v6168_v50 }
 0xbb4   :  { %3363 = vmatpush3.msra.mxu0 %v3156_v35 }
 0xbb5   :  { %3364 = vmatprep.subr.mxu0 %v6168_v50 }
 0xbb6   :  { %3365 = vmatpush3.msra.mxu0 %v3155_v37 }
 0xbb7   :  { %3366 = vmatprep.subr.mxu0 %v6168_v50 }
 0xbb8   :  { %3367 = vmatpush3.msra.mxu0 %v3154_v39 }
 0xbb9   :  { %3368 = vmatprep.subr.mxu0 %v6168_v50 }
 0xbba   :  { %3369 = vmatpush3.msra.mxu0 %v3153_v41 }
 0xc5b   :  { %v3026_v45 = vpop.f32.mrf.mxu0  ;;  %v3097_v47 = vpop.f32.mrf.mxu1 }
 0xc5d   :  { %v3028_v51 = vpop.f32.mrf.mxu0  ;;  %v3099_v52 = vpop.f32.mrf.mxu1 }
 0xc5e   :  { %v3106_v3 = vcombine.low %v3026_v45, %v3028_v51  ;;  %v3107_v61 = vcombine.low %v3097_v47, %v3099_v52 }
 0xc60   :  { %v3110_v1 = vadd.f32 %v3314_v49, %v3106_v3  ;;  %v3111_v50 = vadd.f32 %v3315_v62, %v3107_v61 }
 0xc62   :  { %v3316_v6 = vmul.f32 -1.442695, %v3110_v1  ;;  %v3119_v4 = vrot.slane %v3110_v1, 4  ;;  %v3129_v7 = vrot.slane %v3111_v50, 4 }
 0xc64   :  { %3551 = vpow2.f32 %v3316_v6  ;;  %v3317_v60 = vmul.f32 -1.442695, %v3119_v4  ;;  %v3318_v11 = vmul.f32 -1.442695, %v3129_v7 }
 0xc66   :  { %3553 = vpow2.f32 %v3317_v60 }
 0xc67   :  { %3555 = vpow2.f32 %v3318_v11 }
 0xc71   :  { %v3552_v15 = vpop.eup %3551 }
 0xc72   :  { %v3115_v22 = vadd.f32 1.0, %v3552_v15 }
 0xc73   :  { %v3554_v18 = vpop.eup %3553 }
 0xc74   :  { %3557 = vrcp.f32 %v3115_v22  ;;  %v3124_v26 = vadd.f32 1.0, %v3554_v18  ;;  %v3556_v32 = vpop.eup %3555 }
 0xc75   :  { %3559 = vtanh.f32 %v3111_v50  ;;  %v3134_v48 = vadd.f32 1.0, %v3556_v32 }
 0xc76   :  { %3561 = vrcp.f32 %v3124_v26 }
 0xc77   :  { %3563 = vrcp.f32 %v3134_v48 }
 0xc81   :  { %v3558_v36 = vpop.eup %3557 }
 0xc82   :  { %v3560_v38 = vpop.eup %3559 }
 0xc83   :  { %v3562_v40 = vpop.eup %3561  ;;  %v3138_v44 = vmul.f32 %v3560_v38, %v3558_v36 }
 0xc84   :  { %v3137_v57 = vmul.f32 %v3562_v40, %v2892_v42  ;;  %v3564_v30 = vpop.eup %3563 }
 0xc86   :  { %v3139_v53 = vadd.f32 %v3138_v44, %v3137_v57 }
 0xc88   :  { %3565 = vtanh.f32 %v3139_v53  ;;  %v3144_v56 = vsub.f32 %v3139_v53, %v2892_v42 }
 0xc8a   :  { %v3145_v13 = vmul.f32 %v3319_v9, %v3144_v56 }
 0xc8c   :  { %v3146_v8 = vadd.f32 %v3145_v13, %v2892_v42 }
 0xc8e   :  { %3147 = vst [vmem:[#allocation3] sm:$0xf] %v3146_v8 }
 0xc95   :  { %v3566_v19 = vpop.eup %3565  ;;  %v3152_v16 = vld [vmem:[#allocation3] sm:$0xf] }
 0xc96   :  { %v3141_v63 = vmul.f32 %v3566_v19, %v3564_v30  ;;  %3371 = vmatmul.mubr.f32.vlgmr.msra.gmra.mxu0 %v3152_v16 }
 0xc98   :  { %v3148_v2 = vsub.f32 %v3141_v63, %v5835_v43 }
 0xc9a   :  { %v3149_v46 = vmul.f32 %v3319_v9, %v3148_v2 }
 0xc9c   :  { %v3150_v12 = vadd.f32 %v3149_v46, %v5835_v43 }
 0xc9e   :  { %3151 = vst [vmem:[#allocation2] sm:$0xf] %v3150_v12 }
 0xd56   :  { %v3242_v0 = vpop.f32.mrf.mxu0 }
 0xd57   :  { %v3243_v27 = vadd.f32 %v3320_v17, %v3242_v0 }
 0xd58   :  { %v3372_v31 = vpop.f32.mrf.mxu0 }
 0xd59   :  { %3246 = vst [vmem:[%s5925_s5] sm:$0xf] %v3243_v27 }

</bundles_post_ra>
